<compile_context>
chip_gen: v6e
topology: v6e:2x2x1
jax: 0.10.0
libtpu: 0.0.40
codegen_flags: <defaults>
</compile_context>

<pallas_src>
import functools

import jax
import jax.numpy as jnp
from jax import lax
from jax.experimental import pallas as pl
from jax.experimental.pallas import tpu as pltpu

LANE = 128   # channel dims padded to multiples of the TPU lane width
LPAD = 8     # left W-halo width of the mid scratch (multiple of 8 sublanes so
             # the interior store is full-tile aligned -> no masked RMW stores)


def _round_up(n, m):
    return ((n + m - 1) // m) * m


def _im2col_taps(blk, th, w, c, col0):
    """Build the (th*w, 9*c) im2col matrix for a 3x3 / stride-1 conv.

    blk: (th+2, >=col0+w+2, c) spatially zero-padded block; output pixel (i, j)
    of the block corresponds to blk[i+1, col0+1+j].  Tap order is k = dy*3+dx,
    channel-minor, matching the packed weight layout.  Each shifted view is
    materialized exactly once and the 9 views are fused along the lane axis
    (every piece is a 128-multiple wide, so the concat is lane-aligned).
    """
    cols = []
    for dy in range(3):
        band = blk[dy:dy + th]                                  # (th, _, c)
        for dx in range(3):
            cols.append(band[:, col0 + dx:col0 + dx + w, :].reshape(th * w, c))
    return jnp.concatenate(cols, axis=1)                        # (th*w, 9*c)


def double_conv_kernel(x_ref, w1_ref, b1_ref, w2_ref, b2_ref, out_ref, mid_ref,
                       *, H, W, TH):
    # x_ref  : (1, H+2, W+2, Cpi)        bf16 padded input, one batch element
    # w1_ref : (9*Cpi, Cpm)              bf16 conv1 weights, im2col (tap-major)
    # b1_ref : (1, Cpm)                  f32
    # w2_ref : (9*Cpm, Cpo)              bf16 conv2 weights, im2col (tap-major)
    # b2_ref : (1, Cpo)                  f32
    # out_ref: (1, H, W, Cpo)            f32, lane-dense (Cpo % 128 == 0)
    # mid_ref: (H+2, LPAD+W+8, Cpm)      bf16 scratch for relu(conv1); interior
    #                                    lives at [1:H+1, LPAD:LPAD+W)
    Cpi = x_ref.shape[3]
    Cpm = mid_ref.shape[2]
    Cpo = out_ref.shape[3]
    mwid = mid_ref.shape[1]
    cdt = mid_ref.dtype                      # MXU operand dtype (bf16)

    w1 = w1_ref[...]
    w2 = w2_ref[...]
    b1 = b1_ref[...]
    b2 = b2_ref[...]

    # Zero only the halo of the mid scratch (all stores are tile-aligned).  The
    # interior [1:H+1, LPAD:LPAD+W) is fully overwritten below, so no
    # full-buffer zero fill and no masked read-modify-write stores.  This runs
    # every grid step (cheap: halo only), which keeps it correct if the batch
    # axis is sharded across TensorCores.
    zrow = jnp.zeros((1, mwid, Cpm), cdt)
    mid_ref[0:1, :, :] = zrow
    mid_ref[H + 1:H + 2, :, :] = zrow
    mid_ref[:, 0:LPAD, :] = jnp.zeros((H + 2, LPAD, Cpm), cdt)
    mid_ref[:, LPAD + W:LPAD + W + 8, :] = jnp.zeros((H + 2, 8, Cpm), cdt)

    # ---- conv1 -> bias -> ReLU, row blocks of TH output rows ----
    for r in range(0, H, TH):
        xblk = x_ref[0, r:r + TH + 2, :, :]                     # (TH+2, W+2, Cpi)
        patch = _im2col_taps(xblk, TH, W, Cpi, 0)               # (TH*W, 9*Cpi)
        acc = jnp.dot(patch, w1, preferred_element_type=jnp.float32)
        acc = jnp.maximum(acc + b1, 0.0)                        # bias + ReLU
        # Interior starts at sublane offset LPAD=8 -> full-tile aligned store.
        mid_ref[r + 1:r + TH + 1, LPAD:LPAD + W, :] = (
            acc.astype(cdt).reshape(TH, W, Cpm))

    # ---- conv2 -> bias, row blocks of TH output rows ----
    for r in range(0, H, TH):
        mblk = mid_ref[r:r + TH + 2, :, :]                      # (TH+2, mwid, Cpm)
        patch = _im2col_taps(mblk, TH, W, Cpm, LPAD - 1)        # (TH*W, 9*Cpm)
        acc = jnp.dot(patch, w2, preferred_element_type=jnp.float32) + b2
        out_ref[0, r:r + TH, :, :] = acc.reshape(TH, W, Cpo).astype(out_ref.dtype)


def double_conv(x_nchw, w1_oihw, b1, w2_oihw, b2, *,
                compute_dtype=jnp.bfloat16, block_rows=8):
    """DoubleConv forward (activation='relu').

    x_nchw: (B, Cin, H, W) float32 (PyTorch layout). Returns (B, Cout, H, W).
    """
    B, Cin, H, W = x_nchw.shape
    Cmid = w1_oihw.shape[0]
    Cout = w2_oihw.shape[0]

    Cpi = _round_up(Cin, LANE)
    Cpm = _round_up(Cmid, LANE)
    Cpo = _round_up(Cout, LANE)
    th = block_rows if H % block_rows == 0 else H
    Hp, Wp = H + 2, W + 2
    mwid = LPAD + W + 8

    # TODO(synk): keep activations NHWC end-to-end in the surrounding model to
    # drop these NCHW<->NHWC transposes (HBM round trips outside the kernel).
    x_nhwc = jnp.transpose(x_nchw, (0, 2, 3, 1))
    x_pad = jnp.pad(x_nhwc, ((0, 0), (1, 1), (1, 1), (0, Cpi - Cin)))
    x_pad = x_pad.astype(compute_dtype)

    def pack_w(w_oihw, ci, cip, cop):
        co = w_oihw.shape[0]
        w = jnp.transpose(w_oihw, (2, 3, 1, 0))                 # (3,3,Ci,Co)
        w = jnp.pad(w, ((0, 0), (0, 0), (0, cip - ci), (0, cop - co)))
        return w.reshape(9 * cip, cop).astype(compute_dtype)

    w1_k = pack_w(w1_oihw, Cin, Cpi, Cpm)                       # (9*Cpi, Cpm)
    w2_k = pack_w(w2_oihw, Cmid, Cpm, Cpo)                      # (9*Cpm, Cpo)
    b1_p = jnp.pad(b1, (0, Cpm - Cmid)).reshape(1, Cpm).astype(jnp.float32)
    b2_p = jnp.pad(b2, (0, Cpo - Cout)).reshape(1, Cpo).astype(jnp.float32)

    kernel = functools.partial(double_conv_kernel, H=H, W=W, TH=th)

    # TODO(synk): for UNet-scale images add an H-tiled grid axis with 1-row halo
    # (overlapping blocks via manual make_async_copy) so blocks fit v7x's 64 MiB
    # VMEM and both v7x TensorCores stay busy when B is 1 or odd.
    out_nhwc = pl.pallas_call(
        kernel,
        out_shape=jax.ShapeDtypeStruct((B, H, W, Cpo), jnp.float32),
        grid_spec=pltpu.PrefetchScalarGridSpec(
            num_scalar_prefetch=0,
            grid=(B,),
            in_specs=[
                pl.BlockSpec((1, Hp, Wp, Cpi), lambda b: (b, 0, 0, 0)),
                pl.BlockSpec((9 * Cpi, Cpm), lambda b: (0, 0)),
                pl.BlockSpec((1, Cpm), lambda b: (0, 0)),
                pl.BlockSpec((9 * Cpm, Cpo), lambda b: (0, 0)),
                pl.BlockSpec((1, Cpo), lambda b: (0, 0)),
            ],
            out_specs=pl.BlockSpec((1, H, W, Cpo), lambda b: (b, 0, 0, 0)),
            scratch_shapes=[pltpu.VMEM((Hp, mwid, Cpm), compute_dtype)],
        ),
        compiler_params=pltpu.CompilerParams(
            dimension_semantics=("parallel",),
            vmem_limit_bytes=64 << 20),
    )(x_pad, w1_k, b1_p, w2_k, b2_p)

    # Drop channel padding, back to PyTorch NCHW.
    return jnp.transpose(out_nhwc[..., :Cout], (0, 3, 1, 2))


def _reference(x_nchw, w1, b1, w2, b2):
    """Plain-JAX f32 reference (mirrors torch.nn.Conv2d semantics, NCHW/OIHW)."""
    dn = ("NCHW", "OIHW", "NCHW")
    y = lax.conv_general_dilated(x_nchw, w1, (1, 1), ((1, 1), (1, 1)),
                                 dimension_numbers=dn)
    y = y + b1[None, :, None, None]
    y = jnp.maximum(y, 0.0)
    y = lax.conv_general_dilated(y, w2, (1, 1), ((1, 1), (1, 1)),
                                 dimension_numbers=dn)
    return y + b2[None, :, None, None]


if __name__ == "__main__":
    B, Cin, H, W = 2, 4, 16, 16
    Cout = 8
    Cmid = Cout  # DoubleConv default: mid_channels = out_channels

    key = jax.random.PRNGKey(0)
    kx, k1, kb1, k2, kb2 = jax.random.split(key, 5)

    x = jax.random.normal(kx, (B, Cin, H, W), jnp.float32)
    # Deterministic synthetic parameters (shapes match nn.Conv2d weights/biases).
    w1 = jax.random.normal(k1, (Cmid, Cin, 3, 3), jnp.float32) * 0.1
    b1 = jax.random.normal(kb1, (Cmid,), jnp.float32) * 0.1
    w2 = jax.random.normal(k2, (Cout, Cmid, 3, 3), jnp.float32) * 0.1
    b2 = jax.random.normal(kb2, (Cout,), jnp.float32) * 0.1

    out = jax.block_until_ready(double_conv(x, w1, b1, w2, b2))
    ref = jax.block_until_ready(_reference(x, w1, b1, w2, b2))

    assert out.shape == (B, Cout, H, W)
    # bf16 MXU operands (f32 accumulation) -> compare against the pure-f32
    # reference with a bf16-level tolerance.
    max_err = float(jnp.max(jnp.abs(out - ref)))
    assert jnp.allclose(out, ref, atol=5e-2, rtol=5e-2), max_err

    print("KERNEL_OK")
</pallas_src>

<mosaic_0001>
module attributes {stable_mosaic.version = 11 : i64} {
  func.func @double_conv_kernel(%arg0: i32, %arg1: memref<1x18x18x128xbf16, #tpu.memory_space<vmem>>, %arg2: memref<1152x128xbf16, #tpu.memory_space<vmem>>, %arg3: memref<1x128xf32, #tpu.memory_space<vmem>>, %arg4: memref<1152x128xbf16, #tpu.memory_space<vmem>>, %arg5: memref<1x128xf32, #tpu.memory_space<vmem>>, %arg6: memref<1x16x16x128xf32, #tpu.memory_space<vmem>>, %arg7: memref<18x32x128xbf16, #tpu.memory_space<vmem>>) attributes {dimension_semantics = [#tpu.dimension_semantics<parallel>], iteration_bounds = array<i64: 2>, scalar_prefetch = 0 : i64, scratch_operands = 1 : i64, tpu.core_type = #tpu.core_type<tc>, window_params = [{transform_indices = @transform_0, window_bounds = array<i64: 1, 18, 18, 128>}, {pipeline_mode = #tpu.pipeline_mode<synchronous>, transform_indices = @transform_1, window_bounds = array<i64: 1152, 128>}, {pipeline_mode = #tpu.pipeline_mode<synchronous>, transform_indices = @transform_2, window_bounds = array<i64: 1, 128>}, {pipeline_mode = #tpu.pipeline_mode<synchronous>, transform_indices = @transform_3, window_bounds = array<i64: 1152, 128>}, {pipeline_mode = #tpu.pipeline_mode<synchronous>, transform_indices = @transform_4, window_bounds = array<i64: 1, 128>}, {transform_indices = @transform_5, window_bounds = array<i64: 1, 16, 16, 128>}]} {
    %c0 = arith.constant 0 : index
    %c0_0 = arith.constant 0 : index
    %0 = vector.load %arg2[%c0, %c0_0] : memref<1152x128xbf16, #tpu.memory_space<vmem>>, vector<1152x128xbf16>
    %c0_1 = arith.constant 0 : index
    %c0_2 = arith.constant 0 : index
    %1 = vector.load %arg4[%c0_1, %c0_2] : memref<1152x128xbf16, #tpu.memory_space<vmem>>, vector<1152x128xbf16>
    %c0_3 = arith.constant 0 : index
    %c0_4 = arith.constant 0 : index
    %2 = vector.load %arg3[%c0_3, %c0_4] : memref<1x128xf32, #tpu.memory_space<vmem>>, vector<1x128xf32>
    %c0_5 = arith.constant 0 : index
    %c0_6 = arith.constant 0 : index
    %3 = vector.load %arg5[%c0_5, %c0_6] : memref<1x128xf32, #tpu.memory_space<vmem>>, vector<1x128xf32>
    %cst = arith.constant 0.000000e+00 : bf16
    %4 = vector.broadcast %cst : bf16 to vector<1x32x128xbf16>
    %c0_7 = arith.constant 0 : index
    %c0_8 = arith.constant 0 : index
    %c0_9 = arith.constant 0 : index
    %5 = vector.load %arg7[%c0_7, %c0_8, %c0_9] : memref<18x32x128xbf16, #tpu.memory_space<vmem>>, vector<1x32x128xbf16>
    tpu.vector_store %arg7[%c0_7, %c0_8, %c0_9], %4 {strides = array<i32>} : memref<18x32x128xbf16, #tpu.memory_space<vmem>>, vector<1x32x128xbf16>,
    %c17 = arith.constant 17 : index
    %c0_10 = arith.constant 0 : index
    %c0_11 = arith.constant 0 : index
    %6 = vector.load %arg7[%c17, %c0_10, %c0_11] : memref<18x32x128xbf16, #tpu.memory_space<vmem>>, vector<1x32x128xbf16>
    tpu.vector_store %arg7[%c17, %c0_10, %c0_11], %4 {strides = array<i32>} : memref<18x32x128xbf16, #tpu.memory_space<vmem>>, vector<1x32x128xbf16>,
    %cst_12 = arith.constant 0.000000e+00 : bf16
    %7 = vector.broadcast %cst_12 : bf16 to vector<18x8x128xbf16>
    %c0_13 = arith.constant 0 : index
    %c0_14 = arith.constant 0 : index
    %c0_15 = arith.constant 0 : index
    %8 = vector.load %arg7[%c0_13, %c0_14, %c0_15] : memref<18x32x128xbf16, #tpu.memory_space<vmem>>, vector<18x8x128xbf16>
    tpu.vector_store %arg7[%c0_13, %c0_14, %c0_15], %7 {strides = array<i32>} : memref<18x32x128xbf16, #tpu.memory_space<vmem>>, vector<18x8x128xbf16>,
    %cst_16 = arith.constant 0.000000e+00 : bf16
    %9 = vector.broadcast %cst_16 : bf16 to vector<18x8x128xbf16>
    %c0_17 = arith.constant 0 : index
    %c24 = arith.constant 24 : index
    %c0_18 = arith.constant 0 : index
    %10 = vector.load %arg7[%c0_17, %c24, %c0_18] : memref<18x32x128xbf16, #tpu.memory_space<vmem>>, vector<18x8x128xbf16>
    tpu.vector_store %arg7[%c0_17, %c24, %c0_18], %9 {strides = array<i32>} : memref<18x32x128xbf16, #tpu.memory_space<vmem>>, vector<18x8x128xbf16>,
    %c0_19 = arith.constant 0 : index
    %c0_20 = arith.constant 0 : index
    %c0_21 = arith.constant 0 : index
    %c0_22 = arith.constant 0 : index
    %11 = vector.load %arg1[%c0_19, %c0_20, %c0_21, %c0_22] : memref<1x18x18x128xbf16, #tpu.memory_space<vmem>>, vector<1x10x18x128xbf16>
    %12 = vector.shape_cast %11 : vector<1x10x18x128xbf16> to vector<10x18x128xbf16>
    %13 = vector.extract_strided_slice %12 {offsets = [0, 0, 0], sizes = [8, 18, 128], strides = [1, 1, 1]} : vector<10x18x128xbf16> to vector<8x18x128xbf16>
    %14 = vector.extract_strided_slice %13 {offsets = [0, 0, 0], sizes = [8, 16, 128], strides = [1, 1, 1]} : vector<8x18x128xbf16> to vector<8x16x128xbf16>
    %15 = vector.shape_cast %14 : vector<8x16x128xbf16> to vector<128x128xbf16>
    %16 = vector.extract_strided_slice %13 {offsets = [0, 1, 0], sizes = [8, 16, 128], strides = [1, 1, 1]} : vector<8x18x128xbf16> to vector<8x16x128xbf16>
    %17 = vector.shape_cast %16 : vector<8x16x128xbf16> to vector<128x128xbf16>
    %18 = vector.extract_strided_slice %13 {offsets = [0, 2, 0], sizes = [8, 16, 128], strides = [1, 1, 1]} : vector<8x18x128xbf16> to vector<8x16x128xbf16>
    %19 = vector.shape_cast %18 : vector<8x16x128xbf16> to vector<128x128xbf16>
    %20 = vector.extract_strided_slice %12 {offsets = [1, 0, 0], sizes = [8, 18, 128], strides = [1, 1, 1]} : vector<10x18x128xbf16> to vector<8x18x128xbf16>
    %21 = vector.extract_strided_slice %20 {offsets = [0, 0, 0], sizes = [8, 16, 128], strides = [1, 1, 1]} : vector<8x18x128xbf16> to vector<8x16x128xbf16>
    %22 = vector.shape_cast %21 : vector<8x16x128xbf16> to vector<128x128xbf16>
    %23 = vector.extract_strided_slice %20 {offsets = [0, 1, 0], sizes = [8, 16, 128], strides = [1, 1, 1]} : vector<8x18x128xbf16> to vector<8x16x128xbf16>
    %24 = vector.shape_cast %23 : vector<8x16x128xbf16> to vector<128x128xbf16>
    %25 = vector.extract_strided_slice %20 {offsets = [0, 2, 0], sizes = [8, 16, 128], strides = [1, 1, 1]} : vector<8x18x128xbf16> to vector<8x16x128xbf16>
    %26 = vector.shape_cast %25 : vector<8x16x128xbf16> to vector<128x128xbf16>
    %27 = vector.extract_strided_slice %12 {offsets = [2, 0, 0], sizes = [8, 18, 128], strides = [1, 1, 1]} : vector<10x18x128xbf16> to vector<8x18x128xbf16>
    %28 = vector.extract_strided_slice %27 {offsets = [0, 0, 0], sizes = [8, 16, 128], strides = [1, 1, 1]} : vector<8x18x128xbf16> to vector<8x16x128xbf16>
    %29 = vector.shape_cast %28 : vector<8x16x128xbf16> to vector<128x128xbf16>
    %30 = vector.extract_strided_slice %27 {offsets = [0, 1, 0], sizes = [8, 16, 128], strides = [1, 1, 1]} : vector<8x18x128xbf16> to vector<8x16x128xbf16>
    %31 = vector.shape_cast %30 : vector<8x16x128xbf16> to vector<128x128xbf16>
    %32 = vector.extract_strided_slice %27 {offsets = [0, 2, 0], sizes = [8, 16, 128], strides = [1, 1, 1]} : vector<8x18x128xbf16> to vector<8x16x128xbf16>
    %33 = vector.shape_cast %32 : vector<8x16x128xbf16> to vector<128x128xbf16>
    %34 = tpu.concatenate %15, %17, %19, %22, %24, %26, %29, %31, %33 in 1 : vector<128x128xbf16>, vector<128x128xbf16>, vector<128x128xbf16>, vector<128x128xbf16>, vector<128x128xbf16>, vector<128x128xbf16>, vector<128x128xbf16>, vector<128x128xbf16>, vector<128x128xbf16> -> vector<128x1152xbf16>
    %cst_23 = arith.constant dense<0.000000e+00> : vector<128x128xf32>
    %35 = tpu.matmul %34, %0, %cst_23 {dimension_numbers = #tpu.dot_dimension_numbers<[1], [0], [0], [1], [0, 0, 1, 1], [], []>} : vector<128x1152xbf16>, vector<1152x128xbf16>, vector<128x128xf32> -> vector<128x128xf32>
    %36 = vector.broadcast %2 : vector<1x128xf32> to vector<128x128xf32>
    %37 = arith.addf %35, %36 : vector<128x128xf32>
    %cst_24 = arith.constant 0.000000e+00 : f32
    %38 = vector.broadcast %cst_24 : f32 to vector<128x128xf32>
    %39 = arith.maximumf %37, %38 : vector<128x128xf32>
    %40 = arith.truncf %39 : vector<128x128xf32> to vector<128x128xbf16>
    %41 = vector.shape_cast %40 : vector<128x128xbf16> to vector<8x16x128xbf16>
    %c1 = arith.constant 1 : index
    %c8 = arith.constant 8 : index
    %c0_25 = arith.constant 0 : index
    %42 = vector.load %arg7[%c1, %c8, %c0_25] : memref<18x32x128xbf16, #tpu.memory_space<vmem>>, vector<8x16x128xbf16>
    tpu.vector_store %arg7[%c1, %c8, %c0_25], %41 {strides = array<i32>} : memref<18x32x128xbf16, #tpu.memory_space<vmem>>, vector<8x16x128xbf16>,
    %c0_26 = arith.constant 0 : index
    %c8_27 = arith.constant 8 : index
    %c0_28 = arith.constant 0 : index
    %c0_29 = arith.constant 0 : index
    %43 = vector.load %arg1[%c0_26, %c8_27, %c0_28, %c0_29] : memref<1x18x18x128xbf16, #tpu.memory_space<vmem>>, vector<1x10x18x128xbf16>
    %44 = vector.shape_cast %43 : vector<1x10x18x128xbf16> to vector<10x18x128xbf16>
    %45 = vector.extract_strided_slice %44 {offsets = [0, 0, 0], sizes = [8, 18, 128], strides = [1, 1, 1]} : vector<10x18x128xbf16> to vector<8x18x128xbf16>
    %46 = vector.extract_strided_slice %45 {offsets = [0, 0, 0], sizes = [8, 16, 128], strides = [1, 1, 1]} : vector<8x18x128xbf16> to vector<8x16x128xbf16>
    %47 = vector.shape_cast %46 : vector<8x16x128xbf16> to vector<128x128xbf16>
    %48 = vector.extract_strided_slice %45 {offsets = [0, 1, 0], sizes = [8, 16, 128], strides = [1, 1, 1]} : vector<8x18x128xbf16> to vector<8x16x128xbf16>
    %49 = vector.shape_cast %48 : vector<8x16x128xbf16> to vector<128x128xbf16>
    %50 = vector.extract_strided_slice %45 {offsets = [0, 2, 0], sizes = [8, 16, 128], strides = [1, 1, 1]} : vector<8x18x128xbf16> to vector<8x16x128xbf16>
    %51 = vector.shape_cast %50 : vector<8x16x128xbf16> to vector<128x128xbf16>
    %52 = vector.extract_strided_slice %44 {offsets = [1, 0, 0], sizes = [8, 18, 128], strides = [1, 1, 1]} : vector<10x18x128xbf16> to vector<8x18x128xbf16>
    %53 = vector.extract_strided_slice %52 {offsets = [0, 0, 0], sizes = [8, 16, 128], strides = [1, 1, 1]} : vector<8x18x128xbf16> to vector<8x16x128xbf16>
    %54 = vector.shape_cast %53 : vector<8x16x128xbf16> to vector<128x128xbf16>
    %55 = vector.extract_strided_slice %52 {offsets = [0, 1, 0], sizes = [8, 16, 128], strides = [1, 1, 1]} : vector<8x18x128xbf16> to vector<8x16x128xbf16>
    %56 = vector.shape_cast %55 : vector<8x16x128xbf16> to vector<128x128xbf16>
    %57 = vector.extract_strided_slice %52 {offsets = [0, 2, 0], sizes = [8, 16, 128], strides = [1, 1, 1]} : vector<8x18x128xbf16> to vector<8x16x128xbf16>
    %58 = vector.shape_cast %57 : vector<8x16x128xbf16> to vector<128x128xbf16>
    %59 = vector.extract_strided_slice %44 {offsets = [2, 0, 0], sizes = [8, 18, 128], strides = [1, 1, 1]} : vector<10x18x128xbf16> to vector<8x18x128xbf16>
    %60 = vector.extract_strided_slice %59 {offsets = [0, 0, 0], sizes = [8, 16, 128], strides = [1, 1, 1]} : vector<8x18x128xbf16> to vector<8x16x128xbf16>
    %61 = vector.shape_cast %60 : vector<8x16x128xbf16> to vector<128x128xbf16>
    %62 = vector.extract_strided_slice %59 {offsets = [0, 1, 0], sizes = [8, 16, 128], strides = [1, 1, 1]} : vector<8x18x128xbf16> to vector<8x16x128xbf16>
    %63 = vector.shape_cast %62 : vector<8x16x128xbf16> to vector<128x128xbf16>
    %64 = vector.extract_strided_slice %59 {offsets = [0, 2, 0], sizes = [8, 16, 128], strides = [1, 1, 1]} : vector<8x18x128xbf16> to vector<8x16x128xbf16>
    %65 = vector.shape_cast %64 : vector<8x16x128xbf16> to vector<128x128xbf16>
    %66 = tpu.concatenate %47, %49, %51, %54, %56, %58, %61, %63, %65 in 1 : vector<128x128xbf16>, vector<128x128xbf16>, vector<128x128xbf16>, vector<128x128xbf16>, vector<128x128xbf16>, vector<128x128xbf16>, vector<128x128xbf16>, vector<128x128xbf16>, vector<128x128xbf16> -> vector<128x1152xbf16>
    %cst_30 = arith.constant dense<0.000000e+00> : vector<128x128xf32>
    %67 = tpu.matmul %66, %0, %cst_30 {dimension_numbers = #tpu.dot_dimension_numbers<[1], [0], [0], [1], [0, 0, 1, 1], [], []>} : vector<128x1152xbf16>, vector<1152x128xbf16>, vector<128x128xf32> -> vector<128x128xf32>
    %68 = vector.broadcast %2 : vector<1x128xf32> to vector<128x128xf32>
    %69 = arith.addf %67, %68 : vector<128x128xf32>
    %cst_31 = arith.constant 0.000000e+00 : f32
    %70 = vector.broadcast %cst_31 : f32 to vector<128x128xf32>
    %71 = arith.maximumf %69, %70 : vector<128x128xf32>
    %72 = arith.truncf %71 : vector<128x128xf32> to vector<128x128xbf16>
    %73 = vector.shape_cast %72 : vector<128x128xbf16> to vector<8x16x128xbf16>
    %c9 = arith.constant 9 : index
    %c8_32 = arith.constant 8 : index
    %c0_33 = arith.constant 0 : index
    %74 = vector.load %arg7[%c9, %c8_32, %c0_33] : memref<18x32x128xbf16, #tpu.memory_space<vmem>>, vector<8x16x128xbf16>
    tpu.vector_store %arg7[%c9, %c8_32, %c0_33], %73 {strides = array<i32>} : memref<18x32x128xbf16, #tpu.memory_space<vmem>>, vector<8x16x128xbf16>,
    %c0_34 = arith.constant 0 : index
    %c0_35 = arith.constant 0 : index
    %c0_36 = arith.constant 0 : index
    %75 = vector.load %arg7[%c0_34, %c0_35, %c0_36] : memref<18x32x128xbf16, #tpu.memory_space<vmem>>, vector<10x32x128xbf16>
    %76 = vector.extract_strided_slice %75 {offsets = [0, 0, 0], sizes = [8, 32, 128], strides = [1, 1, 1]} : vector<10x32x128xbf16> to vector<8x32x128xbf16>
    %77 = vector.extract_strided_slice %76 {offsets = [0, 7, 0], sizes = [8, 16, 128], strides = [1, 1, 1]} : vector<8x32x128xbf16> to vector<8x16x128xbf16>
    %78 = vector.shape_cast %77 : vector<8x16x128xbf16> to vector<128x128xbf16>
    %79 = vector.extract_strided_slice %76 {offsets = [0, 8, 0], sizes = [8, 16, 128], strides = [1, 1, 1]} : vector<8x32x128xbf16> to vector<8x16x128xbf16>
    %80 = vector.shape_cast %79 : vector<8x16x128xbf16> to vector<128x128xbf16>
    %81 = vector.extract_strided_slice %76 {offsets = [0, 9, 0], sizes = [8, 16, 128], strides = [1, 1, 1]} : vector<8x32x128xbf16> to vector<8x16x128xbf16>
    %82 = vector.shape_cast %81 : vector<8x16x128xbf16> to vector<128x128xbf16>
    %83 = vector.extract_strided_slice %75 {offsets = [1, 0, 0], sizes = [8, 32, 128], strides = [1, 1, 1]} : vector<10x32x128xbf16> to vector<8x32x128xbf16>
    %84 = vector.extract_strided_slice %83 {offsets = [0, 7, 0], sizes = [8, 16, 128], strides = [1, 1, 1]} : vector<8x32x128xbf16> to vector<8x16x128xbf16>
    %85 = vector.shape_cast %84 : vector<8x16x128xbf16> to vector<128x128xbf16>
    %86 = vector.extract_strided_slice %83 {offsets = [0, 8, 0], sizes = [8, 16, 128], strides = [1, 1, 1]} : vector<8x32x128xbf16> to vector<8x16x128xbf16>
    %87 = vector.shape_cast %86 : vector<8x16x128xbf16> to vector<128x128xbf16>
    %88 = vector.extract_strided_slice %83 {offsets = [0, 9, 0], sizes = [8, 16, 128], strides = [1, 1, 1]} : vector<8x32x128xbf16> to vector<8x16x128xbf16>
    %89 = vector.shape_cast %88 : vector<8x16x128xbf16> to vector<128x128xbf16>
    %90 = vector.extract_strided_slice %75 {offsets = [2, 0, 0], sizes = [8, 32, 128], strides = [1, 1, 1]} : vector<10x32x128xbf16> to vector<8x32x128xbf16>
    %91 = vector.extract_strided_slice %90 {offsets = [0, 7, 0], sizes = [8, 16, 128], strides = [1, 1, 1]} : vector<8x32x128xbf16> to vector<8x16x128xbf16>
    %92 = vector.shape_cast %91 : vector<8x16x128xbf16> to vector<128x128xbf16>
    %93 = vector.extract_strided_slice %90 {offsets = [0, 8, 0], sizes = [8, 16, 128], strides = [1, 1, 1]} : vector<8x32x128xbf16> to vector<8x16x128xbf16>
    %94 = vector.shape_cast %93 : vector<8x16x128xbf16> to vector<128x128xbf16>
    %95 = vector.extract_strided_slice %90 {offsets = [0, 9, 0], sizes = [8, 16, 128], strides = [1, 1, 1]} : vector<8x32x128xbf16> to vector<8x16x128xbf16>
    %96 = vector.shape_cast %95 : vector<8x16x128xbf16> to vector<128x128xbf16>
    %97 = tpu.concatenate %78, %80, %82, %85, %87, %89, %92, %94, %96 in 1 : vector<128x128xbf16>, vector<128x128xbf16>, vector<128x128xbf16>, vector<128x128xbf16>, vector<128x128xbf16>, vector<128x128xbf16>, vector<128x128xbf16>, vector<128x128xbf16>, vector<128x128xbf16> -> vector<128x1152xbf16>
    %cst_37 = arith.constant dense<0.000000e+00> : vector<128x128xf32>
    %98 = tpu.matmul %97, %1, %cst_37 {dimension_numbers = #tpu.dot_dimension_numbers<[1], [0], [0], [1], [0, 0, 1, 1], [], []>} : vector<128x1152xbf16>, vector<1152x128xbf16>, vector<128x128xf32> -> vector<128x128xf32>
    %99 = vector.broadcast %3 : vector<1x128xf32> to vector<128x128xf32>
    %100 = arith.addf %98, %99 : vector<128x128xf32>
    %101 = vector.shape_cast %100 : vector<128x128xf32> to vector<8x16x128xf32>
    %c0_38 = arith.constant 0 : index
    %c0_39 = arith.constant 0 : index
    %c0_40 = arith.constant 0 : index
    %c0_41 = arith.constant 0 : index
    %102 = vector.load %arg6[%c0_38, %c0_39, %c0_40, %c0_41] : memref<1x16x16x128xf32, #tpu.memory_space<vmem>>, vector<1x8x16x128xf32>
    %103 = vector.shape_cast %102 : vector<1x8x16x128xf32> to vector<8x16x128xf32>
    %104 = vector.shape_cast %101 : vector<8x16x128xf32> to vector<1x8x16x128xf32>
    tpu.vector_store %arg6[%c0_38, %c0_39, %c0_40, %c0_41], %104 {strides = array<i32>} : memref<1x16x16x128xf32, #tpu.memory_space<vmem>>, vector<1x8x16x128xf32>,
    %c8_42 = arith.constant 8 : index
    %c0_43 = arith.constant 0 : index
    %c0_44 = arith.constant 0 : index
    %105 = vector.load %arg7[%c8_42, %c0_43, %c0_44] : memref<18x32x128xbf16, #tpu.memory_space<vmem>>, vector<10x32x128xbf16>
    %106 = vector.extract_strided_slice %105 {offsets = [0, 0, 0], sizes = [8, 32, 128], strides = [1, 1, 1]} : vector<10x32x128xbf16> to vector<8x32x128xbf16>
    %107 = vector.extract_strided_slice %106 {offsets = [0, 7, 0], sizes = [8, 16, 128], strides = [1, 1, 1]} : vector<8x32x128xbf16> to vector<8x16x128xbf16>
    %108 = vector.shape_cast %107 : vector<8x16x128xbf16> to vector<128x128xbf16>
    %109 = vector.extract_strided_slice %106 {offsets = [0, 8, 0], sizes = [8, 16, 128], strides = [1, 1, 1]} : vector<8x32x128xbf16> to vector<8x16x128xbf16>
    %110 = vector.shape_cast %109 : vector<8x16x128xbf16> to vector<128x128xbf16>
    %111 = vector.extract_strided_slice %106 {offsets = [0, 9, 0], sizes = [8, 16, 128], strides = [1, 1, 1]} : vector<8x32x128xbf16> to vector<8x16x128xbf16>
    %112 = vector.shape_cast %111 : vector<8x16x128xbf16> to vector<128x128xbf16>
    %113 = vector.extract_strided_slice %105 {offsets = [1, 0, 0], sizes = [8, 32, 128], strides = [1, 1, 1]} : vector<10x32x128xbf16> to vector<8x32x128xbf16>
    %114 = vector.extract_strided_slice %113 {offsets = [0, 7, 0], sizes = [8, 16, 128], strides = [1, 1, 1]} : vector<8x32x128xbf16> to vector<8x16x128xbf16>
    %115 = vector.shape_cast %114 : vector<8x16x128xbf16> to vector<128x128xbf16>
    %116 = vector.extract_strided_slice %113 {offsets = [0, 8, 0], sizes = [8, 16, 128], strides = [1, 1, 1]} : vector<8x32x128xbf16> to vector<8x16x128xbf16>
    %117 = vector.shape_cast %116 : vector<8x16x128xbf16> to vector<128x128xbf16>
    %118 = vector.extract_strided_slice %113 {offsets = [0, 9, 0], sizes = [8, 16, 128], strides = [1, 1, 1]} : vector<8x32x128xbf16> to vector<8x16x128xbf16>
    %119 = vector.shape_cast %118 : vector<8x16x128xbf16> to vector<128x128xbf16>
    %120 = vector.extract_strided_slice %105 {offsets = [2, 0, 0], sizes = [8, 32, 128], strides = [1, 1, 1]} : vector<10x32x128xbf16> to vector<8x32x128xbf16>
    %121 = vector.extract_strided_slice %120 {offsets = [0, 7, 0], sizes = [8, 16, 128], strides = [1, 1, 1]} : vector<8x32x128xbf16> to vector<8x16x128xbf16>
    %122 = vector.shape_cast %121 : vector<8x16x128xbf16> to vector<128x128xbf16>
    %123 = vector.extract_strided_slice %120 {offsets = [0, 8, 0], sizes = [8, 16, 128], strides = [1, 1, 1]} : vector<8x32x128xbf16> to vector<8x16x128xbf16>
    %124 = vector.shape_cast %123 : vector<8x16x128xbf16> to vector<128x128xbf16>
    %125 = vector.extract_strided_slice %120 {offsets = [0, 9, 0], sizes = [8, 16, 128], strides = [1, 1, 1]} : vector<8x32x128xbf16> to vector<8x16x128xbf16>
    %126 = vector.shape_cast %125 : vector<8x16x128xbf16> to vector<128x128xbf16>
    %127 = tpu.concatenate %108, %110, %112, %115, %117, %119, %122, %124, %126 in 1 : vector<128x128xbf16>, vector<128x128xbf16>, vector<128x128xbf16>, vector<128x128xbf16>, vector<128x128xbf16>, vector<128x128xbf16>, vector<128x128xbf16>, vector<128x128xbf16>, vector<128x128xbf16> -> vector<128x1152xbf16>
    %cst_45 = arith.constant dense<0.000000e+00> : vector<128x128xf32>
    %128 = tpu.matmul %127, %1, %cst_45 {dimension_numbers = #tpu.dot_dimension_numbers<[1], [0], [0], [1], [0, 0, 1, 1], [], []>} : vector<128x1152xbf16>, vector<1152x128xbf16>, vector<128x128xf32> -> vector<128x128xf32>
    %129 = vector.broadcast %3 : vector<1x128xf32> to vector<128x128xf32>
    %130 = arith.addf %128, %129 : vector<128x128xf32>
    %131 = vector.shape_cast %130 : vector<128x128xf32> to vector<8x16x128xf32>
    %c0_46 = arith.constant 0 : index
    %c8_47 = arith.constant 8 : index
    %c0_48 = arith.constant 0 : index
    %c0_49 = arith.constant 0 : index
    %132 = vector.load %arg6[%c0_46, %c8_47, %c0_48, %c0_49] : memref<1x16x16x128xf32, #tpu.memory_space<vmem>>, vector<1x8x16x128xf32>
    %133 = vector.shape_cast %132 : vector<1x8x16x128xf32> to vector<8x16x128xf32>
    %134 = vector.shape_cast %131 : vector<8x16x128xf32> to vector<1x8x16x128xf32>
    tpu.vector_store %arg6[%c0_46, %c8_47, %c0_48, %c0_49], %134 {strides = array<i32>} : memref<1x16x16x128xf32, #tpu.memory_space<vmem>>, vector<1x8x16x128xf32>,
    return
  }
  func.func @transform_0(%arg0: i32) -> (i32, i32, i32, i32) {
    %c0_i32 = arith.constant 0 : i32
    %c0_i32_0 = arith.constant 0 : i32
    %c0_i32_1 = arith.constant 0 : i32
    %c0_i32_2 = arith.constant 0 : i32
    return %arg0, %c0_i32, %c0_i32_0, %c0_i32_1 : i32, i32, i32, i32
  }
  func.func @transform_1(%arg0: i32) -> (i32, i32) {
    %c0_i32 = arith.constant 0 : i32
    %c0_i32_0 = arith.constant 0 : i32
    %c0_i32_1 = arith.constant 0 : i32
    return %c0_i32, %c0_i32_0 : i32, i32
  }
  func.func @transform_2(%arg0: i32) -> (i32, i32) {
    %c0_i32 = arith.constant 0 : i32
    %c0_i32_0 = arith.constant 0 : i32
    %c0_i32_1 = arith.constant 0 : i32
    return %c0_i32, %c0_i32_0 : i32, i32
  }
  func.func @transform_3(%arg0: i32) -> (i32, i32) {
    %c0_i32 = arith.constant 0 : i32
    %c0_i32_0 = arith.constant 0 : i32
    %c0_i32_1 = arith.constant 0 : i32
    return %c0_i32, %c0_i32_0 : i32, i32
  }
  func.func @transform_4(%arg0: i32) -> (i32, i32) {
    %c0_i32 = arith.constant 0 : i32
    %c0_i32_0 = arith.constant 0 : i32
    %c0_i32_1 = arith.constant 0 : i32
    return %c0_i32, %c0_i32_0 : i32, i32
  }
  func.func @transform_5(%arg0: i32) -> (i32, i32, i32, i32) {
    %c0_i32 = arith.constant 0 : i32
    %c0_i32_0 = arith.constant 0 : i32
    %c0_i32_1 = arith.constant 0 : i32
    %c0_i32_2 = arith.constant 0 : i32
    return %arg0, %c0_i32, %c0_i32_0, %c0_i32_1 : i32, i32, i32, i32
  }
}

</mosaic_0001>

<bundles_post_ra>
// kernel: tpu_custom_call.1
= control target key start
LH: loop header
LB: loop body
LE: loop exit
PB: predicated region body
PF: predicated region fallthrough
CT: control target
= control target key end

     0   :  { %10 = vsyncpa [#allocation4], 0  ;;  %s11323_s0 = inlined_call_operand.vmem [shape: bf16[2,18,18,128], index: 0, kind: input, shape index: {}]   ;;  %s11324_s1 = inlined_call_operand.vmem [shape: bf16[1152,128], index: 1, kind: input, shape index: {}]   ;;  %s11325_s2 = inlined_call_operand.vmem [shape: f32[1,128], index: 2, kind: input, shape index: {}]   ;;  %s11326_s3 = inlined_call_operand.hbm [shape: bf16[1152,128], index: 3, kind: input, shape index: {}]   ;;  %s11327_s4 = inlined_call_operand.vmem [shape: f32[1,128], index: 4, kind: input, shape index: {}]   ;;  %s11328_s5 = inlined_call_operand.hbm [shape: f32[2,16,16,128], index: 5, kind: output, shape index: {}]  }
   0x1   :  { %11 = vsyncpa [#allocation5], 0 }
   0x2   :  { %13 = vsyncpa [#allocation5 + $0x1], 0  ;;  %s7938_s18 = smov 0   ;;  %s7940_s19 = smov 0  }
   0x3   :  { %s7942_s20 = smov 0   ;;  %s7944_s21 = smov 0  }
   0x4 LB: > { %s7959_s22 = sadd.s32 4294967295, %s7899_s21   ;;  %s5776_s23 = sadd.s32 4294967294, %s7899_s21   ;;  %s7899_s21 = sphi %s7944_s21, %s11585_s21   ;;  %s7895_s20 = sphi %s7942_s20, %s11584_s20   ;;  %s7891_s19 = sphi %s7940_s19, %s11583_s19   ;;  %s7887_s18 = sphi %s7938_s18, %s11582_s18  }
   0x5   : > { %s7963_s24 = sadd.s32 1, %s7899_s21   ;;  %s136_s25 = sadd.s32 1, %s7895_s20 }
   0x6   : > { %s133_s26 = ssub.s32 %s7899_s21, %s7963_s24  ;;  %p146_p0 = scmp.ne.s32.totalorder %s7895_s20, %s7891_s19 }
   0x7   : > { %p134_p1 = scmp.eq.s32.totalorder %s133_s26, 0  ;;  %p147_p2 = scmp.eq.s32.totalorder %s7959_s22, 1 }
   0x8   : > { %p152_p3 = scmp.ne.s32.totalorder %s7891_s19, %s7887_s18  ;;  %p153_p4 = scmp.eq.s32.totalorder %s5776_s23, 1 }
   0x9   : > { %s7974_s27 = scalar_select %p134_p1, %s7895_s20, %s136_s25  }
   0xa   : > { %p7976_p5 = por %p147_p2, %p146_p0  ;;  %p7980_p6 = por %p153_p4, %p152_p3 }
   0xb   : > { %p5777_p7 = scmp.ge.s32.totalorder %s7899_s21, 1  ;;  %p160_p8 = scmp.lt.s32.totalorder %s7899_s21, 3 }
   0xc   : > { %s11356_s29 = scalar_select %p7980_p6, 1, 0 }
   0xd   : > { %p7437_p9 = scmp.eq.s32.totalorder %s7959_s22, 0  ;;  %p7987_p10 = pnand %p5777_p7, %p160_p8 }
   0xe   : > { %s7901_s6 = smov [#allocation3]  }
   0xf   : > { %s178_s7 = sshll.u32 %s7901_s6, 4  ;;  %p7429_p11 = pneg %p7987_p10  ;;  %s179_s7 = int_to_ptr.vmem [resolvable:$true] %s178_s7 }
  0x10   : > { %s7820_s8 = scalar_lea.vmem %s179_s7, 9216  ;;  %p7828_p3 = scmp.lt.s32.totalorder %s179_s7, %s179_s7 }
  0x11   : > { %p7430_p12 = pnand %p7437_p9, %p7429_p11  ;;  %p7821_p0 = scmp.ne.s32.totalorder %s179_s7, %s7820_s8 }
  0x12   : > { %p7829_p4 = scmp.lt.s32.totalorder %s7820_s8, %s7820_s8 }
  0x13   : > { %p7811_p13 = pneg %p7430_p12 }
  0x14   : > { %p7830_p6 = por %p7829_p4, %p7828_p3 }
  0x15   : > { %p7823_p1 = pnand %p7821_p0, %p7811_p13 }
  0x17   : > { %p7824_p2 = pneg %p7823_p1 }
  0x19   : > { %p7831_p7 = pnand %p7830_p6, %p7824_p2 }
  0x1b   : > { %7834 = shalt.err (!%p7831_p7)
}
  0x1c   : > { %s7902_s9 = smov 64   ;;  %s7903_s10 = smov 4  }
  0x1d   : > { %7432 = dma.hbm_to_vmem [thread:$0]  (!%p7430_p12), %s11326_s3, 9216, %s179_s7, [#allocation4], %s7902_s9, %s7902_s9, %s7903_s10  }
  0x1e   : > { %205 = sbr.rel (%p7987_p10) target bundleno = 924 (0x39c), region = 40 }
  0x23   : > { %7878 = dma.done.wait (%p7437_p9), [#allocation4], 9216  }
  0x24   : > { %7880 = vsyncadd (%p7437_p9), [#allocation4], 4294958080  ;;  %v8007_v0 = vld [vmem:[%s11324_s1 + $0x78] sm:$0xff]   ;;  %v7482_v4 = vld [vmem:[%s11324_s1 + $0x70] sm:$0xff]   ;;  %p233_p6 = scmp.lt.s32.totalorder %s7959_s22, 1  ;;  %vm823_vm2 = vcmask 1042432  }
  0x25   : > { %v7479_v1 = vld [vmem:[%s11324_s1 + $0xf8] sm:$0xff]   ;;  %6206 = vmatprep.subr.bf16.mxu0 %v8007_v0  ;;  %v7483_v5 = vld [vmem:[%s11324_s1 + $0xf0] sm:$0xff]   ;;  %v7486_v8 = vld [vmem:[%s11324_s1 + $0x68] sm:$0xff]   ;;  %vm604_vm0 = vsmask.f32 3328  ;;  %vm824_vm3 = vcmask 1046532  }
  0x26   : > { %v7480_v2 = vld [vmem:[%s11324_s1 + $0x38] sm:$0xff]   ;;  %6270 = vmatprep.subr.bf16.mxu1 %v7479_v1  ;;  %v7484_v6 = vld [vmem:[%s11324_s1 + $0x30] sm:$0xff]   ;;  %v7487_v9 = vld [vmem:[%s11324_s1 + $0xe8] sm:$0xff]   ;;  %s234_s9 = scalar_select %p233_p6, %s7959_s22, 1  ;;  %vm605_vm1 = vsmask.f32 7440 }
  0x27   : > { %v7481_v3 = vld [vmem:[%s11324_s1 + $0xb8] sm:$0xff]   ;;  %6207 = vmatpush3.bf16.msra.mxu0 %v7480_v2  ;;  %v7485_v7 = vld [vmem:[%s11324_s1 + $0xb0] sm:$0xff]   ;;  %v7488_v10 = vld [vmem:[%s11324_s1 + $0x28] sm:$0xff]   ;;  %v11360_v59 = vmov 0  ;;  %vm3203_vm6 = vsmask.f32 256 }
  0x28   : > { %6271 = vmatpush3.bf16.msra.mxu1 %v7481_v3  ;;  %6208 = vmatprep.subr.bf16.mxu0 %v7482_v4  ;;  %v7489_v11 = vld [vmem:[%s11324_s1 + $0xa8] sm:$0xff]   ;;  %v7490_v12 = vld [vmem:[%s11324_s1 + $0x60] sm:$0xff]   ;;  %v7494_v16 = vld [vmem:[%s11324_s1 + $0x58] sm:$0xff]   ;;  %s7422_s23 = smul.u32 216, %s234_s9  ;;  %vm3204_vm7 = vsmask.f32 4368 }
  0x29   : > { %6272 = vmatprep.subr.bf16.mxu1 %v7483_v5  ;;  %v7491_v13 = vld [vmem:[%s11324_s1 + $0xe0] sm:$0xff]   ;;  %v7495_v17 = vld [vmem:[%s11324_s1 + $0xd8] sm:$0xff]   ;;  %v7498_v20 = vld [vmem:[%s11324_s1 + $0x50] sm:$0xff]   ;;  %s230_s6 = sand.u32 1, %s7891_s19   ;;  %s6205_s11 = sshll.u32 %s7959_s22, 12 }
  0x2a   : > { %v7492_v14 = vld [vmem:[%s11324_s1 + $0x20] sm:$0xff]   ;;  %v7496_v18 = vld [vmem:[%s11324_s1 + $0x18] sm:$0xff]   ;;  %v7499_v21 = vld [vmem:[%s11324_s1 + $0xd0] sm:$0xff]   ;;  %s8102_s13 = scalar_lea.vmem %s11323_s0, %s7422_s23  ;;  %s5782_s7 = sshll.u32 %s230_s6, 8 }
  0x2b   : > { %6209 = vmatpush3.bf16.msra.mxu0 %v7484_v6  ;;  %v7493_v15 = vld [vmem:[%s11324_s1 + $0xa0] sm:$0xff]   ;;  %v7497_v19 = vld [vmem:[%s11324_s1 + $0x98] sm:$0xff]   ;;  %v7500_v22 = vld [vmem:[%s11324_s1 + $0x10] sm:$0xff]   ;;  %s10996_s8 = scalar_lea.vmem [#allocation6], %s5782_s7  ;;  %s11275_s16 = scalar_lea.hbm %s11328_s5, %s6205_s11 }
  0x2c   : > { %6273 = vmatpush3.bf16.msra.mxu1 %v7485_v7  ;;  %6210 = vmatprep.subr.bf16.mxu0 %v7486_v8  ;;  %v7501_v23 = vld [vmem:[%s11324_s1 + $0x90] sm:$0xff]   ;;  %v7502_v24 = vld [vmem:[%s11324_s1 + $0x48] sm:$0xff]   ;;  %v7506_v28 = vld [vmem:[%s11324_s1 + $0x40] sm:$0xff]   ;;  %s5702_s12 = sshll.u32 %s10996_s8, 4  ;;  %s11283_s22 = scalar_lea.sflag [#allocation5], %s230_s6  ;;  %s11277_s12 = int_to_ptr.vmem [resolvable:$true] %s5702_s12 }
  0x2d   : > { %6274 = vmatprep.subr.bf16.mxu1 %v7487_v9  ;;  %v7503_v25 = vld [vmem:[%s11324_s1 + $0xc8] sm:$0xff]   ;;  %v7507_v29 = vld [vmem:[%s11324_s1 + $0xc0] sm:$0xff]   ;;  %v8125_v42 = vld [vmem:[%s8102_s13 + $0x10] sm:$0xf]  ;;  %s7905_s17 = smov [#allocation6]  }
  0x2e   : > { %v7504_v26 = vld [vmem:[%s11324_s1 + $0x8] sm:$0xff]   ;;  %v7508_v30 = vld [vmem:[%s11324_s1] sm:$0xff]   ;;  %v641_v52 = vshll.u32 %v8125_v42, 16  ;;  %vm8132_vm4 = vmor %vm823_vm2, %vm824_vm3  ;;  %v645_v56 = vshrl.u32 %v8125_v42, 16  ;;  %s7839_s23 = sshll.u32 %s7905_s17, 4  ;;  %s7840_s23 = int_to_ptr.vmem [resolvable:$false] %s7839_s23 }
  0x2f   : > { %6211 = vmatpush3.bf16.msra.mxu0 %v7488_v10  ;;  %v7505_v27 = vld [vmem:[%s11324_s1 + $0x88] sm:$0xff]   ;;  %v7509_v31 = vld [vmem:[%s11324_s1 + $0x80] sm:$0xff]   ;;  %v7512_v58 = vld [vmem:[%s11324_s1 + $0x1f8] sm:$0xff]   ;;  %s7841_s25 = scalar_lea.vmem %s7840_s23, 8192  ;;  %p7842_p11 = scmp.lt.s32.totalorder %s11277_s12, %s7840_s23 }
  0x30   : > { %6275 = vmatpush3.bf16.msra.mxu1 %v7489_v11  ;;  %6212 = vmatprep.subr.bf16.mxu0 %v7490_v12  ;;  %v8111_v32 = vld [vmem:[%s8102_s13] sm:$0xf]  ;;  %v8114_v33 = vld [vmem:[%s8102_s13 + $0x4] sm:$0xf]  ;;  %v576_v34 = vld [vmem:[%s8102_s13 + $0x8] sm:$0x1] }
  0x31   : > { %6276 = vmatprep.subr.bf16.mxu1 %v7491_v13  ;;  %v608_v35 = vshrl.u32 %v8111_v32, 16  ;;  %v611_v36 = vshll.u32 %v8111_v32, 16  ;;  %v617_v37 = vshll.u32 %v8114_v33, 16  ;;  %v621_v38 = vshrl.u32 %v8114_v33, 16  ;;  %v8122_v39 = vld [vmem:[%s8102_s13 + $0xc] sm:$0xf]  ;;  %vm8146_vm5 = vmor %vm604_vm0, %vm605_vm1 }
  0x32   : > { %v627_v40 = vshll.u32 %v576_v34, 16  ;;  %v831_v41 = vrot.slane %v576_v34, 5  ;;  %v632_v43 = vshrl.u32 %v8122_v39, 16  ;;  %v635_v44 = vshll.u32 %v8122_v39, 16  ;;  %v579_v63 = vld [vmem:[%s8102_s13 + $0x14] sm:$0x1]  ;;  %vm9419_vm8 = vmor %vm3203_vm6, %vm3204_vm7 }
  0x33   : > { %6213 = vmatpush3.bf16.msra.mxu0 %v7492_v14  ;;  %v610_v45 = vrot.slane %v608_v35, 4  ;;  %v613_v46 = vrot.slane %v611_v36, 5  ;;  %v619_v47 = vrot.slane %v617_v37, 5  ;;  %v623_v48 = vrot.slane %v621_v38, 4  ;;  %v7515_v2 = vld [vmem:[%s11324_s1 + $0x178] sm:$0xff]   ;;  %v7521_v36 = vld [vmem:[%s11324_s1 + $0x130] sm:$0xff]  }
  0x34   : > { %6277 = vmatpush3.bf16.msra.mxu1 %v7493_v15  ;;  %6214 = vmatprep.subr.bf16.mxu0 %v7494_v16  ;;  %v629_v49 = vrot.slane %v627_v40, 5  ;;  %v634_v50 = vrot.slane %v632_v43, 4  ;;  %v637_v51 = vrot.slane %v635_v44, 5  ;;  %v8139_v57 = vcombine.low %v8122_v39, %v8125_v42  ;;  %v8160_v7 = vld [vmem:[%s8102_s13 + $0x18] sm:$0xf]  ;;  %v7597_v53 = vld [vmem:[#allocation3 + $0x90] sm:$0xff]  }
  0x35   : > { %6278 = vmatprep.subr.bf16.mxu1 %v7495_v17  ;;  %v614_v54 = vor.u32 %v613_v46, %v610_v45  ;;  %v624_v55 = vor.u32 %v623_v48, %v619_v47  ;;  %v11361_v59 = vsel %vm8146_vm5, 4294967295, %v11360_v59  ;;  %v5794_v60 = vcombine.low %v8111_v32, %v8114_v33  ;;  %v8165_v12 = vld [vmem:[%s8102_s13 + $0x1c] sm:$0xf]  ;;  %v582_v35 = vld [vmem:[%s8102_s13 + $0x20] sm:$0x1] }
  0x36   : > { %11362 = vst [vmem:[#allocation9_spill] sm:$0xff] %v11361_v59  ;;  %v5784_v61 = vrot.slane %v8111_v32, 9  ;;  %v828_v62 = vrot.slane %v8114_v33, 5  ;;  %v638_v1 = vor.u32 %v637_v51, %v634_v50  ;;  %v647_v5 = vrot.slane %v645_v56, 4  ;;  %1637 = vmatprep.mubr.bf16.mxu1 %v8139_v57  ;;  %v7513_v15 = vld [vmem:[%s11324_s1 + $0x1b8] sm:$0xff]   ;;  %v7518_v32 = vld [vmem:[%s11324_s1 + $0x1b0] sm:$0xff]  }
  0x37   : > { %6215 = vmatpush3.bf16.msra.mxu0 %v7496_v18  ;;  %v615_v3 = vrot.slane %v614_v54, 4  ;;  %v625_v4 = vrot.slane %v624_v55, 4  ;;  %v643_v6 = vrot.slane %v641_v52, 5  ;;  %v651_v11 = vshll.u32 %v579_v63, 16  ;;  %v7520_v33 = vld [vmem:[%s11324_s1 + $0x170] sm:$0xff]   ;;  %v7522_v51 = vld [vmem:[%s11324_s1 + $0x1e8] sm:$0xff]  }
  0x38   : > { %6279 = vmatpush3.bf16.msra.mxu1 %v7497_v19  ;;  %6216 = vmatprep.subr.bf16.mxu0 %v7498_v20  ;;  %v829_v8 = vsel %vm8132_vm4, %v5784_v61, %v828_v62  ;;  %v830_v9 = vrot.slane %v828_v62, 4  ;;  %v639_v10 = vrot.slane %v638_v1, 4  ;;  %v656_v17 = vshrl.u32 %v8160_v7, 16 }
  0x39   : > { %6280 = vmatprep.subr.bf16.mxu1 %v7499_v21  ;;  %v620_v13 = vsel %vm8146_vm5, %v615_v3, %v619_v47  ;;  %v630_v14 = vsel %vm8146_vm5, %v625_v4, %v629_v49  ;;  %v648_v16 = vor.u32 %v647_v5, %v643_v6  ;;  %v653_v21 = vrot.slane %v651_v11, 5 }
  0x3a   : > { %v5802_v18 = vcombine.low %v620_v13, %v630_v14  ;;  %v832_v19 = vsel %vm8132_vm4, %v830_v9, %v831_v41  ;;  %v644_v20 = vsel %vm8146_vm5, %v639_v10, %v643_v6  ;;  %v658_v40 = vrot.slane %v656_v17, 4  ;;  %v8211_v41 = vld [vmem:[%s8102_s13 + $0x24] sm:$0xf]  ;;  %v585_v6 = vld [vmem:[%s8102_s13 + $0x2c] sm:$0x1] }
  0x3b   : > { %6217 = vmatpush3.bf16.msra.mxu0 %v7500_v22  ;;  %v7516_v22 = vld [vmem:[%s11324_s1 + $0x138] sm:$0xff]   ;;  %v665_v44 = vshll.u32 %v8165_v12, 16  ;;  %v675_v46 = vshll.u32 %v582_v35, 16  ;;  %v680_v48 = vshrl.u32 %v8211_v41, 16  ;;  %v683_v49 = vshll.u32 %v8211_v41, 16  ;;  %v7525_v13 = vld [vmem:[%s11324_s1 + $0x168] sm:$0xff]  }
  0x3c   : > { %6281 = vmatpush3.bf16.msra.mxu1 %v7501_v23  ;;  %6218 = vmatprep.subr.bf16.mxu0 %v7502_v24  ;;  %v5810_v23 = vcombine.low %v829_v8, %v832_v19  ;;  %v649_v24 = vrot.slane %v648_v16, 4  ;;  %v842_v61 = vrot.slane %v8165_v12, 5  ;;  %v845_v62 = vrot.slane %v582_v35, 5  ;;  %v8255_v16 = vld [vmem:[%s8102_s13 + $0x34] sm:$0xf] }
  0x3d   : > { %6282 = vmatprep.subr.bf16.mxu1 %v7503_v25  ;;  %v659_v25 = vshll.u32 %v8160_v7, 16  ;;  %1540 = vmatprep.mubr.bf16.mxu0 %v5802_v18  ;;  %v667_v55 = vrot.slane %v665_v44, 5  ;;  %v677_v56 = vrot.slane %v675_v46, 5  ;;  %v682_v3 = vrot.slane %v680_v48, 4  ;;  %v8296_v48 = vld [vmem:[%s8102_s13 + $0x40] sm:$0xf] }
  0x3e   : > { %v654_v34 = vsel %vm8146_vm5, %v649_v24, %v653_v21  ;;  %v844_v5 = vrot.slane %v842_v61, 4  ;;  %v717_v24 = vshrl.u32 %v8255_v16, 16 }
  0x3f   : > { %6219 = vmatpush3.bf16.msra.mxu0 %v7504_v26  ;;  %v669_v26 = vshrl.u32 %v8165_v12, 16  ;;  %v8205_v37 = vcombine.low %v644_v20, %v654_v34  ;;  %v661_v43 = vrot.slane %v659_v25, 5  ;;  %v7526_v25 = vld [vmem:[%s11324_s1 + $0x128] sm:$0xff]  }
  0x40   : > { %6283 = vmatpush3.bf16.msra.mxu1 %v7505_v27  ;;  %6220 = vmatprep.subr.bf16.mxu0 %v7506_v28  ;;  %v7517_v27 = vld [vmem:[%s11324_s1 + $0x1f0] sm:$0xff]   ;;  %v8189_v28 = vcombine.low %v8160_v7, %v8165_v12 }
  0x41   : > { %6284 = vmatprep.subr.bf16.mxu1 %v7507_v29  ;;  %v5785_v29 = vrot.slane %v8122_v39, 9  ;;  %v671_v45 = vrot.slane %v669_v26, 4  ;;  %v662_v54 = vor.u32 %v661_v43, %v658_v40  ;;  %v8246_v12 = vld [vmem:[%s8102_s13 + $0x30] sm:$0xf]  ;;  %v719_v43 = vrot.slane %v717_v24, 4 }
  0x42   : > { %v704_v17 = vshrl.u32 %v8246_v12, 16  ;;  %v707_v20 = vshll.u32 %v8246_v12, 16 }
  0x43   : > { %6221 = vmatpush3.bf16.msra.mxu0 %v7508_v30  ;;  %v835_v30 = vrot.slane %v8125_v42, 5  ;;  %v8214_v42 = vld [vmem:[%s8102_s13 + $0x28] sm:$0xf]  ;;  %v663_v1 = vrot.slane %v662_v54, 4 }
  0x44   : > { %6285 = vmatpush3.bf16.msra.mxu1 %v7509_v31  ;;  %6334 = vmatprep.subr.bf16.mxu0 %v7515_v2  ;;  %v838_v31 = vrot.slane %v579_v63, 5  ;;  %v693_v50 = vshrl.u32 %v8214_v42, 16  ;;  %v7523_v63 = vld [vmem:[%s11324_s1 + $0x1a8] sm:$0xff]   ;;  %v672_v2 = vor.u32 %v671_v45, %v667_v55  ;;  %v689_v10 = vshll.u32 %v8214_v42, 16  ;;  %v8287_v45 = vld [vmem:[%s8102_s13 + $0x3c] sm:$0xf] }
  0x45   : > { %6398 = vmatprep.subr.bf16.mxu1 %v7512_v58  ;;  %v836_v38 = vsel %vm8132_vm4, %v5785_v29, %v835_v30  ;;  %v837_v39 = vrot.slane %v835_v30, 4  ;;  %v8230_v58 = vcombine.low %v8211_v41, %v8214_v42  ;;  %v668_v8 = vsel %vm8146_vm5, %v663_v1, %v667_v55  ;;  %v7531_v1 = vld [vmem:[%s11324_s1 + $0x120] sm:$0xff]  }
  0x46   : > { %1541 = vmatmul.mubr.bf16.vlgmr.msra.gmra.mxu0 %v5794_v60  ;;  %v5786_v60 = vrot.slane %v8160_v7, 9  ;;  %v685_v7 = vrot.slane %v683_v49, 5  ;;  %v673_v9 = vrot.slane %v672_v2, 4  ;;  %v695_v11 = vrot.slane %v693_v50, 4 }
  0x47   : > { %1638 = vmatmul.mubr.bf16.vlgmr.msra.gmra.mxu1 %v5810_v23  ;;  %6335 = vmatpush3.bf16.msra.mxu0 %v7516_v22  ;;  %v839_v47 = vsel %vm8132_vm4, %v837_v39, %v838_v31  ;;  %v691_v19 = vrot.slane %v689_v10, 5  ;;  %v5787_v29 = vrot.slane %v8211_v41, 9  ;;  %v849_v30 = vrot.slane %v8214_v42, 5  ;;  %v588_v39 = vld [vmem:[%s8102_s13 + $0x38] sm:$0x1] }
  0x48   : > { %6399 = vmatpush3.bf16.msra.mxu1 %v7513_v15  ;;  %1645 = vmatprep.mubr.bf16.mxu1 %v8189_v28  ;;  %v8226_v52 = vcombine.low %v836_v38, %v839_v47  ;;  %v843_v4 = vsel %vm8132_vm4, %v5786_v60, %v842_v61  ;;  %v686_v14 = vor.u32 %v685_v7, %v682_v3  ;;  %v699_v15 = vshll.u32 %v585_v6, 16  ;;  %v7528_v38 = vld [vmem:[%s11324_s1 + $0x1a0] sm:$0xff]  }
  0x49   : > { %6400 = vmatprep.subr.bf16.mxu1 %v7517_v27  ;;  %1548 = vmatprep.mubr.bf16.mxu0 %v8205_v37  ;;  %v678_v18 = vsel %vm8146_vm5, %v673_v9, %v677_v56  ;;  %v696_v27 = vor.u32 %v695_v11, %v691_v19  ;;  %v8274_v31 = vcombine.low %v8246_v12, %v8255_v16  ;;  %v706_v40 = vrot.slane %v704_v17, 4  ;;  %v7530_v60 = vld [vmem:[%s11324_s1 + $0x160] sm:$0xff]  }
  0x4a   : > { %6336 = vmatprep.subr.bf16.mxu0 %v7520_v33  ;;  %v8261_v21 = vcombine.low %v668_v8, %v678_v18  ;;  %v687_v22 = vrot.slane %v686_v14, 4  ;;  %v701_v23 = vrot.slane %v699_v15, 5  ;;  %v7527_v33 = vld [vmem:[%s11324_s1 + $0x1e0] sm:$0xff]   ;;  %v709_v41 = vrot.slane %v707_v20, 5  ;;  %v8335_v18 = vld [vmem:[%s8102_s13 + $0x48] sm:$0xf] }
  0x4b   : > { %6337 = vmatpush3.bf16.msra.mxu0 %v7521_v36  ;;  %v697_v35 = vrot.slane %v696_v27, 4  ;;  %v851_v36 = vrot.slane %v849_v30, 4  ;;  %v713_v42 = vshll.u32 %v8255_v16, 16  ;;  %v723_v44 = vshll.u32 %v588_v39, 16 }
  0x4c   : > { %6401 = vmatpush3.bf16.msra.mxu1 %v7518_v32  ;;  %6338 = vmatprep.subr.bf16.mxu0 %v7525_v13  ;;  %v852_v32 = vrot.slane %v585_v6, 5  ;;  %v692_v34 = vsel %vm8146_vm5, %v687_v22, %v691_v19  ;;  %v850_v47 = vsel %vm8132_vm4, %v5787_v29, %v849_v30  ;;  %v728_v49 = vshrl.u32 %v8287_v45, 16  ;;  %v7532_v6 = vld [vmem:[%s11324_s1 + $0x1d8] sm:$0xff]   ;;  %v591_v13 = vld [vmem:[%s8102_s13 + $0x44] sm:$0x1] }
  0x4d   : > { %6402 = vmatprep.subr.bf16.mxu1 %v7522_v51  ;;  %v702_v46 = vsel %vm8146_vm5, %v697_v35, %v701_v23  ;;  %v731_v50 = vshll.u32 %v8287_v45, 16  ;;  %v710_v55 = vor.u32 %v709_v41, %v706_v40  ;;  %v715_v56 = vrot.slane %v713_v42, 5  ;;  %v8342_v23 = vld [vmem:[%s8102_s13 + $0x4c] sm:$0xf]  ;;  %v7538_v42 = vld [vmem:[%s11324_s1 + $0x190] sm:$0xff]  }
  0x4e   : > { %1549 = vmatmul.mubr.bf16.gmra.mxu0 %v8139_v57  ;;  %v846_v57 = vsel %vm8132_vm4, %v844_v5, %v845_v62  ;;  %v8300_v51 = vcombine.low %v692_v34, %v702_v46  ;;  %v853_v54 = vsel %vm8132_vm4, %v851_v36, %v852_v32  ;;  %v725_v61 = vrot.slane %v723_v44, 5  ;;  %v7536_v32 = vld [vmem:[%s11324_s1 + $0x118] sm:$0xff]   ;;  %v7537_v36 = vld [vmem:[%s11324_s1 + $0x1d0] sm:$0xff]  }
  0x4f   : > { %1646 = vmatmul.mubr.bf16.gmra.mxu1 %v8226_v52  ;;  %v8267_v26 = vcombine.low %v843_v4, %v846_v57  ;;  %1556 = vmatprep.mubr.bf16.mxu0 %v8261_v21  ;;  %v741_v62 = vshrl.u32 %v8296_v48, 16  ;;  %v711_v2 = vrot.slane %v710_v55, 4  ;;  %v720_v3 = vor.u32 %v719_v43, %v715_v56  ;;  %v7535_v57 = vld [vmem:[%s11324_s1 + $0x158] sm:$0xff]  }
  0x50   : > { %1653 = vmatprep.mubr.bf16.mxu1 %v8230_v58  ;;  %6403 = vmatpush3.bf16.msra.mxu1 %v7523_v63  ;;  %v5788_v63 = vrot.slane %v8246_v12, 9  ;;  %v856_v4 = vrot.slane %v8255_v16, 5  ;;  %v859_v5 = vrot.slane %v588_v39, 5  ;;  %v8318_v7 = vcombine.low %v850_v47, %v853_v54  ;;  %v7533_v12 = vld [vmem:[%s11324_s1 + $0x198] sm:$0xff]  }
  0x51   : > { %6339 = vmatpush3.bf16.msra.mxu0 %v7526_v25  ;;  %6404 = vmatprep.subr.bf16.mxu1 %v7527_v33  ;;  %v716_v8 = vsel %vm8146_vm5, %v711_v2, %v715_v56  ;;  %v721_v9 = vrot.slane %v720_v3, 4  ;;  %v8324_v10 = vcombine.low %v8287_v45, %v8296_v48  ;;  %v730_v14 = vrot.slane %v728_v49, 4 }
  0x52   : > { %6340 = vmatprep.subr.bf16.mxu0 %v7530_v60  ;;  %v858_v11 = vrot.slane %v856_v4, 4  ;;  %v733_v15 = vrot.slane %v731_v50, 5  ;;  %v737_v16 = vshll.u32 %v8296_v48, 16  ;;  %v743_v17 = vrot.slane %v741_v62, 4  ;;  %v8375_v50 = vld [vmem:[%s8102_s13 + $0x50] sm:$0x1] }
  0x53   : > { %v726_v19 = vsel %vm8146_vm5, %v721_v9, %v725_v61  ;;  %v857_v20 = vsel %vm8132_vm4, %v5788_v63, %v856_v4  ;;  %v747_v22 = vshll.u32 %v591_v13, 16  ;;  %v752_v24 = vshrl.u32 %v8335_v18, 16  ;;  %v8380_v61 = vld [vmem:[%s8102_s13 + $0x54] sm:$0xf] }
  0x54   : > { %6405 = vmatpush3.bf16.msra.mxu1 %v7528_v38  ;;  %v8347_v25 = vcombine.low %v716_v8, %v726_v19  ;;  %v860_v27 = vsel %vm8132_vm4, %v858_v11, %v859_v5  ;;  %v734_v29 = vor.u32 %v733_v15, %v730_v14  ;;  %v739_v30 = vrot.slane %v737_v16, 5  ;;  %v7542_v16 = vld [vmem:[%s11324_s1 + $0x1c8] sm:$0xff]  }
  0x55   : > { %6341 = vmatpush3.bf16.msra.mxu0 %v7531_v1  ;;  %6406 = vmatprep.subr.bf16.mxu1 %v7532_v6  ;;  %v749_v33 = vrot.slane %v747_v22, 5  ;;  %v755_v34 = vshll.u32 %v8335_v18, 16  ;;  %v765_v35 = vshrl.u32 %v8342_v23, 16  ;;  %v5789_v40 = vrot.slane %v8287_v45, 9  ;;  %v8387_v1 = vld [vmem:[%s8102_s13 + $0x58] sm:$0xf] }
  0x56   : > { %1557 = vmatmul.mubr.bf16.gmra.mxu0 %v8189_v28  ;;  %6342 = vmatprep.subr.bf16.mxu0 %v7535_v57  ;;  %v735_v38 = vrot.slane %v734_v29, 4  ;;  %v744_v39 = vor.u32 %v743_v17, %v739_v30  ;;  %v863_v41 = vrot.slane %v8296_v48, 5  ;;  %v8366_v43 = vcombine.low %v857_v20, %v860_v27  ;;  %v7540_v6 = vld [vmem:[%s11324_s1 + $0x150] sm:$0xff]   ;;  %v597_v27 = vld [vmem:[%s8102_s13 + $0x5c] sm:$0x1]  ;;  %v7545_v29 = vld [vmem:[%s11324_s1 + $0x148] sm:$0xff]  }
  0x57   : > { %1654 = vmatmul.mubr.bf16.gmra.mxu1 %v8267_v26  ;;  %1564 = vmatprep.mubr.bf16.mxu0 %v8300_v51  ;;  %v866_v44 = vrot.slane %v591_v13, 5  ;;  %v754_v46 = vrot.slane %v752_v24, 4  ;;  %v8372_v45 = vcombine.low %v8335_v18, %v8342_v23  ;;  %v757_v54 = vrot.slane %v755_v34, 5 }
  0x58   : > { %1661 = vmatprep.mubr.bf16.mxu1 %v8274_v31  ;;  %6407 = vmatpush3.bf16.msra.mxu1 %v7533_v12  ;;  %v740_v47 = vsel %vm8146_vm5, %v735_v38, %v739_v30  ;;  %v745_v49 = vrot.slane %v744_v39, 4  ;;  %v865_v48 = vrot.slane %v863_v41, 4  ;;  %v761_v55 = vshll.u32 %v8342_v23, 16  ;;  %v7541_v12 = vld [vmem:[%s11324_s1 + $0x110] sm:$0xff]  }
  0x59   : > { %6343 = vmatpush3.bf16.msra.mxu0 %v7536_v32  ;;  %6408 = vmatprep.subr.bf16.mxu1 %v7537_v36  ;;  %v767_v56 = vrot.slane %v765_v35, 4  ;;  %v771_v60 = vshll.u32 %v8375_v50, 16  ;;  %v864_v63 = vsel %vm8132_vm4, %v5789_v40, %v863_v41  ;;  %v758_v4 = vor.u32 %v757_v54, %v754_v46  ;;  %v7548_v54 = vld [vmem:[%s11324_s1 + $0x180] sm:$0xff]  }
  0x5a   : > { %v750_v62 = vsel %vm8146_vm5, %v745_v49, %v749_v33  ;;  %v867_v3 = vsel %vm8132_vm4, %v865_v48, %v866_v44  ;;  %v763_v5 = vrot.slane %v761_v55, 5  ;;  %v776_v8 = vshrl.u32 %v8380_v61, 16  ;;  %6344 = vmatprep.subr.bf16.mxu0 %v7540_v6  ;;  %v7547_v44 = vld [vmem:[%s11324_s1 + $0x1c0] sm:$0xff]  }
  0x5b   : > { %v8389_v2 = vcombine.low %v740_v47, %v750_v62  ;;  %v779_v9 = vshll.u32 %v8380_v61, 16  ;;  %v789_v11 = vshrl.u32 %v8387_v1, 16  ;;  %v759_v13 = vrot.slane %v758_v4, 4  ;;  %v8441_v48 = vld [vmem:[%s8102_s13 + $0x60] sm:$0xf] }
  0x5c   : > { %6409 = vmatpush3.bf16.msra.mxu1 %v7538_v42  ;;  %v768_v57 = vor.u32 %v767_v56, %v763_v5  ;;  %v773_v14 = vrot.slane %v771_v60, 5  ;;  %v870_v15 = vrot.slane %v8342_v23, 5  ;;  %v8410_v17 = vcombine.low %v864_v63, %v867_v3  ;;  %v7543_v23 = vld [vmem:[%s11324_s1 + $0x188] sm:$0xff]   ;;  %v7549_v62 = vld [vmem:[%s11324_s1 + $0x140] sm:$0xff]  }
  0x5d   : > { %v764_v19 = vsel %vm8146_vm5, %v759_v13, %v763_v5  ;;  %v8416_v22 = vcombine.low %v8380_v61, %v8387_v1  ;;  %v5790_v24 = vrot.slane %v8335_v18, 9  ;;  %6345 = vmatpush3.bf16.msra.mxu0 %v7541_v12  ;;  %6410 = vmatprep.subr.bf16.mxu1 %v7542_v16  ;;  %v778_v30 = vrot.slane %v776_v8, 4  ;;  %v7546_v42 = vld [vmem:[%s11324_s1 + $0x108] sm:$0xff]   ;;  %v7550_v8 = vld [vmem:[%s11324_s1 + $0x100] sm:$0xff]   ;;  %v7551_v12 = vld [vmem:[%s11324_s1 + $0x238] sm:$0xff]  }
  0x5e   : > { %1565 = vmatmul.mubr.bf16.gmra.mxu0 %v8230_v58  ;;  %v769_v20 = vrot.slane %v768_v57, 4  ;;  %v781_v32 = vrot.slane %v779_v9, 5  ;;  %v785_v33 = vshll.u32 %v8387_v1, 16  ;;  %v791_v34 = vrot.slane %v789_v11, 4  ;;  %6346 = vmatprep.subr.bf16.mxu0 %v7545_v29 }
  0x5f   : > { %1662 = vmatmul.mubr.bf16.gmra.mxu1 %v8318_v7  ;;  %1572 = vmatprep.mubr.bf16.mxu0 %v8347_v25  ;;  %v872_v18 = vrot.slane %v870_v15, 4  ;;  %v873_v36 = vrot.slane %v8375_v50, 5  ;;  %v795_v38 = vshll.u32 %v597_v27, 16  ;;  %v8444_v50 = vld [vmem:[%s8102_s13 + $0x64] sm:$0xf]  ;;  %v871_v55 = vsel %vm8132_vm4, %v5790_v24, %v870_v15  ;;  %v7662_v15 = vld [vmem:[%s11324_s1 + $0x38] sm:$0xff]  }
  0x60   : > { %1669 = vmatprep.mubr.bf16.mxu1 %v8324_v10  ;;  %v774_v35 = vsel %vm8146_vm5, %v769_v20, %v773_v14  ;;  %6411 = vmatpush3.bf16.msra.mxu1 %v7543_v23  ;;  %v782_v40 = vor.u32 %v781_v32, %v778_v30  ;;  %v787_v41 = vrot.slane %v785_v33, 5  ;;  %v877_v60 = vrot.slane %v8387_v1, 5  ;;  %v7552_v14 = vld [vmem:[%s11324_s1 + $0x230] sm:$0xff]   ;;  %v7665_v24 = vld [vmem:[%s11324_s1 + $0x68] sm:$0xff]   ;;  %v7554_v23 = vld [vmem:[%s11324_s1 + $0x220] sm:$0xff]  }
  0x61   : > { %v8430_v39 = vcombine.low %v764_v19, %v774_v35  ;;  %v797_v49 = vrot.slane %v795_v38, 5  ;;  %v874_v56 = vsel %vm8132_vm4, %v872_v18, %v873_v36  ;;  %v5791_v4 = vrot.slane %v8380_v61, 9  ;;  %6347 = vmatpush3.bf16.msra.mxu0 %v7546_v42  ;;  %6412 = vmatprep.subr.bf16.mxu1 %v7547_v44  ;;  %v7664_v19 = vld [vmem:[%s11324_s1 + $0x30] sm:$0xff]   ;;  %v7666_v32 = vld [vmem:[%s11324_s1 + $0x28] sm:$0xff]   ;;  %v7668_v38 = vld [vmem:[%s11324_s1 + $0x20] sm:$0xff]  }
  0x62   : > { %v783_v46 = vrot.slane %v782_v40, 4  ;;  %v792_v47 = vor.u32 %v791_v34, %v787_v41  ;;  %6348 = vmatprep.subr.bf16.mxu0 %v7549_v62  ;;  %v8462_v5 = vcombine.low %v871_v55, %v874_v56  ;;  %v880_v1 = vrot.slane %v597_v27, 5  ;;  %v7667_v34 = vld [vmem:[%s11324_s1 + $0x60] sm:$0xff]   ;;  %v8538_v18 = vld [vmem:[%s8102_s13 + $0x68] sm:$0x1]  ;;  %v7670_v56 = vld [vmem:[%s11324_s1 + $0x18] sm:$0xff]  }
  0x63   : > { %v8474_v61 = vcombine.low %v8441_v48, %v8444_v50  ;;  %v879_v11 = vrot.slane %v877_v60, 4  ;;  %v886_v16 = vshll.u32 %v8441_v48, 16  ;;  %v896_v20 = vshrl.u32 %v8444_v50, 16  ;;  %v8541_v36 = vld [vmem:[%s8102_s13 + $0x6c] sm:$0xf]  ;;  %v7671_v62 = vld [vmem:[%s11324_s1 + $0x50] sm:$0xff]  }
  0x64   : > { %v788_v63 = vsel %vm8146_vm5, %v783_v46, %v787_v41  ;;  %v793_v3 = vrot.slane %v792_v47, 4  ;;  %6413 = vmatpush3.bf16.msra.mxu1 %v7548_v54  ;;  %v892_v30 = vshll.u32 %v8444_v50, 16  ;;  %v8547_v40 = vld [vmem:[%s8102_s13 + $0x70] sm:$0xf]  ;;  %v7669_v41 = vld [vmem:[%s11324_s1 + $0x58] sm:$0xff]   ;;  %v917_v47 = vshrl.u32 %v8541_v36, 16 }
  0x65   : > { %6478 = vmatprep.subr.bf16.mxu1 %v8007_v0  ;;  %6349 = vmatpush3.bf16.msra.mxu0 %v7550_v8  ;;  %v878_v0 = vsel %vm8132_vm4, %v5791_v4, %v877_v60  ;;  %v881_v13 = vsel %vm8132_vm4, %v879_v11, %v880_v1  ;;  %v888_v29 = vrot.slane %v886_v16, 5  ;;  %v898_v33 = vrot.slane %v896_v20, 4  ;;  %v7556_v46 = vld [vmem:[%s11324_s1 + $0x210] sm:$0xff]   ;;  %v8572_v60 = vld [vmem:[%s8102_s13 + $0x60] sm:$0xf] }
  0x66   : > { %1573 = vmatmul.mubr.bf16.gmra.mxu0 %v8274_v31  ;;  %v798_v6 = vsel %vm8146_vm5, %v793_v3, %v797_v49  ;;  %7294 = vmatprep.subr.bf16.mxu0 %v7551_v12  ;;  %v8487_v57 = vcombine.low %v878_v0, %v881_v13  ;;  %v8535_v35 = vrot.slane %v892_v30, 5  ;;  %v920_v49 = vshll.u32 %v8541_v36, 16  ;;  %v8585_v1 = vld [vmem:[%s8102_s13 + $0x74] sm:$0x1]  ;;  %v8593_v13 = vld [vmem:[%s8102_s13 + $0x68] sm:$0x1] }
  0x67   : > { %1670 = vmatmul.mubr.bf16.gmra.mxu1 %v8366_v43  ;;  %1580 = vmatprep.mubr.bf16.mxu0 %v8389_v2  ;;  %v8470_v9 = vcombine.low %v788_v63, %v798_v6  ;;  %v902_v54 = vshll.u32 %v8538_v18, 16  ;;  %v926_v55 = vshll.u32 %v8547_v40, 16  ;;  %v911_v3 = vrot.slane %v8444_v50, 5  ;;  %v7557_v6 = vld [vmem:[%s11324_s1 + $0x208] sm:$0xff]  }
  0x68   : > { %1677 = vmatprep.mubr.bf16.mxu1 %v8372_v45  ;;  %v899_v44 = vor.u32 %v898_v33, %v8535_v35  ;;  %v914_v4 = vrot.slane %v8538_v18, 5  ;;  %v919_v8 = vrot.slane %v917_v47, 4  ;;  %v922_v11 = vrot.slane %v920_v49, 5 }
  0x69   : > { %v8590_v0 = vrot.slane %v926_v55, 5  ;;  %v2125_v16 = vshll.u32 %v8572_v60, 16  ;;  %v904_v20 = vrot.slane %v902_v54, 5  ;;  %v936_v30 = vshll.u32 %v8585_v1, 16  ;;  %v7676_v55 = vld [vmem:[%s11324_s1] sm:$0xff]  }
  0x6a   : > { %v8577_v63 = vrot.slane %v899_v44, 4 }
  0x6b   : > { %v2127_v33 = vrot.slane %v2125_v16, 5  ;;  %v8637_v49 = vrot.slane %v936_v30, 5 }
  0x6e   : > { %1581 = vmatmul.mubr.bf16.gmra.mxu0 %v8324_v10 }
  0x6f   : > { %1678 = vmatmul.mubr.bf16.gmra.mxu1 %v8410_v17  ;;  %1588 = vmatprep.mubr.bf16.mxu0 %v8430_v39 }
  0x70   : > { %1685 = vmatprep.mubr.bf16.mxu1 %v8416_v22 }
  0x76   : > { %1589 = vmatmul.mubr.bf16.gmra.mxu0 %v8372_v45 }
  0x77   : > { %1686 = vmatmul.mubr.bf16.gmra.mxu1 %v8462_v5  ;;  %1596 = vmatprep.mubr.bf16.mxu0 %v8470_v9 }
  0x78   : > { %1693 = vmatprep.mubr.bf16.mxu1 %v8474_v61 }
  0x7e   : > { %1597 = vmatmul.mubr.bf16.gmra.mxu0 %v8416_v22 }
  0x7f   : > { %1694 = vmatmul.mubr.bf16.gmra.mxu1 %v8487_v57  ;;  %1734 = vmatprep.mubr.bf16.mxu0 %v8226_v52  ;;  %v883_v52 = vshrl.u32 %v8441_v48, 16 }
  0x80   : > { %1831 = vmatprep.mubr.bf16.mxu1 %v8261_v21 }
  0x81   : > { %v885_v27 = vrot.slane %v883_v52, 4 }
  0x86   : > { %1735 = vmatmul.mubr.bf16.vlgmr.msra.gmra.mxu0 %v8205_v37  ;;  %v7663_v37 = vld [vmem:[%s11324_s1 + $0x70] sm:$0xff]  }
  0x87   : > { %1832 = vmatmul.mubr.bf16.vlgmr.msra.gmra.mxu1 %v8189_v28  ;;  %1742 = vmatprep.mubr.bf16.mxu0 %v8267_v26  ;;  %v7553_v28 = vld [vmem:[%s11324_s1 + $0x228] sm:$0xff]  }
  0x88   : > { %6479 = vmatpush3.bf16.msra.mxu1 %v7662_v15  ;;  %1839 = vmatprep.mubr.bf16.mxu1 %v8300_v51  ;;  %v7672_v15 = vld [vmem:[%s11324_s1 + $0x10] sm:$0xff]  }
  0x89   : > { %7295 = vmatpush3.bf16.msra.mxu0 %v7551_v12  ;;  %6480 = vmatprep.subr.bf16.mxu1 %v7663_v37  ;;  %v8588_v12 = vld [vmem:[%s8102_s13 + $0x64] sm:$0xf]  ;;  %v7673_v37 = vld [vmem:[%s11324_s1 + $0x48] sm:$0xff]  }
  0x8a   : > { %7296 = vmatprep.subr.bf16.mxu0 %v7552_v14 }
  0x8c   : > { %6481 = vmatpush3.bf16.msra.mxu1 %v7664_v19  ;;  %v2131_v19 = vshll.u32 %v8588_v12, 16 }
  0x8d   : > { %7297 = vmatpush3.bf16.msra.mxu0 %v7552_v14  ;;  %6482 = vmatprep.subr.bf16.mxu1 %v7665_v24  ;;  %v2122_v14 = vshrl.u32 %v8572_v60, 16  ;;  %v2135_v24 = vshrl.u32 %v8588_v12, 16 }
  0x8e   : > { %7298 = vmatprep.subr.bf16.mxu0 %v7553_v28  ;;  %1743 = vmatmul.mubr.bf16.gmra.mxu0 %v8261_v21  ;;  %v889_v21 = vor.u32 %v888_v29, %v885_v27  ;;  %v8617_v27 = vrot.slane %v911_v3, 4  ;;  %v923_v29 = vor.u32 %v922_v11, %v919_v8  ;;  %v7677_v8 = vld [vmem:[%s11324_s1 + $0xf8] sm:$0xff]  }
  0x8f   : > { %1840 = vmatmul.mubr.bf16.gmra.mxu1 %v8230_v58  ;;  %1750 = vmatprep.mubr.bf16.mxu0 %v8318_v7  ;;  %v7555_v58 = vld [vmem:[%s11324_s1 + $0x218] sm:$0xff]   ;;  %v2137_v44 = vrot.slane %v2135_v24, 4 }
  0x90   : > { %1847 = vmatprep.mubr.bf16.mxu1 %v8347_v25  ;;  %6483 = vmatpush3.bf16.msra.mxu1 %v7666_v32  ;;  %v8552_v42 = vrot.slane %v889_v21, 4  ;;  %v8628_v21 = vrot.slane %v2131_v19, 5  ;;  %v8635_v47 = vrot.slane %v923_v29, 4  ;;  %v7678_v11 = vld [vmem:[%s11324_s1 + $0x178] sm:$0xff]   ;;  %v8679_v19 = vld [vmem:[%s8102_s13 + $0x80] sm:$0x1] }
  0x91   : > { %7299 = vmatpush3.bf16.msra.mxu0 %v7553_v28  ;;  %6484 = vmatprep.subr.bf16.mxu1 %v7667_v34  ;;  %v7559_v28 = vld [vmem:[%s11324_s1 + $0x200] sm:$0xff]   ;;  %v2141_v34 = vshll.u32 %v8593_v13, 16 }
  0x92   : > { %7300 = vmatprep.subr.bf16.mxu0 %v7554_v23  ;;  %v929_v50 = vsel %vm8146_vm5, %v8635_v47, %v8590_v0 }
  0x94   : > { %6485 = vmatpush3.bf16.msra.mxu1 %v7668_v38  ;;  %v8631_v38 = vld [vmem:[%s8102_s13 + $0x70] sm:$0xf] }
  0x95   : > { %7301 = vmatpush3.bf16.msra.mxu0 %v7554_v23  ;;  %6486 = vmatprep.subr.bf16.mxu1 %v7669_v41  ;;  %v8611_v23 = vld [vmem:[%s8102_s13 + $0x6c] sm:$0xf]  ;;  %v2159_v16 = vshrl.u32 %v8631_v38, 16 }
  0x96   : > { %7302 = vmatprep.subr.bf16.mxu0 %v7555_v58  ;;  %1751 = vmatmul.mubr.bf16.gmra.mxu0 %v8300_v51  ;;  %v930_v51 = vshrl.u32 %v8547_v40, 16  ;;  %v2146_v41 = vshrl.u32 %v8611_v23, 16 }
  0x97   : > { %1848 = vmatmul.mubr.bf16.gmra.mxu1 %v8274_v31  ;;  %1758 = vmatprep.mubr.bf16.mxu0 %v8366_v43  ;;  %v5792_v31 = vrot.slane %v8441_v48, 9  ;;  %v915_v48 = vsel %vm8132_vm4, %v8617_v27, %v914_v4 }
  0x98   : > { %1855 = vmatprep.mubr.bf16.mxu1 %v8389_v2  ;;  %6487 = vmatpush3.bf16.msra.mxu1 %v7670_v56  ;;  %v932_v52 = vrot.slane %v930_v51, 4  ;;  %v8644_v56 = vrot.slane %v2141_v34, 5  ;;  %v8647_v51 = vld [vmem:[%s8102_s13 + $0x78] sm:$0xf] }
  0x99   : > { %7303 = vmatpush3.bf16.msra.mxu0 %v7555_v58  ;;  %6488 = vmatprep.subr.bf16.mxu1 %v7671_v62  ;;  %v7675_v58 = vld [vmem:[%s11324_s1 + $0x40] sm:$0xff]   ;;  %v895_v62 = vsel %vm8146_vm5, %v8552_v42, %v8535_v35  ;;  %v2155_v35 = vshll.u32 %v8631_v38, 16  ;;  %v8664_v42 = vld [vmem:[%s8102_s13 + $0x7c] sm:$0xf] }
  0x9a   : > { %7304 = vmatprep.subr.bf16.mxu0 %v7556_v46  ;;  %v933_v32 = vor.u32 %v932_v52, %v8590_v0  ;;  %v2179_v29 = vshll.u32 %v8664_v42, 16  ;;  %v2183_v30 = vshrl.u32 %v8664_v42, 16 }
  0x9b   : > { %v8696_v34 = vrot.slane %v2155_v35, 5 }
  0x9c   : > { %6489 = vmatpush3.bf16.msra.mxu1 %v7672_v15  ;;  %v8639_v54 = vrot.slane %v933_v32, 4  ;;  %v2138_v15 = vor.u32 %v2137_v44, %v8628_v21  ;;  %v8708_v35 = vrot.slane %v2179_v29, 5  ;;  %v945_v29 = vrot.slane %v8547_v40, 5 }
  0x9d   : > { %7305 = vmatpush3.bf16.msra.mxu0 %v7556_v46  ;;  %6490 = vmatprep.subr.bf16.mxu1 %v7673_v37  ;;  %v2149_v46 = vshll.u32 %v8611_v23, 16  ;;  %v8671_v37 = vld [vmem:[%s8102_s13 + $0x84] sm:$0xf] }
  0x9e   : > { %7306 = vmatprep.subr.bf16.mxu0 %v7557_v6  ;;  %1759 = vmatmul.mubr.bf16.gmra.mxu0 %v8347_v25  ;;  %v2124_v25 = vrot.slane %v2122_v14, 4  ;;  %v2148_v14 = vrot.slane %v2146_v41, 4  ;;  %v2194_v32 = vshrl.u32 %v8671_v37, 16 }
  0x9f   : > { %1856 = vmatmul.mubr.bf16.gmra.mxu1 %v8324_v10  ;;  %1766 = vmatprep.mubr.bf16.mxu0 %v8410_v17  ;;  %v7674_v10 = vld [vmem:[%s11324_s1 + $0x8] sm:$0xff]   ;;  %v2151_v52 = vrot.slane %v2149_v46, 5 }
  0xa0   : > { %1863 = vmatprep.mubr.bf16.mxu1 %v8430_v39  ;;  %6491 = vmatpush3.bf16.msra.mxu1 %v7674_v10  ;;  %v8692_v10 = vrot.slane %v2138_v15, 4  ;;  %v8711_v15 = vld [vmem:[%s8102_s13 + $0x8c] sm:$0x1] }
  0xa1   : > { %7307 = vmatpush3.bf16.msra.mxu0 %v7557_v6  ;;  %6492 = vmatprep.subr.bf16.mxu1 %v7675_v58  ;;  %v905_v6 = vsel %vm8146_vm5, %v8577_v63, %v904_v20  ;;  %v2128_v63 = vor.u32 %v2127_v33, %v2124_v25  ;;  %v8682_v20 = vld [vmem:[%s8102_s13 + $0x88] sm:$0xf]  ;;  %v2197_v33 = vshll.u32 %v8671_v37, 16  ;;  %v2161_v58 = vrot.slane %v2159_v16, 4 }
  0xa2   : > { %7308 = vmatprep.subr.bf16.mxu0 %v7559_v28  ;;  %v8686_v24 = vcombine.low %v895_v62, %v905_v6  ;;  %v2203_v41 = vshll.u32 %v8682_v20, 16  ;;  %v2207_v44 = vshrl.u32 %v8682_v20, 16  ;;  %v2189_v6 = vshll.u32 %v8679_v19, 16 }
  0xa3   : > { %v8690_v25 = vrot.slane %v2128_v63, 4  ;;  %v2185_v63 = vrot.slane %v2183_v30, 4 }
  0xa4   : > { %6493 = vmatpush3.bf16.msra.mxu1 %v7676_v55  ;;  %v8731_v18 = vrot.slane %v2203_v41, 5  ;;  %v2209_v4 = vrot.slane %v2207_v44, 4 }
  0xa5   : > { %7309 = vmatpush3.bf16.msra.mxu0 %v7559_v28  ;;  %6606 = vmatprep.subr.bf16.mxu1 %v7678_v11  ;;  %v8676_v28 = vld [vmem:[%s8102_s13 + $0x74] sm:$0x1]  ;;  %v2152_v11 = vor.u32 %v2151_v52, %v2148_v14  ;;  %v8734_v14 = vld [vmem:[%s8102_s13 + $0x90] sm:$0xf]  ;;  %v2186_v16 = vor.u32 %v2185_v63, %v8708_v35 }
  0xa6   : > { %6542 = vmatprep.subr.bf16.mxu0 %v7677_v8  ;;  %1767 = vmatmul.mubr.bf16.gmra.mxu0 %v8389_v2  ;;  %v2173_v2 = vshll.u32 %v8647_v51, 16  ;;  %v2165_v46 = vshll.u32 %v8676_v28, 16  ;;  %v912_v8 = vsel %vm8132_vm4, %v5792_v31, %v911_v3  ;;  %v2196_v31 = vrot.slane %v2194_v32, 4 }
  0xa7   : > { %1864 = vmatmul.mubr.bf16.gmra.mxu1 %v8372_v45  ;;  %1774 = vmatprep.mubr.bf16.mxu0 %v8462_v5  ;;  %v2170_v45 = vshrl.u32 %v8647_v51, 16  ;;  %v2199_v3 = vrot.slane %v2197_v33, 5  ;;  %v8736_v0 = vcombine.low %v912_v8, %v915_v48  ;;  %v2153_v47 = vrot.slane %v2152_v11, 4  ;;  %v8755_v8 = vld [vmem:[%s8102_s13 + $0x9c] sm:$0xf] }
  0xa8   : > { %1871 = vmatprep.mubr.bf16.mxu1 %v8470_v9  ;;  %v2175_v62 = vrot.slane %v2173_v2, 5  ;;  %v2167_v52 = vrot.slane %v2165_v46, 5  ;;  %v2213_v2 = vshll.u32 %v8711_v15, 16  ;;  %v8744_v32 = vrot.slane %v2189_v6, 5  ;;  %v8758_v11 = vld [vmem:[%s8102_s13 + $0xa0] sm:$0xf] }
  0xa9   : > { %v2172_v55 = vrot.slane %v2170_v45, 4  ;;  %v8740_v45 = vld [vmem:[%s8102_s13 + $0x94] sm:$0xf]  ;;  %v2210_v33 = vor.u32 %v2209_v4, %v8731_v18  ;;  %v2218_v41 = vshrl.u32 %v8734_v14, 16  ;;  %v2221_v46 = vshll.u32 %v8734_v14, 16 }
  0xaa   : > { %v2187_v63 = vrot.slane %v2186_v16, 4  ;;  %v5793_v6 = vrot.slane %v8541_v36, 9 }
  0xab   : > { %v2176_v27 = vor.u32 %v2175_v62, %v2172_v55  ;;  %v2227_v55 = vshll.u32 %v8740_v45, 16  ;;  %v2231_v62 = vshrl.u32 %v8740_v45, 16  ;;  %v2223_v4 = vrot.slane %v2221_v46, 5 }
  0xad   : > { %v2177_v44 = vrot.slane %v2176_v27, 4  ;;  %v8783_v27 = vrot.slane %v2227_v55, 5  ;;  %v2233_v16 = vrot.slane %v2231_v62, 4  ;;  %v7684_v62 = vld [vmem:[%s11324_s1 + $0x130] sm:$0xff]  }
  0xae   : > { %1775 = vmatmul.mubr.bf16.gmra.mxu0 %v8430_v39  ;;  %v2162_v39 = vor.u32 %v2161_v58, %v8696_v34  ;;  %v8748_v58 = vld [vmem:[%s8102_s13 + $0x98] sm:$0x1] }
  0xaf   : > { %1872 = vmatmul.mubr.bf16.gmra.mxu1 %v8416_v22  ;;  %1782 = vmatprep.mubr.bf16.mxu0 %v8487_v57  ;;  %v939_v22 = vsel %vm8146_vm5, %v8639_v54, %v8637_v49  ;;  %v2200_v54 = vor.u32 %v2199_v3, %v2196_v31  ;;  %v8769_v31 = vrot.slane %v945_v29, 4  ;;  %v948_v3 = vrot.slane %v8585_v1, 5 }
  0xb0   : > { %1879 = vmatprep.mubr.bf16.mxu1 %v8686_v24  ;;  %v5822_v49 = vcombine.low %v929_v50, %v939_v22  ;;  %v2163_v30 = vrot.slane %v2162_v39, 4  ;;  %v8765_v50 = vrot.slane %v2213_v2, 5  ;;  %v8781_v22 = vrot.slane %v2210_v33, 4 }
  0xb1   : > { %v8763_v48 = vrot.slane %v2200_v54, 4  ;;  %v2220_v39 = vrot.slane %v2218_v41, 4  ;;  %v2237_v54 = vshll.u32 %v8748_v58, 16  ;;  %v2245_v2 = vshll.u32 %v8755_v8, 16 }
  0xb2   : > { %v5953_v33 = vcombine.low %v8572_v60, %v8588_v12  ;;  %v2158_v41 = vsel %vm8146_vm5, %v2153_v47, %v8696_v34  ;;  %v2168_v46 = vsel %vm8146_vm5, %v2163_v30, %v2167_v52  ;;  %v7681_v34 = vld [vmem:[%s11324_s1 + $0xf0] sm:$0xff]   ;;  %v2182_v47 = vsel %vm8146_vm5, %v2177_v44, %v8708_v35  ;;  %v7685_v35 = vld [vmem:[%s11324_s1 + $0xe8] sm:$0xff]  }
  0xb3   : > { %v8801_v55 = vcombine.low %v2158_v41, %v2168_v46  ;;  %v2192_v52 = vsel %vm8146_vm5, %v2187_v63, %v8744_v32  ;;  %v8826_v30 = vcombine.low %v8611_v23, %v8631_v38  ;;  %v7686_v44 = vld [vmem:[%s11324_s1 + $0x168] sm:$0xff]   ;;  %v2224_v63 = vor.u32 %v2223_v4, %v2220_v39  ;;  %v8862_v4 = vld [vmem:[%s8102_s13 + $0xa4] sm:$0x1] }
  0xb4   : > { %v8837_v32 = vcombine.low %v2182_v47, %v2192_v52  ;;  %v2206_v39 = vsel %vm8146_vm5, %v8763_v48, %v8731_v18  ;;  %v2239_v41 = vrot.slane %v2237_v54, 5  ;;  %v8872_v46 = vld [vmem:[%s8102_s13 + $0xa8] sm:$0xf]  ;;  %v7690_v18 = vld [vmem:[%s11324_s1 + $0x160] sm:$0xff]   ;;  %v2342_v52 = vrot.slane %v8593_v13, 5 }
  0xb6   : > { %1783 = vmatmul.mubr.bf16.gmra.mxu0 %v8470_v9  ;;  %v2134_v9 = vsel %vm8146_vm5, %v8690_v25, %v8628_v21  ;;  %v2251_v21 = vshll.u32 %v8758_v11, 16  ;;  %v2255_v25 = vshrl.u32 %v8758_v11, 16 }
  0xb7   : > { %1880 = vmatmul.mubr.bf16.gmra.mxu1 %v8474_v61  ;;  %1790 = vmatprep.mubr.bf16.mxu0 %v8736_v0  ;;  %v2144_v61 = vsel %vm8146_vm5, %v8692_v10, %v8644_v56  ;;  %v5821_v56 = vcombine.low %v8541_v36, %v8547_v40  ;;  %v2261_v40 = vshll.u32 %v8862_v4, 16 }
  0xb8   : > { %1887 = vmatprep.mubr.bf16.mxu1 %v5822_v49  ;;  %v2242_v49 = vshrl.u32 %v8755_v8, 16  ;;  %v5961_v10 = vcombine.low %v2134_v9, %v2144_v61  ;;  %v2234_v9 = vor.u32 %v2233_v16, %v8783_v27  ;;  %v7687_v61 = vld [vmem:[%s11324_s1 + $0xa8] sm:$0xff]   ;;  %v2216_v16 = vsel %vm8146_vm5, %v8781_v22, %v8765_v50  ;;  %v7691_v50 = vld [vmem:[%s11324_s1 + $0xa0] sm:$0xff]   ;;  %v7692_v22 = vld [vmem:[%s11324_s1 + $0xd8] sm:$0xff]  }
  0xb9   : > { %v8885_v54 = vcombine.low %v2206_v39, %v2216_v16  ;;  %v7699_v39 = vld [vmem:[%s11324_s1 + $0x150] sm:$0xff]  }
  0xba   : > { %v2244_v48 = vrot.slane %v2242_v49, 4  ;;  %v946_v49 = vsel %vm8132_vm4, %v5793_v6, %v945_v29  ;;  %v2266_v29 = vshrl.u32 %v8872_v46, 16  ;;  %v2269_v6 = vshll.u32 %v8872_v46, 16 }
  0xbc   : > { %v2271_v16 = vrot.slane %v2269_v6, 5 }
  0xbe   : > { %1791 = vmatmul.mubr.bf16.gmra.mxu0 %v8686_v24  ;;  %v7680_v24 = vld [vmem:[%s11324_s1 + $0x138] sm:$0xff]  }
  0xbf   : > { %1888 = vmatmul.mubr.bf16.gmra.mxu1 %v5821_v56  ;;  %7310 = vmatprep.mubr.bf16.mxu0 %v8267_v26  ;;  %v7679_v26 = vld [vmem:[%s11324_s1 + $0xb8] sm:$0xff]   ;;  %v7688_v56 = vld [vmem:[%s11324_s1 + $0xe0] sm:$0xff]  }
  0xc0   : > { %2613 = vmatprep.mubr.bf16.mxu1 %v5961_v10  ;;  %v2225_v10 = vrot.slane %v2224_v63, 4  ;;  %v7697_v63 = vld [vmem:[%s11324_s1 + $0x118] sm:$0xff]  }
  0xc6   : > { %7311 = vmatmul.mubr.bf16.vlgmr.msra.gmra.mxu0 %v8318_v7  ;;  %v7682_v7 = vld [vmem:[%s11324_s1 + $0x170] sm:$0xff]  }
  0xc7   : > { %2614 = vmatmul.mubr.bf16.vlgmr.msra.gmra.mxu1 %v5953_v33  ;;  %6543 = vmatpush3.bf16.msra.mxu0 %v7679_v26  ;;  %v2235_v33 = vrot.slane %v2234_v9, 4  ;;  %v2247_v26 = vrot.slane %v2245_v2, 5  ;;  %v949_v2 = vsel %vm8132_vm4, %v8769_v31, %v948_v3  ;;  %v7694_v31 = vld [vmem:[%s11324_s1 + $0x98] sm:$0xff]  }
  0xc8   : > { %6607 = vmatpush3.bf16.msra.mxu1 %v7680_v24  ;;  %6544 = vmatprep.subr.bf16.mxu0 %v7681_v34  ;;  %v8877_v24 = vrot.slane %v2251_v21, 5  ;;  %v2257_v34 = vrot.slane %v2255_v25, 4  ;;  %v7693_v21 = vld [vmem:[%s11324_s1 + $0x120] sm:$0xff]   ;;  %v2339_v25 = vrot.slane %v8588_v12, 5 }
  0xc9   : > { %7314 = vmatprep.mubr.bf16.mxu0 %v8366_v43  ;;  %2621 = vmatprep.mubr.bf16.mxu1 %v8801_v55  ;;  %v7683_v43 = vld [vmem:[%s11324_s1 + $0xb0] sm:$0xff]   ;;  %v2248_v36 = vor.u32 %v2247_v26, %v2244_v48  ;;  %v2240_v12 = vsel %vm8146_vm5, %v2235_v33, %v2239_v41  ;;  %v7700_v41 = vld [vmem:[%s11324_s1 + $0xc8] sm:$0xff]   ;;  %v8958_v26 = vld [vmem:[%s8102_s13 + $0xb8] sm:$0xf] }
  0xca   : > { %6608 = vmatprep.subr.bf16.mxu1 %v7682_v7  ;;  %v8888_v7 = vld [vmem:[%s8102_s13 + $0xac] sm:$0xf]  ;;  %v2258_v1 = vor.u32 %v2257_v34, %v8877_v24  ;;  %v8955_v48 = vld [vmem:[%s8102_s13 + $0xb4] sm:$0xf]  ;;  %v2303_v6 = vshrl.u32 %v8958_v26, 16 }
  0xcb   : > { %6545 = vmatpush3.bf16.msra.mxu0 %v7683_v43  ;;  %v2275_v3 = vshll.u32 %v8888_v7, 16  ;;  %v2279_v47 = vshrl.u32 %v8888_v7, 16  ;;  %v7695_v43 = vld [vmem:[%s11324_s1 + $0xd0] sm:$0xff]   ;;  %v2249_v9 = vrot.slane %v2248_v36, 4 }
  0xcc   : > { %6609 = vmatpush3.bf16.msra.mxu1 %v7684_v62  ;;  %6546 = vmatprep.subr.bf16.mxu0 %v7685_v35  ;;  %v5943_v62 = vrot.slane %v8572_v60, 9  ;;  %v2341_v35 = vrot.slane %v2339_v25, 4  ;;  %v7698_v60 = vld [vmem:[%s11324_s1 + $0x90] sm:$0xff]  }
  0xcd   : > { %6610 = vmatprep.subr.bf16.mxu1 %v7686_v44  ;;  %v7696_v44 = vld [vmem:[%s11324_s1 + $0x158] sm:$0xff]   ;;  %v2281_v33 = vrot.slane %v2279_v47, 4  ;;  %v2349_v47 = vrot.slane %v8676_v28, 5  ;;  %v2305_v28 = vrot.slane %v2303_v6, 4 }
  0xce   : > { %7315 = vmatmul.mubr.bf16.gmra.mxu0 %v8410_v17  ;;  %v8855_v17 = vcombine.low %v8647_v51, %v8664_v42  ;;  %v2340_v34 = vsel %vm8132_vm4, %v5943_v62, %v2339_v25 }
  0xcf   : > { %2622 = vmatmul.mubr.bf16.gmra.mxu1 %v8826_v30  ;;  %6547 = vmatpush3.bf16.msra.mxu0 %v7687_v61  ;;  %v2259_v61 = vrot.slane %v2258_v1, 4  ;;  %v2293_v1 = vshll.u32 %v8955_v48, 16 }
  0xd0   : > { %7318 = vmatprep.mubr.bf16.mxu0 %v8462_v5  ;;  %6548 = vmatprep.subr.bf16.mxu0 %v7688_v56  ;;  %v7689_v5 = vld [vmem:[%s11324_s1 + $0x128] sm:$0xff]   ;;  %v2263_v56 = vrot.slane %v2261_v40, 5 }
  0xd1   : > { %2629 = vmatprep.mubr.bf16.mxu1 %v8837_v32  ;;  %6611 = vmatpush3.bf16.msra.mxu1 %v7689_v5  ;;  %v2268_v5 = vrot.slane %v2266_v29, 4  ;;  %v2299_v29 = vshll.u32 %v8958_v26, 16 }
  0xd2   : > { %6612 = vmatprep.subr.bf16.mxu1 %v7690_v18  ;;  %v8952_v18 = vld [vmem:[%s8102_s13 + $0xb0] sm:$0x1] }
  0xd3   : > { %6549 = vmatpush3.bf16.msra.mxu0 %v7691_v50  ;;  %v2343_v50 = vsel %vm8132_vm4, %v2341_v35, %v2342_v52  ;;  %v2272_v25 = vor.u32 %v2271_v16, %v2268_v5  ;;  %v2285_v36 = vshll.u32 %v8952_v18, 16  ;;  %v7704_v52 = vld [vmem:[%s11324_s1 + $0x148] sm:$0xff]  }
  0xd4   : > { %6550 = vmatprep.subr.bf16.mxu0 %v7692_v22  ;;  %v2254_v22 = vsel %vm8146_vm5, %v2249_v9, %v8877_v24  ;;  %v7702_v24 = vld [vmem:[%s11324_s1 + $0xc0] sm:$0xff]   ;;  %v2301_v9 = vrot.slane %v2299_v29, 5 }
  0xd5   : > { %6613 = vmatpush3.bf16.msra.mxu1 %v7693_v21  ;;  %v2264_v21 = vsel %vm8146_vm5, %v2259_v61, %v2263_v56  ;;  %v2273_v62 = vrot.slane %v2272_v25, 4  ;;  %v7706_v61 = vld [vmem:[%s11324_s1 + $0x1f8] sm:$0xff]   ;;  %v7707_v56 = vld [vmem:[%s11324_s1 + $0x108] sm:$0xff]  }
  0xd6   : > { %7319 = vmatmul.mubr.bf16.gmra.mxu0 %v8487_v57  ;;  %v2230_v57 = vsel %vm8146_vm5, %v2225_v10, %v8783_v27  ;;  %v8929_v27 = vcombine.low %v8671_v37, %v8682_v20  ;;  %6614 = vmatprep.subr.bf16.mxu1 %v7696_v44  ;;  %v8946_v10 = vrot.slane %v2275_v3, 5  ;;  %v2287_v44 = vrot.slane %v2285_v36, 5 }
  0xd7   : > { %2630 = vmatmul.mubr.bf16.gmra.mxu1 %v8855_v17  ;;  %6551 = vmatpush3.bf16.msra.mxu0 %v7694_v31  ;;  %v8935_v13 = vcombine.low %v2230_v57, %v2240_v12  ;;  %v8987_v31 = vcombine.low %v8734_v14, %v8740_v45  ;;  %v7703_v57 = vld [vmem:[%s11324_s1 + $0x110] sm:$0xff]   ;;  %v5969_v12 = vcombine.low %v2340_v34, %v2343_v50 }
  0xd8   : > { %7322 = vmatprep.mubr.bf16.mxu0 %v8736_v0  ;;  %6552 = vmatprep.subr.bf16.mxu0 %v7695_v43  ;;  %v5823_v0 = vcombine.low %v946_v49, %v949_v2  ;;  %v2346_v49 = vrot.slane %v8631_v38, 5  ;;  %v7701_v2 = vld [vmem:[%s11324_s1 + $0x88] sm:$0xff]   ;;  %v2282_v40 = vor.u32 %v2281_v33, %v8946_v10  ;;  %v2290_v38 = vshrl.u32 %v8955_v48, 16  ;;  %v7705_v43 = vld [vmem:[%s11324_s1 + $0x80] sm:$0xff]  }
  0xd9   : > { %2637 = vmatprep.mubr.bf16.mxu1 %v8885_v54  ;;  %6615 = vmatpush3.bf16.msra.mxu1 %v7697_v63  ;;  %v2295_v63 = vrot.slane %v2293_v1, 5  ;;  %v2278_v16 = vsel %vm8146_vm5, %v2273_v62, %v8946_v10  ;;  %v2353_v33 = vrot.slane %v8664_v42, 5  ;;  %v2306_v50 = vor.u32 %v2305_v28, %v2301_v9  ;;  %v7710_v42 = vld [vmem:[%s11324_s1 + $0x100] sm:$0xff]   ;;  %v7711_v10 = vld [vmem:[%s11324_s1 + $0x1f0] sm:$0xff]  }
  0xda   : > { %6616 = vmatprep.subr.bf16.mxu1 %v7699_v39  ;;  %v2348_v3 = vrot.slane %v2346_v49, 4  ;;  %v2283_v35 = vrot.slane %v2282_v40, 4  ;;  %v9044_v40 = vld [vmem:[%s11324_s1 + $0x238] sm:$0xff]   ;;  %v2356_v1 = vrot.slane %v8679_v19, 5  ;;  %v7716_v62 = vld [vmem:[%s11324_s1 + $0x1e0] sm:$0xff]  }
  0xdb   : > { %6553 = vmatpush3.bf16.msra.mxu0 %v7698_v60  ;;  %v9009_v60 = vld [vmem:[%s8102_s13 + $0xbc] sm:$0x1]  ;;  %v2307_v6 = vrot.slane %v2306_v50, 4  ;;  %v7717_v28 = vld [vmem:[%s11324_s1 + $0x1a0] sm:$0xff]   ;;  %v7721_v50 = vld [vmem:[%s11324_s1 + $0x190] sm:$0xff]  }
  0xdc   : > { %6554 = vmatprep.subr.bf16.mxu0 %v7700_v41  ;;  %v2350_v5 = vsel %vm8132_vm4, %v2348_v3, %v2349_v47  ;;  %v2288_v41 = vsel %vm8146_vm5, %v2283_v35, %v2287_v44  ;;  %v2360_v3 = vrot.slane %v8682_v20, 5  ;;  %v9077_v35 = vcombine.low %v8872_v46, %v8888_v7 }
  0xdd   : > { %6617 = vmatpush3.bf16.msra.mxu1 %v7703_v57  ;;  %v9047_v36 = vcombine.low %v2278_v16, %v2288_v41  ;;  %v9108_v16 = vcombine.low %v8955_v48, %v8958_v26  ;;  %v5947_v41 = vrot.slane %v8734_v14, 9 }
  0xde   : > { %7323 = vmatmul.mubr.bf16.gmra.mxu0 %v5823_v0  ;;  %6618 = vmatprep.subr.bf16.mxu1 %v7704_v52  ;;  %v9000_v0 = vcombine.low %v2254_v22, %v2264_v21  ;;  %v2309_v22 = vshll.u32 %v9009_v60, 16  ;;  %v9039_v21 = vcombine.low %v8755_v8, %v8758_v11 }
  0xdf   : > { %2638 = vmatmul.mubr.bf16.gmra.mxu1 %v8929_v27  ;;  %6555 = vmatpush3.bf16.msra.mxu0 %v7701_v2  ;;  %v7709_v2 = vld [vmem:[%s11324_s1 + $0x1b8] sm:$0xff]  }
  0xe0   : > { %2645 = vmatprep.mubr.bf16.mxu1 %v8935_v13  ;;  %6556 = vmatprep.subr.bf16.mxu0 %v7702_v24  ;;  %v5945_v24 = vrot.slane %v8647_v51, 9  ;;  %v2311_v57 = vrot.slane %v2309_v22, 5  ;;  %v7722_v22 = vld [vmem:[%s11324_s1 + $0x1c8] sm:$0xff]  }
  0xe1   : > { %2710 = vmatprep.mubr.bf16.mxu0 %v8826_v30  ;;  %v5944_v30 = vrot.slane %v8611_v23, 9  ;;  %v2292_v23 = vrot.slane %v2290_v38, 4  ;;  %6619 = vmatpush3.bf16.msra.mxu1 %v7707_v56  ;;  %v2355_v38 = vrot.slane %v2353_v33, 4  ;;  %v2367_v56 = vrot.slane %v8740_v45, 5 }
  0xe2   : > { %v2354_v51 = vsel %vm8132_vm4, %v5945_v24, %v2353_v33  ;;  %v2312_v52 = vsel %vm8146_vm5, %v2307_v6, %v2311_v57  ;;  %v2370_v45 = vrot.slane %v8748_v58, 5  ;;  %v5948_v24 = vrot.slane %v8755_v8, 9 }
  0xe3   : > { %6557 = vmatpush3.bf16.msra.mxu0 %v7705_v43  ;;  %v2347_v39 = vsel %vm8132_vm4, %v5944_v30, %v2346_v49  ;;  %v2296_v34 = vor.u32 %v2295_v63, %v2292_v23  ;;  %v7708_v49 = vld [vmem:[%s11324_s1 + $0x140] sm:$0xff]   ;;  %v7714_v30 = vld [vmem:[%s11324_s1 + $0x1e8] sm:$0xff]   ;;  %v2357_v19 = vsel %vm8132_vm4, %v2355_v38, %v2356_v1  ;;  %v5946_v23 = vrot.slane %v8671_v37, 9 }
  0xe4   : > { %6670 = vmatprep.subr.bf16.mxu0 %v7706_v61  ;;  %6620 = vmatprep.subr.bf16.mxu1 %v7708_v49  ;;  %v5970_v25 = vcombine.low %v2347_v39, %v2350_v5  ;;  %v7715_v43 = vld [vmem:[%s11324_s1 + $0x1a8] sm:$0xff]   ;;  %v9079_v20 = vcombine.low %v2354_v51, %v2357_v19  ;;  %v2362_v63 = vrot.slane %v2360_v3, 4  ;;  %v7718_v61 = vld [vmem:[%s11324_s1 + $0x1d8] sm:$0xff]   ;;  %v7720_v5 = vld [vmem:[%s11324_s1 + $0x1d0] sm:$0xff]   ;;  %v2368_v14 = vsel %vm8132_vm4, %v5947_v41, %v2367_v56 }
  0xe5   : > { %6621 = vmatpush3.bf16.msra.mxu1 %v7710_v42  ;;  %v2297_v29 = vrot.slane %v2296_v34, 4  ;;  %v2361_v37 = vsel %vm8132_vm4, %v5946_v23, %v2360_v3  ;;  %v7719_v39 = vld [vmem:[%s11324_s1 + $0x198] sm:$0xff]   ;;  %v2369_v34 = vrot.slane %v2367_v56, 4  ;;  %v2374_v49 = vrot.slane %v8758_v11, 5  ;;  %v7724_v42 = vld [vmem:[%s11324_s1 + $0x1c0] sm:$0xff]  }
  0xe6   : > { %2711 = vmatmul.mubr.bf16.vlgmr.msra.gmra.mxu0 %v5969_v12  ;;  %7326 = vmatprep.subr.bf16.mxu1 %v9044_v40  ;;  %v7713_v12 = vld [vmem:[%s11324_s1 + $0x1b0] sm:$0xff]   ;;  %v2377_v1 = vrot.slane %v8862_v4, 5  ;;  %v7725_v11 = vld [vmem:[%s11324_s1 + $0x180] sm:$0xff]   ;;  %v2381_v57 = vrot.slane %v8888_v7, 5 }
  0xe7   : > { %2646 = vmatmul.mubr.bf16.gmra.mxu1 %v8987_v31  ;;  %2718 = vmatprep.mubr.bf16.mxu0 %v8855_v17  ;;  %v2302_v47 = vsel %vm8146_vm5, %v2297_v29, %v2301_v9  ;;  %v2363_v9 = vrot.slane %v8711_v15, 5  ;;  %v2371_v58 = vsel %vm8132_vm4, %v2369_v34, %v2370_v45  ;;  %v2376_v38 = vrot.slane %v2374_v49, 4 }
  0xe8   : > { %2653 = vmatprep.mubr.bf16.mxu1 %v9000_v0  ;;  %6671 = vmatpush3.bf16.msra.mxu0 %v7709_v2  ;;  %v9081_v44 = vcombine.low %v2302_v47, %v2312_v52  ;;  %v7723_v2 = vld [vmem:[%s11324_s1 + $0x188] sm:$0xff]   ;;  %v2375_v8 = vsel %vm8132_vm4, %v5948_v24, %v2374_v49  ;;  %v9165_v23 = vrot.slane %v2381_v57, 4 }
  0xe9   : > { %6672 = vmatprep.subr.bf16.mxu0 %v7711_v10  ;;  %v2364_v15 = vsel %vm8132_vm4, %v2362_v63, %v2363_v9  ;;  %v7570_v10 = vld [vmem:[#allocation3 + $0x78] sm:$0xff]   ;;  %v2378_v4 = vsel %vm8132_vm4, %v2376_v38, %v2377_v1  ;;  %v2384_v63 = vrot.slane %v8952_v18, 5  ;;  %v7904_v9 = vmov 0  }
  0xea   : > { %v9110_v33 = vcombine.low %v2361_v37, %v2364_v15  ;;  %v9159_v52 = vcombine.low %v2375_v8, %v2378_v4  ;;  %529 = vst [vmem:[#allocation2] sm:$0xf] %v7904_v9  ;;  %530 = vst [vmem:[#allocation2 + $0x4] sm:$0xf] %v7904_v9 }
  0xeb   : > { %531 = vst [vmem:[#allocation2 + $0x8] sm:$0xf] %v7904_v9  ;;  %532 = vst [vmem:[#allocation2 + $0xc] sm:$0xf] %v7904_v9  ;;  %v2385_v45 = vsel %vm8132_vm4, %v9165_v23, %v2384_v63 }
  0xec   : > { %6673 = vmatpush3.bf16.msra.mxu0 %v7713_v12  ;;  %v9153_v12 = vld [vmem:[%s11325_s2] ss:$0 sm:$0xff]  ;;  %534 = vst [vmem:[#allocation2 + $0x110] sm:$0xf] %v7904_v9  ;;  %535 = vst [vmem:[#allocation2 + $0x114] sm:$0xf] %v7904_v9 }
  0xed   : > { %6674 = vmatprep.subr.bf16.mxu0 %v7714_v30  ;;  %536 = vst [vmem:[#allocation2 + $0x118] sm:$0xf] %v7904_v9  ;;  %537 = vst [vmem:[#allocation2 + $0x11c] sm:$0xf] %v7904_v9 }
  0xee   : > { %2719 = vmatmul.mubr.bf16.gmra.mxu0 %v5970_v25  ;;  %539 = vst [vmem:[#allocation2 + $0x10] sm:$0xf] %v7904_v9  ;;  %540 = vst [vmem:[#allocation2 + $0x20] sm:$0xf] %v7904_v9 }
  0xef   : > { %2654 = vmatmul.mubr.bf16.gmra.mxu1 %v9039_v21  ;;  %2726 = vmatprep.mubr.bf16.mxu0 %v8929_v27  ;;  %541 = vst [vmem:[#allocation2 + $0x30] sm:$0xf] %v7904_v9  ;;  %542 = vst [vmem:[#allocation2 + $0x40] sm:$0xf] %v7904_v9 }
  0xf0   : > { %2661 = vmatprep.mubr.bf16.mxu1 %v9047_v36  ;;  %6675 = vmatpush3.bf16.msra.mxu0 %v7715_v43  ;;  %543 = vst [vmem:[#allocation2 + $0x50] sm:$0xf] %v7904_v9  ;;  %544 = vst [vmem:[#allocation2 + $0x60] sm:$0xf] %v7904_v9 }
  0xf1   : > { %6676 = vmatprep.subr.bf16.mxu0 %v7716_v62  ;;  %v5949_v62 = vrot.slane %v8872_v46, 9  ;;  %545 = vst [vmem:[#allocation2 + $0x70] sm:$0xf] %v7904_v9  ;;  %546 = vst [vmem:[#allocation2 + $0x80] sm:$0xf] %v7904_v9 }
  0xf2   : > { %547 = vst [vmem:[#allocation2 + $0x90] sm:$0xf] %v7904_v9  ;;  %548 = vst [vmem:[#allocation2 + $0xa0] sm:$0xf] %v7904_v9 }
  0xf3   : > { %549 = vst [vmem:[#allocation2 + $0xb0] sm:$0xf] %v7904_v9  ;;  %550 = vst [vmem:[#allocation2 + $0xc0] sm:$0xf] %v7904_v9  ;;  %v2382_v34 = vsel %vm8132_vm4, %v5949_v62, %v2381_v57 }
  0xf4   : > { %6677 = vmatpush3.bf16.msra.mxu0 %v7717_v28  ;;  %551 = vst [vmem:[#allocation2 + $0xd0] sm:$0xf] %v7904_v9  ;;  %552 = vst [vmem:[#allocation2 + $0xe0] sm:$0xf] %v7904_v9  ;;  %v9199_v38 = vcombine.low %v2382_v34, %v2385_v45  ;;  %v7731_v45 = vld [vmem:[%s11324_s1 + $0x208] sm:$0xff]  }
  0xf5   : > { %6678 = vmatprep.subr.bf16.mxu0 %v7718_v61  ;;  %553 = vst [vmem:[#allocation2 + $0xf0] sm:$0xf] %v7904_v9  ;;  %554 = vst [vmem:[#allocation2 + $0x100] sm:$0xf] %v7904_v9  ;;  %v7727_v61 = vld [vmem:[%s11324_s1 + $0x228] sm:$0xff]  }
  0xf6   : > { %2727 = vmatmul.mubr.bf16.gmra.mxu0 %v9079_v20  ;;  %557 = vst [vmem:[#allocation2 + $0x1c] sm:$0xf] %v7904_v9  ;;  %558 = vst [vmem:[#allocation2 + $0x2c] sm:$0xf] %v7904_v9 }
  0xf7   : > { %2662 = vmatmul.mubr.bf16.gmra.mxu1 %v9077_v35  ;;  %2734 = vmatprep.mubr.bf16.mxu0 %v8987_v31  ;;  %559 = vst [vmem:[#allocation2 + $0x3c] sm:$0xf] %v7904_v9  ;;  %560 = vst [vmem:[#allocation2 + $0x4c] sm:$0xf] %v7904_v9 }
  0xf8   : > { %2669 = vmatprep.mubr.bf16.mxu1 %v9081_v44  ;;  %6679 = vmatpush3.bf16.msra.mxu0 %v7719_v39  ;;  %561 = vst [vmem:[#allocation2 + $0x5c] sm:$0xf] %v7904_v9  ;;  %562 = vst [vmem:[#allocation2 + $0x6c] sm:$0xf] %v7904_v9 }
  0xf9   : > { %6680 = vmatprep.subr.bf16.mxu0 %v7720_v5  ;;  %563 = vst [vmem:[#allocation2 + $0x7c] sm:$0xf] %v7904_v9  ;;  %564 = vst [vmem:[#allocation2 + $0x8c] sm:$0xf] %v7904_v9 }
  0xfa   : > { %565 = vst [vmem:[#allocation2 + $0x9c] sm:$0xf] %v7904_v9  ;;  %566 = vst [vmem:[#allocation2 + $0xac] sm:$0xf] %v7904_v9 }
  0xfb   : > { %567 = vst [vmem:[#allocation2 + $0xbc] sm:$0xf] %v7904_v9  ;;  %568 = vst [vmem:[#allocation2 + $0xcc] sm:$0xf] %v7904_v9 }
  0xfc   : > { %6681 = vmatpush3.bf16.msra.mxu0 %v7721_v50  ;;  %569 = vst [vmem:[#allocation2 + $0xdc] sm:$0xf] %v7904_v9  ;;  %570 = vst [vmem:[#allocation2 + $0xec] sm:$0xf] %v7904_v9  ;;  %v9188_v50 = vld [vmem:[%s8102_s13 + $0xc0] sm:$0xf] }
  0xfd   : > { %6682 = vmatprep.subr.bf16.mxu0 %v7722_v22  ;;  %571 = vst [vmem:[#allocation2 + $0xfc] sm:$0xf] %v7904_v9  ;;  %572 = vst [vmem:[#allocation2 + $0x10c] sm:$0xf] %v7904_v9  ;;  %v9191_v22 = vld [vmem:[%s8102_s13 + $0xc4] sm:$0xf] }
  0xfe   : > { %2735 = vmatmul.mubr.bf16.gmra.mxu0 %v9110_v33  ;;  %538 = vst [vmem:[#allocation2] sm:$0xf] %v7904_v9  ;;  %556 = vst [vmem:[#allocation2 + $0xc] sm:$0xf] %v7904_v9  ;;  %v9203_v1 = vcombine.low %v9188_v50, %v9191_v22 }
  0xff   : > { %2670 = vmatmul.mubr.bf16.gmra.mxu1 %v9108_v16  ;;  %2742 = vmatprep.mubr.bf16.mxu0 %v9039_v21  ;;  %555 = vst [vmem:[#allocation2 + $0x110] sm:$0xf] %v7904_v9  ;;  %573 = vst [vmem:[#allocation2 + $0x11c] sm:$0xf] %v7904_v9  ;;  %v7730_v9 = vld [vmem:[%s11324_s1 + $0x210] sm:$0xff]  }
 0x100   : > { %2807 = vmatprep.mubr.bf16.mxu1 %v5970_v25  ;;  %6683 = vmatpush3.bf16.msra.mxu0 %v7723_v2  ;;  %v9134_v25 = vcombine.low %v2368_v14, %v2371_v58  ;;  %v2388_v14 = vrot.slane %v8958_v26, 5 }
 0x101   : > { %6684 = vmatprep.subr.bf16.mxu0 %v7724_v42  ;;  %v7728_v42 = vld [vmem:[%s11324_s1 + $0x220] sm:$0xff]  }
 0x104   : > { %6685 = vmatpush3.bf16.msra.mxu0 %v7725_v11  ;;  %v5950_v11 = vrot.slane %v8955_v48, 9 }
 0x105   : > { %6750 = vmatprep.subr.bf16.mxu0 %v7570_v10 }
 0x106   : > { %v6222_v29 = vpop.f32.mrf.mxu0  ;;  %2743 = vmatmul.mubr.bf16.gmra.mxu0 %v9134_v25 }
 0x107   : > { %v6286_v6 = vpop.f32.mrf.mxu1  ;;  %2808 = vmatmul.mubr.bf16.vlgmr.msra.gmra.mxu1 %v8801_v55  ;;  %2750 = vmatprep.mubr.bf16.mxu0 %v9077_v35  ;;  %v7726_v55 = vld [vmem:[%s11324_s1 + $0x230] sm:$0xff]  }
 0x108   : > { %7327 = vmatpush3.bf16.msra.mxu1 %v9044_v40  ;;  %v6223_v30 = vpop.f32.mrf.mxu0  ;;  %2815 = vmatprep.mubr.bf16.mxu1 %v9079_v20 }
 0x109   : > { %v6287_v51 = vpop.f32.mrf.mxu1  ;;  %7328 = vmatprep.subr.bf16.mxu1 %v7726_v55  ;;  %v6224_v40 = vadd.f32 %v6223_v30, %v6222_v29  ;;  %v2390_v29 = vrot.slane %v2388_v14, 4 }
 0x10a   : > { %v6288_v19 = vadd.f32 %v6287_v51, %v6286_v6  ;;  %v6225_v3 = vpop.f32.mrf.mxu0  ;;  %v2391_v6 = vrot.slane %v9009_v60, 5  ;;  %v2389_v60 = vsel %vm8132_vm4, %v5950_v11, %v2388_v14  ;;  %v7578_v11 = vld [vmem:[#allocation3 + $0xf8] sm:$0xff]  }
 0x10b   : > { %v6289_v47 = vpop.f32.mrf.mxu1  ;;  %v1543_v43 = vadd.f32 %v6224_v40, %v9153_v12 }
 0x10c   : > { %7329 = vmatpush3.bf16.msra.mxu1 %v7726_v55  ;;  %v6226_v18 = vpop.f32.mrf.mxu0  ;;  %v7729_v55 = vld [vmem:[%s11324_s1 + $0x218] sm:$0xff]  }
 0x10d   : > { %v6290_v28 = vpop.f32.mrf.mxu1  ;;  %7330 = vmatprep.subr.bf16.mxu1 %v7727_v61  ;;  %v9171_v37 = vadd.f32 %v6288_v19, %v1543_v43  ;;  %v6227_v15 = vadd.f32 %v6226_v18, %v6225_v3  ;;  %v2392_v3 = vsel %vm8132_vm4, %v2390_v29, %v2391_v6 }
 0x10e   : > { %v6291_v56 = vadd.f32 %v6290_v28, %v6289_v47  ;;  %v6228_v39 = vpop.f32.mrf.mxu0  ;;  %2751 = vmatmul.mubr.bf16.gmra.mxu0 %v9159_v52 }
 0x10f   : > { %v6292_v5 = vpop.f32.mrf.mxu1  ;;  %2816 = vmatmul.mubr.bf16.gmra.mxu1 %v8837_v32  ;;  %v1546_v41 = vadd.f32 %v6227_v15, %v9153_v12  ;;  %2758 = vmatprep.mubr.bf16.mxu0 %v9108_v16 }
 0x110   : > { %2823 = vmatprep.mubr.bf16.mxu1 %v9110_v33  ;;  %v6229_v58 = vpop.f32.mrf.mxu0  ;;  %7331 = vmatpush3.bf16.msra.mxu1 %v7727_v61  ;;  %v9227_v61 = vcombine.low %v2389_v60, %v2392_v3 }
 0x111   : > { %v6293_v49 = vpop.f32.mrf.mxu1  ;;  %v9194_v2 = vadd.f32 %v6291_v56, %v1546_v41  ;;  %v6230_v7 = vadd.f32 %v6229_v58, %v6228_v39  ;;  %7332 = vmatprep.subr.bf16.mxu1 %v7728_v42 }
 0x112   : > { %v6294_v46 = vadd.f32 %v6293_v49, %v6292_v5  ;;  %v6231_v10 = vpop.f32.mrf.mxu0 }
 0x113   : > { %v6295_v24 = vpop.f32.mrf.mxu1  ;;  %v1551_v26 = vadd.f32 %v6230_v7, %v9153_v12 }
 0x114   : > { %v6232_v8 = vpop.f32.mrf.mxu0  ;;  %7333 = vmatpush3.bf16.msra.mxu1 %v7728_v42 }
 0x115   : > { %v6296_v4 = vpop.f32.mrf.mxu1  ;;  %v9208_v57 = vadd.f32 %v6294_v46, %v1551_v26  ;;  %v6233_v30 = vadd.f32 %v6232_v8, %v6231_v10  ;;  %7334 = vmatprep.subr.bf16.mxu1 %v7729_v55  ;;  %v7732_v26 = vld [vmem:[%s11324_s1 + $0x200] sm:$0xff]  }
 0x116   : > { %v6297_v51 = vadd.f32 %v6296_v4, %v6295_v24  ;;  %v6234_v40 = vpop.f32.mrf.mxu0  ;;  %2759 = vmatmul.mubr.bf16.gmra.mxu0 %v9199_v38 }
 0x117   : > { %v6298_v19 = vpop.f32.mrf.mxu1  ;;  %2824 = vmatmul.mubr.bf16.gmra.mxu1 %v8885_v54  ;;  %v1554_v48 = vadd.f32 %v6233_v30, %v9153_v12  ;;  %2766 = vmatprep.mubr.bf16.mxu0 %v9203_v1 }
 0x118   : > { %2831 = vmatprep.mubr.bf16.mxu1 %v9134_v25  ;;  %v6235_v47 = vpop.f32.mrf.mxu0  ;;  %7335 = vmatpush3.bf16.msra.mxu1 %v7729_v55 }
 0x119   : > { %v6299_v43 = vpop.f32.mrf.mxu1  ;;  %v9222_v62 = vadd.f32 %v6297_v51, %v1554_v48  ;;  %v6236_v23 = vadd.f32 %v6235_v47, %v6234_v40  ;;  %7336 = vmatprep.subr.bf16.mxu1 %v7730_v9  ;;  %v2394_v48 = vshrl.u32 %v9188_v50, 16  ;;  %v2397_v47 = vshll.u32 %v9188_v50, 16 }
 0x11a   : > { %v6300_v63 = vadd.f32 %v6299_v43, %v6298_v19  ;;  %v6237_v18 = vpop.f32.mrf.mxu0  ;;  %v7572_v19 = vld [vmem:[#allocation3 + $0x70] sm:$0xff]   ;;  %v2403_v43 = vshll.u32 %v9191_v22, 16 }
 0x11b   : > { %v6301_v28 = vpop.f32.mrf.mxu1  ;;  %v1559_v15 = vadd.f32 %v6236_v23, %v9153_v12  ;;  %v2407_v23 = vshrl.u32 %v9191_v22, 16 }
 0x11c   : > { %v6238_v56 = vpop.f32.mrf.mxu0  ;;  %7337 = vmatpush3.bf16.msra.mxu1 %v7730_v9 }
 0x11d   : > { %v6302_v39 = vpop.f32.mrf.mxu1  ;;  %v9230_v5 = vadd.f32 %v6300_v63, %v1559_v15  ;;  %v6239_v41 = vadd.f32 %v6238_v56, %v6237_v18  ;;  %7338 = vmatprep.subr.bf16.mxu1 %v7731_v45  ;;  %v7573_v15 = vld [vmem:[#allocation3 + $0x30] sm:$0xff]  }
 0x11e   : > { %v6303_v34 = vadd.f32 %v6302_v39, %v6301_v28  ;;  %v6240_v14 = vpop.f32.mrf.mxu0  ;;  %2767 = vmatmul.mubr.bf16.gmra.mxu0 %v9227_v61  ;;  %v2422_v28 = vrot.slane %v9191_v22, 5 }
 0x11f   : > { %v6304_v58 = vpop.f32.mrf.mxu1  ;;  %2832 = vmatmul.mubr.bf16.gmra.mxu1 %v8935_v13  ;;  %v1562_v49 = vadd.f32 %v6239_v41, %v9153_v12  ;;  %2904 = vmatprep.mubr.bf16.mxu0 %v8837_v32  ;;  %v7571_v32 = vld [vmem:[#allocation3 + $0x38] sm:$0xff]   ;;  %v5939_v41 = vld [vmem:[%s8102_s13 + $0xc8] sm:$0x1] }
 0x120   : > { %2839 = vmatprep.mubr.bf16.mxu1 %v9159_v52  ;;  %v6241_v7 = vpop.f32.mrf.mxu0  ;;  %7339 = vmatpush3.bf16.msra.mxu1 %v7731_v45  ;;  %v2396_v45 = vrot.slane %v2394_v48, 4 }
 0x121   : > { %v6305_v46 = vpop.f32.mrf.mxu1  ;;  %v9240_v42 = vadd.f32 %v6303_v34, %v1562_v49  ;;  %v6242_v10 = vadd.f32 %v6241_v7, %v6240_v14  ;;  %7340 = vmatprep.subr.bf16.mxu1 %v7732_v26  ;;  %v7574_v34 = vld [vmem:[#allocation3 + $0x68] sm:$0xff]   ;;  %v2399_v49 = vrot.slane %v2397_v47, 5  ;;  %v9261_v7 = vrot.slane %v2403_v43, 5 }
 0x122   : > { %v6306_v24 = vadd.f32 %v6305_v46, %v6304_v58  ;;  %v6243_v29 = vpop.f32.mrf.mxu0 }
 0x123   : > { %v6307_v6 = vpop.f32.mrf.mxu1  ;;  %v1567_v8 = vadd.f32 %v6242_v10, %v9153_v12 }
 0x124   : > { %v6244_v4 = vpop.f32.mrf.mxu0  ;;  %7341 = vmatpush3.bf16.msra.mxu1 %v7732_v26  ;;  %v2424_v26 = vrot.slane %v2422_v28, 4 }
 0x125   : > { %v6308_v30 = vpop.f32.mrf.mxu1  ;;  %v9246_v51 = vadd.f32 %v6306_v24, %v1567_v8  ;;  %v6245_v55 = vadd.f32 %v6244_v4, %v6243_v29  ;;  %6814 = vmatprep.subr.bf16.mxu1 %v7578_v11  ;;  %v5951_v24 = vrot.slane %v9188_v50, 9  ;;  %v2425_v11 = vrot.slane %v5939_v41, 5  ;;  %v7575_v29 = vld [vmem:[#allocation3 + $0x28] sm:$0xff]  }
 0x126   : > { %v6309_v40 = vadd.f32 %v6308_v30, %v6307_v6  ;;  %v6246_v60 = vpop.f32.mrf.mxu0  ;;  %2905 = vmatmul.mubr.bf16.vlgmr.msra.gmra.mxu0 %v8855_v17  ;;  %v7576_v30 = vld [vmem:[#allocation3 + $0x60] sm:$0xff]   ;;  %v2400_v50 = vor.u32 %v2399_v49, %v2396_v45 }
 0x127   : > { %v6310_v3 = vpop.f32.mrf.mxu1  ;;  %2840 = vmatmul.mubr.bf16.gmra.mxu1 %v9000_v0  ;;  %v1570_v63 = vadd.f32 %v6245_v55, %v9153_v12  ;;  %2912 = vmatprep.mubr.bf16.mxu0 %v8885_v54  ;;  %v2409_v54 = vrot.slane %v2407_v23, 4  ;;  %v2423_v47 = vsel %vm8132_vm4, %v5951_v24, %v2422_v28  ;;  %v2426_v43 = vsel %vm8132_vm4, %v2424_v26, %v2425_v11 }
 0x128   : > { %2847 = vmatprep.mubr.bf16.mxu1 %v9199_v38  ;;  %v6247_v9 = vpop.f32.mrf.mxu0  ;;  %6751 = vmatpush3.bf16.msra.mxu0 %v7571_v32 }
 0x129   : > { %v6311_v18 = vpop.f32.mrf.mxu1  ;;  %v9258_v56 = vadd.f32 %v6309_v40, %v1570_v63  ;;  %v6248_v17 = vadd.f32 %v6247_v9, %v6246_v60  ;;  %6752 = vmatprep.subr.bf16.mxu0 %v7572_v19  ;;  %v2413_v40 = vshll.u32 %v5939_v41, 16  ;;  %v2410_v48 = vor.u32 %v2409_v54, %v9261_v7 }
 0x12a   : > { %v6312_v39 = vadd.f32 %v6311_v18, %v6310_v3  ;;  %v6249_v14 = vpop.f32.mrf.mxu0  ;;  %v7580_v18 = vld [vmem:[#allocation3 + $0x58] sm:$0xff]   ;;  %v9280_v41 = vcombine.low %v2423_v47, %v2426_v43 }
 0x12b   : > { %11363 = vst [vmem:[#allocation10_spill] sm:$0xff] %v9258_v56  ;;  %v6313_v58 = vpop.f32.mrf.mxu1  ;;  %v1575_v46 = vadd.f32 %v6248_v17, %v9153_v12  ;;  %v2415_v17 = vrot.slane %v2413_v40, 5  ;;  %v2411_v28 = vrot.slane %v2410_v48, 4  ;;  %v7590_v40 = vld [vmem:[#allocation3 + $0x48] sm:$0xff]   ;;  %v3187_v56 = vld [vmem:[#allocation2 + $0x60] sm:$0xf] }
 0x12c   : > { %v6250_v10 = vpop.f32.mrf.mxu0  ;;  %6753 = vmatpush3.bf16.msra.mxu0 %v7573_v15 }
 0x12d   : > { %v6314_v22 = vpop.f32.mrf.mxu1  ;;  %v9265_v6 = vadd.f32 %v6312_v39, %v1575_v46  ;;  %v6251_v8 = vadd.f32 %v6250_v10, %v6249_v14  ;;  %6754 = vmatprep.subr.bf16.mxu0 %v7574_v34  ;;  %v2401_v34 = vrot.slane %v2400_v50, 4  ;;  %v7586_v10 = vld [vmem:[#allocation3 + $0x50] sm:$0xff]  }
 0x12e   : > { %v6315_v4 = vadd.f32 %v6314_v22, %v6313_v58  ;;  %v6252_v32 = vpop.f32.mrf.mxu0  ;;  %2913 = vmatmul.mubr.bf16.gmra.mxu0 %v8929_v27  ;;  %v7577_v27 = vld [vmem:[#allocation3 + $0x20] sm:$0xff]   ;;  %v7581_v58 = vld [vmem:[#allocation3 + $0x18] sm:$0xff]  }
 0x12f   : > { %11364 = vst [vmem:[#allocation11_spill] sm:$0xff] %v9265_v6  ;;  %v6316_v55 = vpop.f32.mrf.mxu1  ;;  %2848 = vmatmul.mubr.bf16.gmra.mxu1 %v9047_v36  ;;  %v1578_v19 = vadd.f32 %v6251_v8, %v9153_v12  ;;  %2920 = vmatprep.mubr.bf16.mxu0 %v8935_v13  ;;  %v2406_v11 = vsel %vm8146_vm5, %v2401_v34, %v9261_v7 }
 0x130   : > { %2855 = vmatprep.mubr.bf16.mxu1 %v9227_v61  ;;  %v6253_v60 = vpop.f32.mrf.mxu0  ;;  %6755 = vmatpush3.bf16.msra.mxu0 %v7575_v29  ;;  %v2416_v29 = vsel %vm8146_vm5, %v2411_v28, %v2415_v17 }
 0x131   : > { %v6317_v3 = vpop.f32.mrf.mxu1  ;;  %v9277_v23 = vadd.f32 %v6315_v4, %v1578_v19  ;;  %v6254_v63 = vadd.f32 %v6253_v60, %v6252_v32  ;;  %6756 = vmatprep.subr.bf16.mxu0 %v7576_v30  ;;  %v7587_v30 = vld [vmem:[#allocation3 + $0x10] sm:$0xff]   ;;  %v9296_v50 = vcombine.low %v2406_v11, %v2416_v29 }
 0x132   : > { %v6318_v9 = vadd.f32 %v6317_v3, %v6316_v55  ;;  %v6255_v13 = vpop.f32.mrf.mxu0  ;;  %v7591_v3 = vld [vmem:[#allocation3 + $0x8] sm:$0xff]  }
 0x133   : > { %11365 = vst [vmem:[#allocation12_spill] sm:$0xff] %v9277_v23  ;;  %v6319_v15 = vpop.f32.mrf.mxu1  ;;  %v1583_v39 = vadd.f32 %v6254_v63, %v9153_v12  ;;  %v9302_v63 = vld [vmem:[%s8102_s13 + $0xcc] sm:$0xf] }
 0x134   : > { %v6256_v45 = vpop.f32.mrf.mxu0  ;;  %6757 = vmatpush3.bf16.msra.mxu0 %v7577_v27  ;;  %v2428_v28 = vshrl.u32 %v9302_v63, 16 }
 0x135   : > { %v6320_v14 = vpop.f32.mrf.mxu1  ;;  %v9282_v49 = vadd.f32 %v6318_v9, %v1583_v39  ;;  %v6257_v54 = vadd.f32 %v6256_v45, %v6255_v13  ;;  %6758 = vmatprep.subr.bf16.mxu0 %v7580_v18  ;;  %v9305_v9 = vld [vmem:[%s8102_s13 + $0xd0] sm:$0xf]  ;;  %v7594_v18 = vld [vmem:[#allocation3 + $0x40] sm:$0xff]   ;;  %v2431_v45 = vshll.u32 %v9302_v63, 16 }
 0x136   : > { %v6321_v46 = vadd.f32 %v6320_v14, %v6319_v15  ;;  %v6258_v22 = vpop.f32.mrf.mxu0  ;;  %2921 = vmatmul.mubr.bf16.gmra.mxu0 %v8987_v31  ;;  %v2437_v14 = vshll.u32 %v9305_v9, 16  ;;  %v2430_v29 = vrot.slane %v2428_v28, 4 }
 0x137   : > { %11366 = vst [vmem:[#allocation13_spill] sm:$0xff] %v9282_v49  ;;  %v6322_v24 = vpop.f32.mrf.mxu1  ;;  %2856 = vmatmul.mubr.bf16.gmra.mxu1 %v9081_v44  ;;  %v1586_v26 = vadd.f32 %v6257_v54, %v9153_v12  ;;  %2928 = vmatprep.mubr.bf16.mxu0 %v9000_v0  ;;  %v7595_v54 = vld [vmem:[#allocation3] sm:$0xff]  }
 0x138   : > { %2863 = vmatprep.mubr.bf16.mxu1 %v9280_v41  ;;  %v6259_v8 = vpop.f32.mrf.mxu0  ;;  %6759 = vmatpush3.bf16.msra.mxu0 %v7581_v58  ;;  %v2441_v58 = vshrl.u32 %v9305_v9, 16 }
 0x139   : > { %v6323_v4 = vpop.f32.mrf.mxu1  ;;  %v9294_v32 = vadd.f32 %v6321_v46, %v1586_v26  ;;  %v6260_v31 = vadd.f32 %v6259_v8, %v6258_v22  ;;  %6760 = vmatprep.subr.bf16.mxu0 %v7586_v10  ;;  %v2433_v8 = vrot.slane %v2431_v45, 5 }
 0x13a   : > { %v6324_v55 = vadd.f32 %v6323_v4, %v6322_v24  ;;  %v6261_v0 = vpop.f32.mrf.mxu0  ;;  %v2439_v4 = vrot.slane %v2437_v14, 5  ;;  %v7585_v14 = vld [vmem:[#allocation3 + $0xa8] sm:$0xff]  }
 0x13b   : > { %11367 = vst [vmem:[#allocation14_spill] sm:$0xff] %v9294_v32  ;;  %v6325_v19 = vpop.f32.mrf.mxu1  ;;  %v1591_v7 = vadd.f32 %v6260_v31, %v9153_v12  ;;  %v7579_v31 = vld [vmem:[#allocation3 + $0xb8] sm:$0xff]  }
 0x13c   : > { %v6262_v48 = vpop.f32.mrf.mxu0  ;;  %6761 = vmatpush3.bf16.msra.mxu0 %v7587_v30  ;;  %v2443_v30 = vrot.slane %v2441_v58, 4  ;;  %v7588_v58 = vld [vmem:[#allocation3 + $0xe0] sm:$0xff]   ;;  %v7625_v32 = vld [vmem:[#allocation3 + $0x158] sm:$0xff]  }
 0x13d   : > { %v6326_v60 = vpop.f32.mrf.mxu1  ;;  %v9299_v47 = vadd.f32 %v6324_v55, %v1591_v7  ;;  %v6263_v43 = vadd.f32 %v6262_v48, %v6261_v0  ;;  %6762 = vmatprep.subr.bf16.mxu0 %v7590_v40  ;;  %v7582_v7 = vld [vmem:[#allocation3 + $0xf0] sm:$0xff]  }
 0x13e   : > { %v6327_v27 = vadd.f32 %v6326_v60, %v6325_v19  ;;  %v6264_v13 = vpop.f32.mrf.mxu0  ;;  %2929 = vmatmul.mubr.bf16.gmra.mxu0 %v9039_v21  ;;  %v9322_v19 = vld [vmem:[%s8102_s13 + $0xd4] sm:$0x1]  ;;  %s7835_s13 = scalar_lea.vmem %s11277_s12, 4096 }
 0x13f   : > { %11368 = vst [vmem:[#allocation15_spill] sm:$0xff] %v9299_v47  ;;  %v6328_v15 = vpop.f32.mrf.mxu1  ;;  %2864 = vmatmul.mubr.bf16.gmra.mxu1 %v9296_v50  ;;  %v1594_v17 = vadd.f32 %v6263_v43, %v9153_v12  ;;  %2936 = vmatprep.mubr.bf16.mxu0 %v9047_v36  ;;  %v7605_v36 = vld [vmem:[#allocation3 + $0x178] sm:$0xff]   ;;  %p7836_p8 = scmp.ne.s32.totalorder %s11277_s12, %s7835_s13  ;;  %p7843_p12 = scmp.lt.s32.totalorder %s7841_s25, %s7835_s13 }
 0x140   : > { %7342 = vmatprep.mubr.bf16.mxu1 %v9079_v20  ;;  %v6265_v39 = vpop.f32.mrf.mxu0  ;;  %6763 = vmatpush3.bf16.msra.mxu0 %v7591_v3 }
 0x141   : > { %v6329_v34 = vpop.f32.mrf.mxu1  ;;  %v9316_v46 = vadd.f32 %v6327_v27, %v1594_v17  ;;  %v6266_v21 = vadd.f32 %v6265_v39, %v6264_v13  ;;  %6764 = vmatprep.subr.bf16.mxu0 %v7594_v18  ;;  %v2434_v18 = vor.u32 %v2433_v8, %v2430_v29  ;;  %v2444_v13 = vor.u32 %v2443_v30, %v2439_v4  ;;  %v7583_v17 = vld [vmem:[#allocation3 + $0xb0] sm:$0xff]   ;;  %p7837_p9 = pnand %p7836_p8, %p7976_p5  ;;  %p7844_p13 = por %p7843_p12, %p7842_p11 }
 0x142   : > { %v6330_v10 = vadd.f32 %v6329_v34, %v6328_v15  ;;  %v6267_v20 = vpop.f32.mrf.mxu0  ;;  %v2447_v15 = vshll.u32 %v9322_v19, 16  ;;  %v2459_v29 = vrot.slane %v9322_v19, 5  ;;  %v5952_v8 = vrot.slane %v9302_v63, 9 }
 0x143   : > { %11369 = vst [vmem:[#allocation16_spill] sm:$0xff] %v9316_v46  ;;  %v6331_v22 = vpop.f32.mrf.mxu1  ;;  %v1599_v24 = vadd.f32 %v6266_v21, %v9153_v12  ;;  %v2435_v34 = vrot.slane %v2434_v18, 4  ;;  %v2445_v28 = vrot.slane %v2444_v13, 4  ;;  %v7593_v18 = vld [vmem:[#allocation3 + $0x98] sm:$0xff]   ;;  %v7596_v13 = vld [vmem:[#allocation3 + $0xd0] sm:$0xff]   ;;  %v7621_v46 = vld [vmem:[#allocation3 + $0x120] sm:$0xff]   ;;  %p7838_p10 = pneg %p7837_p9 }
 0x144   : > { %v6268_v26 = vpop.f32.mrf.mxu0  ;;  %6765 = vmatpush3.bf16.msra.mxu0 %v7595_v54  ;;  %v2449_v45 = vrot.slane %v2447_v15, 5 }
 0x145   : > { %v6332_v11 = vpop.f32.mrf.mxu1  ;;  %v9319_v55 = vadd.f32 %v6330_v10, %v1599_v24  ;;  %v6269_v40 = vadd.f32 %v6268_v26, %v6267_v20  ;;  %6878 = vmatprep.subr.bf16.mxu0 %v7605_v36  ;;  %v2456_v10 = vrot.slane %v9305_v9, 5  ;;  %v9365_v26 = vld [vmem:[#allocation2 + $0x4] sm:$0xf]  ;;  %p7845_p0 = pnand %p7844_p13, %p7838_p10 }
 0x146   : > { %v6333_v0 = vadd.f32 %v6332_v11, %v6331_v22  ;;  %v9324_v48 = vpop.f32.mrf.mxu0  ;;  %2937 = vmatmul.mubr.bf16.gmra.mxu0 %v9077_v35  ;;  %v7584_v35 = vld [vmem:[#allocation3 + $0xe8] sm:$0xff]   ;;  %v2440_v22 = vsel %vm8146_vm5, %v2435_v34, %v2439_v4  ;;  %v2450_v24 = vsel %vm8146_vm5, %v2445_v28, %v2449_v45  ;;  %v11331_v45 = vshll.u32 %v9365_v26, 16 }
 0x147   : > { %11370 = vst [vmem:[#allocation17_spill] sm:$0xff] %v9319_v55  ;;  %v9326_v60 = vpop.f32.mrf.mxu1  ;;  %7343 = vmatmul.mubr.bf16.vlgmr.msra.gmra.mxu1 %v9110_v33  ;;  %v1602_v3 = vadd.f32 %v6269_v40, %v9153_v12  ;;  %2944 = vmatprep.mubr.bf16.mxu0 %v9081_v44  ;;  %v2458_v4 = vrot.slane %v2456_v10, 4  ;;  %v5981_v30 = vcombine.low %v2440_v22, %v2450_v24  ;;  %v11332_v40 = vshrl.u32 %v9365_v26, 16 }
 0x148   : > { %7346 = vmatprep.mubr.bf16.mxu1 %v9134_v25  ;;  %v9333_v43 = vpop.f32.mrf.mxu0  ;;  %6815 = vmatpush3.bf16.msra.mxu1 %v7579_v31  ;;  %v3163_v31 = vld [vmem:[#allocation2] sm:$0xf]  ;;  %v5980_v24 = vcombine.low %v9302_v63, %v9305_v9  ;;  %v11372_v63 = vmov 0  ;;  %v7601_v9 = vld [vmem:[#allocation3 + $0x88] sm:$0xff]  }
 0x149   : > { %v9335_v27 = vpop.f32.mrf.mxu1  ;;  %v9338_v39 = vadd.f32 %v6333_v0, %v1602_v3  ;;  %6816 = vmatprep.subr.bf16.mxu1 %v7582_v7  ;;  %v3207_v34 = vshrl.u32 %v3163_v31, 16  ;;  %v3214_v28 = vrot.slane %v11332_v40, 7  ;;  %v11373_v63 = vsel %vm9419_vm8, 4294967295, %v11372_v63 }
 0x14a   : > { %v9340_v33 = vpop.f32.mrf.mxu0  ;;  %11374 = vst [vmem:[#allocation19_spill] sm:$0xff] %v11373_v63 }
 0x14b   : > { %11371 = vst [vmem:[#allocation18_spill] sm:$0xff] %v9338_v39  ;;  %v9342_v12 = vpop.f32.mrf.mxu1 }
 0x14c   : > { %v9344_v44 = vpop.f32.mrf.mxu0  ;;  %6817 = vmatpush3.bf16.msra.mxu1 %v7583_v17  ;;  %v2457_v17 = vsel %vm8132_vm4, %v5952_v8, %v2456_v10  ;;  %v3219_v8 = vrot.slane %v3214_v28, 4 }
 0x14d   : > { %v9346_v25 = vpop.f32.mrf.mxu1  ;;  %6818 = vmatprep.subr.bf16.mxu1 %v7584_v35  ;;  %v2460_v35 = vsel %vm8132_vm4, %v2458_v4, %v2459_v29  ;;  %v3217_v29 = vor.u32 %v11331_v45, %v3214_v28 }
 0x14e   : > { %v9348_v54 = vpop.f32.mrf.mxu0  ;;  %2945 = vmatmul.mubr.bf16.gmra.mxu0 %v9108_v16  ;;  %v7589_v16 = vld [vmem:[#allocation3 + $0xa0] sm:$0xff]  }
 0x14f   : > { %v9350_v21 = vpop.f32.mrf.mxu1  ;;  %7347 = vmatmul.mubr.bf16.gmra.mxu1 %v9159_v52  ;;  %2952 = vmatprep.mubr.bf16.mxu0 %v9296_v50  ;;  %v9367_v52 = vld [vmem:[#allocation2 + $0x8] sm:$0xf]  ;;  %v7592_v50 = vld [vmem:[#allocation3 + $0xd8] sm:$0xff]  }
 0x150   : > { %7350 = vmatprep.mubr.bf16.mxu1 %v9199_v38  ;;  %v9357_v36 = vpop.f32.mrf.mxu0  ;;  %6819 = vmatpush3.bf16.msra.mxu1 %v7585_v14  ;;  %v11329_v0 = vshrl.u32 %v9367_v52, 16 }
 0x151   : > { %v9359_v20 = vpop.f32.mrf.mxu1  ;;  %6820 = vmatprep.subr.bf16.mxu1 %v7588_v58 }
 0x152   : > { %v9369_v11 = vpop.f32.mrf.mxu0 }
 0x153   : > { %v9371_v38 = vpop.f32.mrf.mxu1 }
 0x154   : > { %v9377_v7 = vpop.f32.mrf.mxu0  ;;  %6821 = vmatpush3.bf16.msra.mxu1 %v7589_v16  ;;  %v5982_v16 = vcombine.low %v2457_v17, %v2460_v35 }
 0x155   : > { %v9379_v3 = vpop.f32.mrf.mxu1  ;;  %6822 = vmatprep.subr.bf16.mxu1 %v7592_v50  ;;  %v5999_v50 = vrot.slane %v3207_v34, 11 }
 0x156   : > { %v9381_v15 = vpop.f32.mrf.mxu0  ;;  %2953 = vmatmul.mubr.bf16.gmra.mxu0 %v9203_v1  ;;  %v3223_v1 = vrot.slane %v11329_v0, 7  ;;  %v7607_v0 = vld [vmem:[#allocation3 + $0x1f8] sm:$0xff]  }
 0x157   : > { %v9383_v19 = vpop.f32.mrf.mxu1  ;;  %7351 = vmatmul.mubr.bf16.gmra.mxu1 %v9227_v61  ;;  %2960 = vmatprep.mubr.bf16.mxu0 %v5981_v30  ;;  %v11330_v61 = vshll.u32 %v9367_v52, 16  ;;  %v6017_v30 = vcombine.low %v9365_v26, %v9367_v52  ;;  %v3218_v34 = vsel %vm9419_vm8, %v5999_v50, %v3217_v29  ;;  %v7610_v29 = vld [vmem:[#allocation3 + $0x170] sm:$0xff]  }
 0x158   : > { %7354 = vmatprep.mubr.bf16.mxu1 %v9280_v41  ;;  %v9398_v14 = vpop.f32.mrf.mxu0  ;;  %6823 = vmatpush3.bf16.msra.mxu1 %v7593_v18  ;;  %v7600_v41 = vld [vmem:[#allocation3 + $0xc8] sm:$0xff]  }
 0x159   : > { %v9400_v58 = vpop.f32.mrf.mxu1  ;;  %6824 = vmatprep.subr.bf16.mxu1 %v7596_v13  ;;  %v3226_v4 = vor.u32 %v11330_v61, %v3223_v1  ;;  %v7602_v13 = vld [vmem:[#allocation3 + $0xc0] sm:$0xff]  }
 0x15a   : > { %v9402_v10 = vpop.f32.mrf.mxu0 }
 0x15b   : > { %v9404_v22 = vpop.f32.mrf.mxu1  ;;  %v3227_v28 = vsel %vm9419_vm8, %v3219_v8, %v3226_v4 }
 0x15c   : > { %v9414_v31 = vpop.f32.mrf.mxu0  ;;  %6825 = vmatpush3.bf16.msra.mxu1 %v7597_v53 }
 0x15d   : > { %v9416_v18 = vpop.f32.mrf.mxu1  ;;  %6826 = vmatprep.subr.bf16.mxu1 %v7600_v41  ;;  %v7603_v41 = vld [vmem:[#allocation3 + $0x80] sm:$0xff]  }
 0x15e   : > { %v9423_v17 = vpop.f32.mrf.mxu0  ;;  %2961 = vmatmul.mubr.bf16.gmra.mxu0 %v5980_v24  ;;  %v6009_v24 = vcombine.low %v3218_v34, %v3227_v28  ;;  %v7615_v34 = vld [vmem:[#allocation3 + $0x168] sm:$0xff]  }
 0x15f   : > { %v9425_v35 = vpop.f32.mrf.mxu1  ;;  %7355 = vmatmul.mubr.bf16.gmra.mxu1 %v5982_v16  ;;  %4176 = vmatprep.mubr.bf16.mxu0 %v6017_v30  ;;  %v7606_v16 = vld [vmem:[#allocation3 + $0x138] sm:$0xff]   ;;  %v7611_v30 = vld [vmem:[#allocation3 + $0x130] sm:$0xff]  }
 0x160   : > { %v9431_v1 = vpop.f32.mrf.mxu0  ;;  %6827 = vmatpush3.bf16.msra.mxu1 %v7601_v9 }
 0x161   : > { %v9433_v53 = vpop.f32.mrf.mxu1  ;;  %6828 = vmatprep.subr.bf16.mxu1 %v7602_v13 }
 0x162   : > { %v9435_v61 = vpop.f32.mrf.mxu0 }
 0x163   : > { %v9437_v45 = vpop.f32.mrf.mxu1 }
 0x164   : > { %11375 = vst [vmem:[#allocation20_spill] sm:$0xff] %v9437_v45  ;;  %v9439_v40 = vpop.f32.mrf.mxu0  ;;  %6829 = vmatpush3.bf16.msra.mxu1 %v7603_v41  ;;  %v7616_v41 = vld [vmem:[#allocation3 + $0x128] sm:$0xff]  }
 0x165   : > { %v9441_v50 = vpop.f32.mrf.mxu1  ;;  %6942 = vmatprep.subr.bf16.mxu1 %v7607_v0 }
 0x166   : > { %11376 = vst [vmem:[#allocation21_spill] sm:$0xff] %v9441_v50  ;;  %v9443_v8 = vpop.f32.mrf.mxu0  ;;  %4177 = vmatmul.mubr.bf16.vlgmr.msra.gmra.mxu0 %v6009_v24  ;;  %v7620_v24 = vld [vmem:[#allocation3 + $0x160] sm:$0xff]  }
 0x167   : > { %v9445_v4 = vpop.f32.mrf.mxu1  ;;  %6879 = vmatpush3.bf16.msra.mxu0 %v7606_v16  ;;  %v3179_v50 = vld [vmem:[#allocation2 + $0x40] sm:$0xf] }
 0x168   : > { %11377 = vst [vmem:[#allocation22_spill] sm:$0xff] %v9445_v4  ;;  %v9447_v9 = vpop.f32.mrf.mxu0  ;;  %6880 = vmatprep.subr.bf16.mxu0 %v7610_v29 }
 0x169   : > { %11378 = vst [vmem:[#allocation23_spill] sm:$0xff] %v9447_v9  ;;  %v9449_v13 = vpop.f32.mrf.mxu1 }
 0x16a   : > { %11379 = vst [vmem:[#allocation24_spill] sm:$0xff] %v9449_v13  ;;  %v9451_v28 = vpop.f32.mrf.mxu0 }
 0x16b   : > { %11380 = vst [vmem:[#allocation25_spill] sm:$0xff] %v9451_v28  ;;  %v9453_v63 = vpop.f32.mrf.mxu1  ;;  %6881 = vmatpush3.bf16.msra.mxu0 %v7611_v30  ;;  %v11388_v30 = vshrl.u32 %v9365_v26, 16 }
 0x16c   : > { %11381 = vst [vmem:[#allocation26_spill] sm:$0xff] %v9453_v63  ;;  %v9455_v0 = vpop.f32.mrf.mxu0  ;;  %6882 = vmatprep.subr.bf16.mxu0 %v7615_v34  ;;  %v11389_v63 = vshll.u32 %v9365_v26, 16  ;;  %v11390_v34 = vshll.u32 %v9367_v52, 16  ;;  %v7630_v26 = vld [vmem:[#allocation3 + $0x150] sm:$0xff]  }
 0x16d   : > { %11382 = vst [vmem:[#allocation27_spill] sm:$0xff] %v9455_v0  ;;  %v9457_v39 = vpop.f32.mrf.mxu1  ;;  %v3382_v49 = vrot.slane %v11388_v30, 4 }
 0x16e   : > { %11383 = vst [vmem:[#allocation28_spill] sm:$0xff] %v9457_v39  ;;  %v9459_v16 = vpop.f32.mrf.mxu0  ;;  %v3383_v39 = vrot.slane %v11389_v63, 5  ;;  %v9473_v23 = vrot.slane %v11390_v34, 5 }
 0x16f   : > { %11384 = vst [vmem:[#allocation29_spill] sm:$0xff] %v9459_v16  ;;  %v9461_v55 = vpop.f32.mrf.mxu1  ;;  %6883 = vmatpush3.bf16.msra.mxu0 %v7616_v41 }
 0x170   : > { %11385 = vst [vmem:[#allocation30_spill] sm:$0xff] %v9461_v55  ;;  %v9463_v29 = vpop.f32.mrf.mxu0  ;;  %6884 = vmatprep.subr.bf16.mxu0 %v7620_v24  ;;  %v11391_v55 = vshrl.u32 %v9367_v52, 16  ;;  %v7626_v24 = vld [vmem:[#allocation3 + $0x118] sm:$0xff]   ;;  %v3384_v63 = vor.u32 %v3383_v39, %v3382_v49  ;;  %v3167_v52 = vld [vmem:[#allocation2 + $0x10] sm:$0xf] }
 0x171   : > { %11386 = vst [vmem:[#allocation31_spill] sm:$0xff] %v9463_v29  ;;  %v9465_v47 = vpop.f32.mrf.mxu1  ;;  %v3170_v39 = vld [vmem:[#allocation2 + $0x1c] sm:$0xf] }
 0x172   : > { %11387 = vst [vmem:[#allocation32_spill] sm:$0xff] %v9465_v47  ;;  %v3388_v41 = vrot.slane %v11391_v55, 4  ;;  %v9477_v13 = vpop.f32.mrf.mxu0  ;;  %v3166_v47 = vld [vmem:[#allocation2 + $0xc] sm:$0xf] }
 0x173   : > { %11392 = vst [vmem:[#allocation33_spill] sm:$0xff] %v9477_v13  ;;  %v9479_v4 = vpop.f32.mrf.mxu1  ;;  %6885 = vmatpush3.bf16.msra.mxu0 %v7621_v46  ;;  %v3392_v29 = vshll.u32 %v3166_v47, 16 }
 0x174   : > { %11393 = vst [vmem:[#allocation34_spill] sm:$0xff] %v9479_v4  ;;  %v9481_v6 = vpop.f32.mrf.mxu0  ;;  %6886 = vmatprep.subr.bf16.mxu0 %v7625_v32  ;;  %v3389_v34 = vor.u32 %v3388_v41, %v9473_v23  ;;  %v7631_v4 = vld [vmem:[#allocation3 + $0x110] sm:$0xff]   ;;  %v3385_v32 = vrot.slane %v3384_v63, 4  ;;  %v3178_v63 = vld [vmem:[#allocation2 + $0x3c] sm:$0xf] }
 0x175   : > { %11394 = vst [vmem:[#allocation35_spill] sm:$0xff] %v9481_v6  ;;  %v9483_v30 = vpop.f32.mrf.mxu1  ;;  %v3171_v6 = vld [vmem:[#allocation2 + $0x20] sm:$0xf]  ;;  %v3394_v49 = vrot.slane %v3392_v29, 5 }
 0x176   : > { %11395 = vst [vmem:[#allocation36_spill] sm:$0xff] %v9483_v30  ;;  %v9486_v16 = vpop.f32.mrf.mxu0  ;;  %v7632_v30 = vld [vmem:[#allocation3 + $0x148] sm:$0xff]   ;;  %v3390_v0 = vrot.slane %v3389_v34, 4  ;;  %v3251_v28 = vshrl.u32 %v3171_v6, 16  ;;  %v3183_v34 = vld [vmem:[#allocation2 + $0x50] sm:$0xf]  ;;  %v3387_v6 = vsel %vm8146_vm5, %v3385_v32, %v9473_v23 }
 0x177   : > { %11396 = vst [vmem:[#allocation37_spill] sm:$0xff] %v9486_v16  ;;  %v9488_v55 = vpop.f32.mrf.mxu1  ;;  %6887 = vmatpush3.bf16.msra.mxu0 %v7626_v24  ;;  %v3229_v16 = vshrl.u32 %v3167_v52, 16  ;;  %v3174_v24 = vld [vmem:[#allocation2 + $0x2c] sm:$0xf]  ;;  %v7636_v29 = vld [vmem:[#allocation3 + $0x140] sm:$0xff]   ;;  %v3434_v23 = vshll.u32 %v3178_v63, 16 }
 0x178   : > { %11397 = vst [vmem:[#allocation38_spill] sm:$0xff] %v9488_v55  ;;  %v9490_v13 = vpop.f32.mrf.mxu0  ;;  %6888 = vmatprep.subr.bf16.mxu0 %v7630_v26  ;;  %v3175_v55 = vld [vmem:[#allocation2 + $0x30] sm:$0xf]  ;;  %v3406_v26 = vshll.u32 %v3170_v39, 16  ;;  %v6355_v39 = vadd.f32 %v9344_v44, %v9340_v33  ;;  %v3317_v32 = vshrl.u32 %v3183_v34, 16  ;;  %v3339_v34 = vshrl.u32 %v3187_v56, 16 }
 0x179   : > { %11398 = vst [vmem:[#allocation39_spill] sm:$0xff] %v9490_v13  ;;  %v9492_v46 = vpop.f32.mrf.mxu1  ;;  %v7634_v13 = vld [vmem:[#allocation3 + $0x108] sm:$0xff]   ;;  %v3273_v52 = vshrl.u32 %v3175_v55, 16  ;;  %v9517_v9 = vrot.slane %v3229_v16, 11  ;;  %v9527_v55 = vrot.slane %v3251_v28, 11  ;;  %v7642_v16 = vld [vmem:[#allocation3 + $0x238] sm:$0xff]  }
 0x17a   : > { %11399 = vst [vmem:[#allocation40_spill] sm:$0xff] %v9492_v46  ;;  %v9494_v41 = vpop.f32.mrf.mxu0 }
 0x17b   : > { %11400 = vst [vmem:[#allocation41_spill] sm:$0xff] %v9494_v41  ;;  %v9496_v47 = vpop.f32.mrf.mxu1  ;;  %6889 = vmatpush3.bf16.msra.mxu0 %v7631_v4  ;;  %v6358_v41 = vadd.f32 %v9357_v36, %v9348_v54  ;;  %v3395_v4 = vsel %vm8146_vm5, %v3390_v0, %v3394_v49  ;;  %v3295_v54 = vshrl.u32 %v3179_v50, 16  ;;  %v3182_v36 = vld [vmem:[#allocation2 + $0x4c] sm:$0xf]  ;;  %v7637_v0 = vld [vmem:[#allocation3 + $0x100] sm:$0xff]   ;;  %v9529_v50 = vrot.slane %v3406_v26, 5 }
 0x17c   : > { %11401 = vst [vmem:[#allocation42_spill] sm:$0xff] %v9496_v47  ;;  %v9498_v45 = vpop.f32.mrf.mxu0  ;;  %6890 = vmatprep.subr.bf16.mxu0 %v7632_v30  ;;  %v6352_v47 = vadd.f32 %v9333_v43, %v9324_v48  ;;  %v6361_v48 = vadd.f32 %v9377_v7, %v9369_v11  ;;  %v9525_v44 = vcombine.low %v3387_v6, %v3395_v4  ;;  %v3186_v49 = vld [vmem:[#allocation2 + $0x5c] sm:$0xf]  ;;  %v3448_v63 = vshll.u32 %v3182_v36, 16 }
 0x17d   : > { %11402 = vst [vmem:[#allocation43_spill] sm:$0xff] %v9498_v45  ;;  %v9500_v46 = vpop.f32.mrf.mxu1  ;;  %v3420_v45 = vshll.u32 %v3174_v24, 16  ;;  %v1745_v24 = vadd.f32 %v6358_v41, %v9208_v57  ;;  %v1740_v7 = vadd.f32 %v6355_v39, %v9194_v2  ;;  %v9542_v26 = vrot.slane %v3295_v54, 11 }
 0x17e   : > { %11403 = vst [vmem:[#allocation44_spill] sm:$0xff] %v9500_v46  ;;  %v9513_v46 = vpop.f32.mrf.mxu0  ;;  %v1737_v11 = vadd.f32 %v6352_v47, %v9171_v37  ;;  %v9546_v57 = vrot.slane %v3434_v23, 5  ;;  %v9548_v41 = vrot.slane %v3317_v32, 11  ;;  %v3462_v56 = vshll.u32 %v3186_v49, 16 }
 0x17f   : > { %v9515_v30 = vpop.f32.mrf.mxu1  ;;  %6891 = vmatpush3.bf16.msra.mxu0 %v7634_v13  ;;  %v9532_v13 = vrot.slane %v3273_v52, 11  ;;  %v9540_v28 = vrot.slane %v3420_v45, 5  ;;  %v6416_v37 = vadd.f32 %v9335_v27, %v9326_v60  ;;  %v6419_v2 = vadd.f32 %v9346_v25, %v9342_v12  ;;  %v9569_v12 = vld [vmem:[#allocation2 + $0x6c] sm:$0xf] }
 0x180   : > { %v9521_v43 = vpop.f32.mrf.mxu0  ;;  %6892 = vmatprep.subr.bf16.mxu0 %v7636_v29  ;;  %v6422_v29 = vadd.f32 %v9359_v20, %v9350_v21  ;;  %v1748_v45 = vadd.f32 %v6361_v48, %v9222_v62  ;;  %v6364_v47 = vadd.f32 %v9398_v14, %v9381_v15  ;;  %v9561_v20 = vld [vmem:[#allocation2 + $0x70] sm:$0xf]  ;;  %v6370_v52 = vadd.f32 %v9431_v1, %v9423_v17 }
 0x181   : > { %v9523_v33 = vpop.f32.mrf.mxu1  ;;  %v9565_v60 = vrot.slane %v3448_v63, 5  ;;  %v9567_v27 = vrot.slane %v3339_v34, 11  ;;  %v6425_v62 = vadd.f32 %v9379_v3, %v9371_v38  ;;  %v6367_v25 = vadd.f32 %v9414_v31, %v9402_v10 }
 0x182   : > { %v9536_v59 = vpop.f32.mrf.mxu0  ;;  %v1842_v39 = vadd.f32 %v6422_v29, %v1745_v24  ;;  %v1834_v54 = vadd.f32 %v6416_v37, %v1737_v11  ;;  %v1837_v36 = vadd.f32 %v6419_v2, %v1740_v7  ;;  %v6373_v17 = vadd.f32 %v9439_v40, %v9435_v61  ;;  %v11405_v7 = vld [vmem:[#allocation10_spill] sm:$0xff]  ;;  %v11406_v2 = vld [vmem:[#allocation20_spill] sm:$0xff] }
 0x183   : > { %v9538_v6 = vpop.f32.mrf.mxu1  ;;  %6893 = vmatpush3.bf16.msra.mxu0 %v7637_v0  ;;  %v9577_v23 = vrot.slane %v3462_v56, 5  ;;  %v1753_v0 = vadd.f32 %v6364_v47, %v9230_v5  ;;  %v6428_v38 = vadd.f32 %v9400_v58, %v9383_v19  ;;  %v1845_v10 = vadd.f32 %v6425_v62, %v1748_v45  ;;  %v11404_v19 = vld [vmem:[#allocation23_spill] sm:$0xff]  ;;  %v11407_v45 = vld [vmem:[#allocation21_spill] sm:$0xff] }
 0x184   : > { %v9557_v4 = vpop.f32.mrf.mxu0  ;;  %7358 = vmatprep.subr.bf16.mxu0 %v7642_v16  ;;  %v1761_v49 = vadd.f32 %v6370_v52, %v9246_v51  ;;  %v1756_v61 = vadd.f32 %v6367_v25, %v9240_v42  ;;  %v6431_v63 = vadd.f32 %v9416_v18, %v9404_v22  ;;  %v6434_v5 = vadd.f32 %v9433_v53, %v9425_v35  ;;  %v11408_v47 = vld [vmem:[#allocation25_spill] sm:$0xff]  ;;  %v11409_v52 = vld [vmem:[#allocation27_spill] sm:$0xff] }
 0x185   : > { %v9559_v21 = vpop.f32.mrf.mxu1  ;;  %v6376_v58 = vadd.f32 %v11404_v19, %v9443_v8  ;;  %v1764_v51 = vadd.f32 %v6373_v17, %v11405_v7  ;;  %v6437_v42 = vadd.f32 %v11407_v45, %v11406_v2  ;;  %v6379_v22 = vadd.f32 %v11409_v52, %v11408_v47  ;;  %v11410_v18 = vld [vmem:[#allocation29_spill] sm:$0xff]  ;;  %v11412_v17 = vld [vmem:[#allocation11_spill] sm:$0xff] }
 0x186   : > { %v7312_v15 = vpop.f32.mrf.mxu0  ;;  %v1850_v8 = vadd.f32 %v6428_v38, %v1753_v0  ;;  %v1853_v2 = vadd.f32 %v6431_v63, %v1756_v61  ;;  %v11421_v52 = vld [vmem:[#allocation37_spill] sm:$0xff] }
 0x187   : > { %v6494_v14 = vpop.f32.mrf.mxu1  ;;  %v1939_v1 = vadd.f32 %v7312_v15, %v1842_v39  ;;  %v11411_v39 = vld [vmem:[#allocation31_spill] sm:$0xff]  ;;  %v1861_v38 = vadd.f32 %v6437_v42, %v1764_v51  ;;  %v11424_v51 = vld [vmem:[#allocation32_spill] sm:$0xff] }
 0x188   : > { %v1930_v3 = vpop.f32.mrf.mxu0  ;;  %v6382_v35 = vadd.f32 %v11411_v39, %v11410_v18  ;;  %v11422_v18 = vld [vmem:[#allocation39_spill] sm:$0xff] }
 0x189   : > { %v6495_v48 = vpop.f32.mrf.mxu1  ;;  %v1995_v16 = vmax.f32 %v1939_v1, 0.0  ;;  %v1931_v24 = vadd.f32 %v1930_v3, %v1834_v54  ;;  %v1858_v54 = vadd.f32 %v6434_v5, %v1761_v49  ;;  %v1769_v1 = vadd.f32 %v6376_v58, %v11412_v17  ;;  %v11413_v3 = vld [vmem:[#allocation22_spill] sm:$0xff]  ;;  %v11419_v49 = vld [vmem:[#allocation28_spill] sm:$0xff]  ;;  %v11420_v58 = vld [vmem:[#allocation13_spill] sm:$0xff] }
 0x18a   : > { %v9585_v40 = vadd.f32 %v6495_v48, %v6494_v14  ;;  %v7313_v34 = vpop.f32.mrf.mxu0  ;;  %v11414_v48 = vld [vmem:[#allocation24_spill] sm:$0xff]  ;;  %v6388_v39 = vadd.f32 %v11422_v18, %v11421_v52 }
 0x18b   : > { %v9594_v11 = vpop.f32.mrf.mxu1  ;;  %v6175_v29 = vpack.c.bf16 %v1995_v16, %v1995_v16  ;;  %v1993_v56 = vmax.f32 %v1931_v24, 0.0  ;;  %v1942_v37 = vadd.f32 %v7313_v34, %v1845_v10  ;;  %v6440_v10 = vadd.f32 %v11414_v48, %v11413_v3  ;;  %v11415_v16 = vld [vmem:[#allocation33_spill] sm:$0xff]  ;;  %v11416_v24 = vld [vmem:[#allocation35_spill] sm:$0xff] }
 0x18c   : > { %v1933_v53 = vpop.f32.mrf.mxu0  ;;  %v6385_v19 = vadd.f32 %v11416_v24, %v11415_v16  ;;  %v11427_v48 = vld [vmem:[#allocation43_spill] sm:$0xff] }
 0x18d   : > { %v9603_v62 = vpop.f32.mrf.mxu1  ;;  %2076 = vst [vmem:[#allocation2 + $0x24] sm:$0xf] %v6175_v29  ;;  %v6173_v25 = vpack.c.bf16 %v1993_v56, %v1993_v56  ;;  %v1996_v15 = vmax.f32 %v1942_v37, 0.0  ;;  %v1934_v14 = vadd.f32 %v1933_v53, %v1837_v36  ;;  %v11417_v29 = vld [vmem:[#allocation12_spill] sm:$0xff]  ;;  %v11418_v36 = vld [vmem:[#allocation26_spill] sm:$0xff]  ;;  %v1777_v37 = vadd.f32 %v6382_v35, %v11420_v58 }
 0x18e   : > { %v7316_v34 = vpop.f32.mrf.mxu0  ;;  %v1772_v56 = vadd.f32 %v6379_v22, %v11417_v29  ;;  %v6443_v5 = vadd.f32 %v11419_v49, %v11418_v36  ;;  %v11425_v22 = vld [vmem:[#allocation14_spill] sm:$0xff]  ;;  %v11429_v29 = vld [vmem:[#allocation36_spill] sm:$0xff]  ;;  %v11430_v49 = vld [vmem:[#allocation15_spill] sm:$0xff] }
 0x18f   : > { %v6500_v7 = vpop.f32.mrf.mxu1  ;;  %2074 = vst [vmem:[#allocation2 + $0x14] sm:$0xf] %v6173_v25  ;;  %v6176_v45 = vpack.c.bf16 %v1996_v15, %v1996_v15  ;;  %v1994_v47 = vmax.f32 %v1934_v14, 0.0  ;;  %v1955_v0 = vadd.f32 %v7316_v34, %v1858_v54  ;;  %v11423_v15 = vld [vmem:[#allocation30_spill] sm:$0xff]  ;;  %v1780_v14 = vadd.f32 %v6385_v19, %v11425_v22  ;;  %v11426_v54 = vld [vmem:[#allocation41_spill] sm:$0xff] }
 0x190   : > { %v1946_v53 = vpop.f32.mrf.mxu0  ;;  %v6446_v42 = vadd.f32 %v11424_v51, %v11423_v15  ;;  %v6391_v16 = vadd.f32 %v11427_v48, %v11426_v54  ;;  %v1866_v34 = vadd.f32 %v6440_v10, %v1769_v1  ;;  %v1785_v58 = vadd.f32 %v6388_v39, %v11430_v49  ;;  %v11434_v15 = vld [vmem:[#allocation42_spill] sm:$0xff]  ;;  %v11435_v51 = vld [vmem:[#allocation44_spill] sm:$0xff]  ;;  %v11436_v48 = vld [vmem:[#allocation17_spill] sm:$0xff] }
 0x191   : > { %v6501_v17 = vpop.f32.mrf.mxu1  ;;  %2077 = vst [vmem:[#allocation2 + $0x28] sm:$0xf] %v6176_v45  ;;  %v6174_v3 = vpack.c.bf16 %v1994_v47, %v1994_v47  ;;  %v1999_v61 = vmax.f32 %v1955_v0, 0.0  ;;  %v1947_v63 = vadd.f32 %v1946_v53, %v1850_v8  ;;  %v6394_v45 = vadd.f32 %v9521_v43, %v9513_v46  ;;  %v11428_v0 = vld [vmem:[#allocation34_spill] sm:$0xff] }
 0x192   : > { %v9616_v25 = vadd.f32 %v6501_v17, %v6500_v7  ;;  %v7317_v35 = vpop.f32.mrf.mxu0  ;;  %v6449_v36 = vadd.f32 %v11429_v29, %v11428_v0  ;;  %v6397_v19 = vadd.f32 %v9557_v4, %v9536_v59  ;;  %v1869_v53 = vadd.f32 %v6443_v5, %v1772_v56  ;;  %v11431_v17 = vld [vmem:[#allocation38_spill] sm:$0xff] }
 0x193   : > { %v9623_v24 = vpop.f32.mrf.mxu1  ;;  %2075 = vst [vmem:[#allocation2 + $0x18] sm:$0xf] %v6174_v3  ;;  %v6179_v47 = vpack.c.bf16 %v1999_v61, %v1999_v61  ;;  %v1997_v8 = vmax.f32 %v1947_v63, 0.0  ;;  %v1958_v7 = vadd.f32 %v7317_v35, %v1861_v38  ;;  %v1874_v43 = vadd.f32 %v6446_v42, %v1777_v37  ;;  %v11432_v3 = vld [vmem:[#allocation40_spill] sm:$0xff]  ;;  %v11437_v42 = vld [vmem:[#allocation18_spill] sm:$0xff] }
 0x194   : > { %v1949_v52 = vpop.f32.mrf.mxu0  ;;  %v6452_v38 = vadd.f32 %v11432_v3, %v11431_v17  ;;  %v11433_v61 = vld [vmem:[#allocation16_spill] sm:$0xff]  ;;  %v6455_v39 = vadd.f32 %v11435_v51, %v11434_v15  ;;  %v1877_v59 = vadd.f32 %v6449_v36, %v1780_v14  ;;  %v1793_v35 = vadd.f32 %v6394_v45, %v11436_v48 }
 0x195   : > { %v9632_v18 = vpop.f32.mrf.mxu1  ;;  %2080 = vst [vmem:[#allocation2 + $0x44] sm:$0xf] %v6179_v47  ;;  %v6177_v1 = vpack.c.bf16 %v1997_v8, %v1997_v8  ;;  %v2000_v10 = vmax.f32 %v1958_v7, 0.0  ;;  %v1950_v46 = vadd.f32 %v1949_v52, %v1853_v2  ;;  %v1788_v63 = vadd.f32 %v6391_v16, %v11433_v61  ;;  %v9640_v2 = vld [vmem:[#allocation2 + $0x24] sm:$0xf] }
 0x196   : > { %v7320_v22 = vpop.f32.mrf.mxu0  ;;  %v3168_v4 = vld [vmem:[#allocation2 + $0x14] sm:$0xf]  ;;  %v6458_v37 = vadd.f32 %v9523_v33, %v9515_v30  ;;  %v1796_v16 = vadd.f32 %v6397_v19, %v11437_v42  ;;  %v1882_v29 = vadd.f32 %v6452_v38, %v1785_v58  ;;  %v6461_v52 = vadd.f32 %v9559_v21, %v9538_v6 }
 0x197   : > { %v6506_v54 = vpop.f32.mrf.mxu1  ;;  %2078 = vst [vmem:[#allocation2 + $0x34] sm:$0xf] %v6177_v1  ;;  %v6180_v56 = vpack.c.bf16 %v2000_v10, %v2000_v10  ;;  %v1998_v5 = vmax.f32 %v1950_v46, 0.0  ;;  %v1971_v47 = vadd.f32 %v7320_v22, %v1874_v43  ;;  %v3234_v0 = vshrl.u32 %v3168_v4, 16 }
 0x198   : > { %v1962_v8 = vpop.f32.mrf.mxu0  ;;  %v9651_v33 = vadd.f32 %v6455_v39, %v1788_v63  ;;  %v3256_v19 = vshrl.u32 %v9640_v2, 16  ;;  %v1890_v3 = vadd.f32 %v6458_v37, %v1793_v35  ;;  %v3237_v61 = vshll.u32 %v3168_v4, 16  ;;  %v9665_v51 = vld [vmem:[#allocation2 + $0x28] sm:$0xf] }
 0x199   : > { %v6507_v7 = vpop.f32.mrf.mxu1  ;;  %2081 = vst [vmem:[#allocation2 + $0x48] sm:$0xf] %v6180_v56  ;;  %v6178_v14 = vpack.c.bf16 %v1998_v5, %v1998_v5  ;;  %v2003_v36 = vmax.f32 %v1971_v47, 0.0  ;;  %v1963_v49 = vadd.f32 %v1962_v8, %v1866_v34  ;;  %v3236_v30 = vrot.slane %v3234_v0, 7  ;;  %v9657_v34 = vld [vmem:[%s11325_s2] ss:$0 sm:$0xff] }
 0x19a   : > { %v9645_v45 = vadd.f32 %v6507_v7, %v6506_v54  ;;  %v7321_v1 = vpop.f32.mrf.mxu0  ;;  %v3169_v46 = vld [vmem:[#allocation2 + $0x18] sm:$0xf]  ;;  %v9661_v6 = vadd.f32 %v9657_v34, %v9585_v40  ;;  %v1893_v15 = vadd.f32 %v6461_v52, %v1796_v16  ;;  %v9667_v56 = vrot.slane %v3234_v0, 4 }
 0x19b   : > { %v9649_v10 = vpop.f32.mrf.mxu1  ;;  %2079 = vst [vmem:[#allocation2 + $0x38] sm:$0xf] %v6178_v14  ;;  %v6183_v58 = vpack.c.bf16 %v2003_v36, %v2003_v36  ;;  %v2001_v43 = vmax.f32 %v1963_v49, 0.0  ;;  %v1974_v17 = vadd.f32 %v7321_v1, %v1877_v59  ;;  %v3243_v63 = vshrl.u32 %v3169_v46, 16 }
 0x19c   : > { %v1965_v21 = vpop.f32.mrf.mxu0  ;;  %v3246_v59 = vshll.u32 %v3169_v46, 16  ;;  %v3239_v48 = vor.u32 %v3237_v61, %v3236_v30  ;;  %v9669_v47 = vrot.slane %v3256_v19, 7  ;;  %v9671_v8 = vcombine.low %v3168_v4, %v3169_v46 }
 0x19d   : > { %v9663_v38 = vpop.f32.mrf.mxu1  ;;  %2084 = vst [vmem:[#allocation2 + $0x64] sm:$0xf] %v6183_v58  ;;  %v6181_v39 = vpack.c.bf16 %v2001_v43, %v2001_v43  ;;  %v2004_v22 = vmax.f32 %v1974_v17, 0.0  ;;  %v1966_v54 = vadd.f32 %v1965_v21, %v1869_v53  ;;  %v3245_v35 = vrot.slane %v3243_v63, 7  ;;  %v7739_v21 = vld [vmem:[#allocation3 + $0x68] sm:$0xff]  }
 0x19e   : > { %v7324_v5 = vpop.f32.mrf.mxu0  ;;  %v3265_v16 = vshrl.u32 %v9665_v51, 16  ;;  %v3241_v7 = vrot.slane %v3236_v30, 4  ;;  %v9674_v36 = vrot.slane %v3237_v61, 5  ;;  %v9676_v1 = vrot.slane %v3246_v59, 5  ;;  %4184 = vmatprep.mubr.bf16.mxu0 %v9671_v8 }
 0x19f   : > { %v6512_v40 = vpop.f32.mrf.mxu1  ;;  %2082 = vst [vmem:[#allocation2 + $0x54] sm:$0xf] %v6181_v39  ;;  %v6184_v37 = vpack.c.bf16 %v2004_v22, %v2004_v22  ;;  %v2002_v42 = vmax.f32 %v1966_v54, 0.0  ;;  %v3248_v14 = vor.u32 %v3246_v59, %v3245_v35  ;;  %v1987_v53 = vadd.f32 %v7324_v5, %v1890_v3 }
 0x1a0   : > { %v1978_v49 = vpop.f32.mrf.mxu0  ;;  %v9681_v4 = vrot.slane %v3243_v63, 4  ;;  %v3240_v3 = vsel %vm9419_vm8, %v9517_v9, %v3239_v48  ;;  %v7609_v63 = vld [vmem:[#allocation3 + $0x1b8] sm:$0xff]   ;;  %v6499_v59 = vadd.f32 %v9603_v62, %v9594_v11  ;;  %v3259_v9 = vshll.u32 %v9640_v2, 16 }
 0x1a1   : > { %v6513_v52 = vpop.f32.mrf.mxu1  ;;  %2085 = vst [vmem:[#allocation2 + $0x68] sm:$0xf] %v6184_v37  ;;  %v6182_v0 = vpack.c.bf16 %v2002_v42, %v2002_v42  ;;  %v1979_v58 = vadd.f32 %v1978_v49, %v1882_v29  ;;  %v2007_v46 = vmax.f32 %v1987_v53, 0.0  ;;  %v3249_v61 = vsel %vm9419_vm8, %v3241_v7, %v3248_v14  ;;  %v7612_v37 = vld [vmem:[#allocation3 + $0x1f0] sm:$0xff]  }
 0x1a2   : > { %v9679_v43 = vadd.f32 %v6513_v52, %v6512_v40  ;;  %v7325_v17 = vpop.f32.mrf.mxu0  ;;  %v6010_v54 = vcombine.low %v3240_v3, %v3249_v61  ;;  %v3267_v29 = vrot.slane %v3265_v16, 7  ;;  %v9697_v48 = vrot.slane %v3256_v19, 4  ;;  %v9701_v53 = vld [vmem:[#allocation2 + $0x34] sm:$0xf]  ;;  %v9703_v11 = vld [vmem:[#allocation2 + $0x38] sm:$0xf] }
 0x1a3   : > { %v9683_v30 = vpop.f32.mrf.mxu1  ;;  %2083 = vst [vmem:[#allocation2 + $0x58] sm:$0xf] %v6182_v0  ;;  %v2005_v39 = vmax.f32 %v1979_v58, 0.0  ;;  %v1990_v22 = vadd.f32 %v7325_v17, %v1893_v15  ;;  %v6187_v35 = vpack.c.bf16 %v2007_v46, %v2007_v46  ;;  %v3268_v14 = vshll.u32 %v9665_v51, 16 }
 0x1a4   : > { %v1981_v5 = vpop.f32.mrf.mxu0  ;;  %4185 = vmatmul.mubr.bf16.gmra.mxu0 %v6010_v54  ;;  %4273 = vmatprep.mubr.bf16.mxu1 %v6010_v54  ;;  %v3398_v62 = vor.u32 %v9674_v36, %v9667_v56  ;;  %v3403_v19 = vor.u32 %v9681_v4, %v9676_v1  ;;  %v9711_v49 = vcombine.low %v9640_v2, %v9665_v51  ;;  %v3263_v17 = vrot.slane %v9669_v47, 4  ;;  %v7614_v36 = vld [vmem:[#allocation3 + $0x1b0] sm:$0xff]   ;;  %v7619_v51 = vld [vmem:[#allocation3 + $0x1a8] sm:$0xff]  }
 0x1a5   : > { %v9694_v40 = vpop.f32.mrf.mxu1  ;;  %v6185_v42 = vpack.c.bf16 %v2005_v39, %v2005_v39  ;;  %v2008_v7 = vmax.f32 %v1990_v22, 0.0  ;;  %v1982_v15 = vadd.f32 %v1981_v5, %v9651_v33  ;;  %2088 = vst [vmem:[#allocation2 + $0x84] sm:$0xf] %v6187_v35  ;;  %4274 = vmatmul.mubr.bf16.vlgmr.msra.gmra.mxu1 %v9525_v44  ;;  %v3261_v0 = vor.u32 %v3259_v9, %v9669_v47  ;;  %v7617_v22 = vld [vmem:[#allocation3 + $0x1e8] sm:$0xff]  }
 0x1a6   : > { %v6558_v52 = vpop.f32.mrf.mxu0  ;;  %v3270_v56 = vor.u32 %v3268_v14, %v3267_v29  ;;  %6943 = vmatpush3.bf16.msra.mxu1 %v7609_v63  ;;  %v9716_v4 = vrot.slane %v3259_v9, 5  ;;  %4192 = vmatprep.mubr.bf16.mxu0 %v9711_v49  ;;  %v3278_v61 = vshrl.u32 %v9701_v53, 16  ;;  %v3287_v39 = vshrl.u32 %v9703_v11, 16 }
 0x1a7   : > { %v6518_v33 = vpop.f32.mrf.mxu1  ;;  %2086 = vst [vmem:[#allocation2 + $0x74] sm:$0xf] %v6185_v42  ;;  %v6188_v58 = vpack.c.bf16 %v2008_v7, %v2008_v7  ;;  %v2006_v46 = vmax.f32 %v1982_v15, 0.0  ;;  %v3262_v44 = vsel %vm9419_vm8, %v9527_v55, %v3261_v0  ;;  %6944 = vmatprep.subr.bf16.mxu1 %v7612_v37  ;;  %v9728_v35 = vrot.slane %v3268_v14, 5 }
 0x1a8   : > { %v6559_v3 = vpop.f32.mrf.mxu0  ;;  %v3271_v54 = vsel %vm9419_vm8, %v3263_v17, %v3270_v56  ;;  %v9732_v55 = vrot.slane %v3265_v16, 4  ;;  %v3280_v42 = vrot.slane %v3278_v61, 7  ;;  %v2619_v7 = vadd.f32 %v9657_v34, %v6499_v59  ;;  %v9758_v56 = vld [vmem:[#allocation2 + $0x44] sm:$0xf] }
 0x1a9   : > { %v6519_v2 = vpop.f32.mrf.mxu1  ;;  %2089 = vst [vmem:[#allocation2 + $0x88] sm:$0xf] %v6188_v58  ;;  %v6186_v47 = vpack.c.bf16 %v2006_v46, %v2006_v46  ;;  %v6560_v63 = vadd.f32 %v6559_v3, %v6558_v52  ;;  %v9734_v5 = vcombine.low %v3262_v44, %v3271_v54  ;;  %v2624_v15 = vadd.f32 %v9657_v34, %v9616_v25  ;;  %v9768_v3 = vld [vmem:[#allocation2 + $0x48] sm:$0xf] }
 0x1aa   : > { %v9726_v29 = vadd.f32 %v6519_v2, %v6518_v33  ;;  %v6561_v37 = vpop.f32.mrf.mxu0  ;;  %v3289_v14 = vrot.slane %v3287_v39, 7  ;;  %6945 = vmatpush3.bf16.msra.mxu1 %v7614_v36  ;;  %v6505_v16 = vadd.f32 %v9632_v18, %v9623_v24  ;;  %v3281_v59 = vshll.u32 %v9701_v53, 16 }
 0x1ab   : > { %v9736_v9 = vpop.f32.mrf.mxu1  ;;  %2087 = vst [vmem:[#allocation2 + $0x78] sm:$0xf] %v6186_v47  ;;  %v9742_v33 = vadd.f32 %v6560_v63, %v9661_v6  ;;  %4281 = vmatprep.mubr.bf16.mxu1 %v9734_v5  ;;  %v9752_v25 = vcombine.low %v9701_v53, %v9703_v11  ;;  %v3399_v58 = vrot.slane %v3398_v62, 4  ;;  %6946 = vmatprep.subr.bf16.mxu1 %v7617_v22  ;;  %v7622_v6 = vld [vmem:[#allocation3 + $0x1e0] sm:$0xff]   ;;  %v3290_v24 = vshll.u32 %v9703_v11, 16 }
 0x1ac   : > { %v6562_v0 = vpop.f32.mrf.mxu0  ;;  %v3412_v46 = vor.u32 %v9716_v4, %v9697_v48  ;;  %4193 = vmatmul.mubr.bf16.gmra.mxu0 %v9734_v5  ;;  %v3404_v18 = vrot.slane %v3403_v19, 4  ;;  %v3417_v36 = vor.u32 %v9732_v55, %v9728_v35  ;;  %v9762_v44 = vrot.slane %v3278_v61, 4  ;;  %v7624_v47 = vld [vmem:[#allocation3 + $0x1a0] sm:$0xff]  }
 0x1ad   : > { %v9747_v52 = vpop.f32.mrf.mxu1  ;;  %v6563_v17 = vadd.f32 %v6562_v0, %v6561_v37  ;;  %4200 = vmatprep.mubr.bf16.mxu0 %v9752_v25  ;;  %v3401_v62 = vsel %vm8146_vm5, %v3399_v58, %v9676_v1  ;;  %v3283_v2 = vor.u32 %v3281_v59, %v3280_v42  ;;  %v3285_v22 = vrot.slane %v3280_v42, 4  ;;  %v7627_v0 = vld [vmem:[#allocation3 + $0x1d8] sm:$0xff]  }
 0x1ae   : > { %v6564_v4 = vpop.f32.mrf.mxu0  ;;  %v3409_v19 = vsel %vm8146_vm5, %v3404_v18, %v9529_v50  ;;  %v3292_v61 = vor.u32 %v3290_v24, %v3289_v14  ;;  %6947 = vmatpush3.bf16.msra.mxu1 %v7619_v51  ;;  %v9775_v54 = vrot.slane %v3281_v59, 5  ;;  %v3309_v51 = vshrl.u32 %v9768_v3, 16 }
 0x1af   : > { %v6524_v48 = vpop.f32.mrf.mxu1  ;;  %v9770_v11 = vadd.f32 %v6563_v17, %v2619_v7  ;;  %v9777_v63 = vcombine.low %v3401_v62, %v3409_v19  ;;  %v3284_v1 = vsel %vm9419_vm8, %v9532_v13, %v3283_v2  ;;  %v3300_v7 = vshrl.u32 %v9758_v56, 16  ;;  %6948 = vmatprep.subr.bf16.mxu1 %v7622_v6 }
 0x1b0   : > { %v6565_v37 = vpop.f32.mrf.mxu0  ;;  %v3293_v50 = vsel %vm9419_vm8, %v3285_v22, %v3292_v61  ;;  %v9788_v59 = vrot.slane %v3290_v24, 5  ;;  %v9790_v58 = vrot.slane %v3287_v39, 4  ;;  %v2627_v62 = vadd.f32 %v9657_v34, %v6505_v16  ;;  %v7629_v24 = vld [vmem:[#allocation3 + $0x198] sm:$0xff]  }
 0x1b1   : > { %v6525_v55 = vpop.f32.mrf.mxu1  ;;  %v6566_v14 = vadd.f32 %v6565_v37, %v6564_v4  ;;  %4282 = vmatmul.mubr.bf16.gmra.mxu1 %v9777_v63  ;;  %v9793_v13 = vcombine.low %v3284_v1, %v3293_v50  ;;  %v3302_v18 = vrot.slane %v3300_v7, 7  ;;  %v3311_v2 = vrot.slane %v3309_v51, 7 }
 0x1b2   : > { %v9785_v42 = vadd.f32 %v6525_v55, %v6524_v48  ;;  %v6567_v6 = vpop.f32.mrf.mxu0  ;;  %v2632_v48 = vadd.f32 %v9657_v34, %v9645_v45  ;;  %6949 = vmatpush3.bf16.msra.mxu1 %v7624_v47  ;;  %v6511_v39 = vadd.f32 %v9663_v38, %v9649_v10  ;;  %v3303_v61 = vshll.u32 %v9758_v56, 16  ;;  %v9816_v55 = vld [vmem:[#allocation2 + $0x54] sm:$0xf] }
 0x1b3   : > { %v9795_v17 = vpop.f32.mrf.mxu1  ;;  %v9800_v4 = vadd.f32 %v6566_v14, %v2624_v15  ;;  %4289 = vmatprep.mubr.bf16.mxu1 %v9793_v13  ;;  %v9810_v16 = vcombine.low %v9758_v56, %v9768_v3  ;;  %v3413_v45 = vrot.slane %v3412_v46, 4  ;;  %6950 = vmatprep.subr.bf16.mxu1 %v7627_v0  ;;  %v7633_v15 = vld [vmem:[#allocation3 + $0x1d0] sm:$0xff]   ;;  %v3426_v47 = vor.u32 %v9775_v54, %v9762_v44  ;;  %v9826_v0 = vld [vmem:[#allocation2 + $0x58] sm:$0xf] }
 0x1b4   : > { %v6568_v22 = vpop.f32.mrf.mxu0  ;;  %4201 = vmatmul.mubr.bf16.gmra.mxu0 %v9793_v13  ;;  %v3312_v10 = vshll.u32 %v9768_v3, 16  ;;  %v3418_v38 = vrot.slane %v3417_v36, 4  ;;  %v3431_v37 = vor.u32 %v9790_v58, %v9788_v59  ;;  %v9820_v50 = vrot.slane %v3300_v7, 4  ;;  %v7635_v58 = vld [vmem:[#allocation3 + $0x190] sm:$0xff]  }
 0x1b5   : > { %v9805_v19 = vpop.f32.mrf.mxu1  ;;  %v6569_v1 = vadd.f32 %v6568_v22, %v6567_v6  ;;  %4208 = vmatprep.mubr.bf16.mxu0 %v9810_v16  ;;  %v3415_v46 = vsel %vm8146_vm5, %v3413_v45, %v9728_v35  ;;  %v3305_v54 = vor.u32 %v3303_v61, %v3302_v18  ;;  %v3307_v14 = vrot.slane %v3302_v18, 4 }
 0x1b6   : > { %v6570_v44 = vpop.f32.mrf.mxu0  ;;  %v3423_v36 = vsel %vm8146_vm5, %v3418_v38, %v9540_v28  ;;  %v3314_v7 = vor.u32 %v3312_v10, %v3311_v2  ;;  %6951 = vmatpush3.bf16.msra.mxu1 %v7629_v24  ;;  %v9833_v6 = vrot.slane %v3303_v61, 5  ;;  %v3331_v24 = vshrl.u32 %v9826_v0, 16 }
 0x1b7   : > { %v6530_v56 = vpop.f32.mrf.mxu1  ;;  %v9828_v3 = vadd.f32 %v6569_v1, %v2627_v62  ;;  %v9835_v22 = vcombine.low %v3415_v46, %v3423_v36  ;;  %v3306_v35 = vsel %vm9419_vm8, %v9542_v26, %v3305_v54  ;;  %v3322_v62 = vshrl.u32 %v9816_v55, 16  ;;  %6952 = vmatprep.subr.bf16.mxu1 %v7633_v15  ;;  %v7638_v1 = vld [vmem:[#allocation3 + $0x1c8] sm:$0xff]  }
 0x1b8   : > { %v6571_v31 = vpop.f32.mrf.mxu0  ;;  %v3315_v28 = vsel %vm9419_vm8, %v3307_v14, %v3314_v7  ;;  %v9846_v61 = vrot.slane %v3312_v10, 5  ;;  %v9848_v38 = vrot.slane %v3309_v51, 4  ;;  %v2635_v36 = vadd.f32 %v9657_v34, %v6511_v39  ;;  %v7639_v10 = vld [vmem:[#allocation3 + $0x188] sm:$0xff]  }
 0x1b9   : > { %11440 = vst [vmem:[#allocation23_spill] sm:$0xff] %v9828_v3  ;;  %11441 = vst [vmem:[#allocation10_spill] sm:$0xff] %v9835_v22  ;;  %v6531_v45 = vpop.f32.mrf.mxu1  ;;  %v6572_v2 = vadd.f32 %v6571_v31, %v6570_v44  ;;  %4290 = vmatmul.mubr.bf16.gmra.mxu1 %v9835_v22  ;;  %v9851_v26 = vcombine.low %v3306_v35, %v3315_v28  ;;  %v3324_v54 = vrot.slane %v3322_v62, 7  ;;  %v3333_v44 = vrot.slane %v3331_v24, 7  ;;  %v9874_v28 = vld [vmem:[#allocation2 + $0x64] sm:$0xf] }
 0x1ba   : > { %v9843_v18 = vadd.f32 %v6531_v45, %v6530_v56  ;;  %v6573_v15 = vpop.f32.mrf.mxu0  ;;  %v2640_v56 = vadd.f32 %v9657_v34, %v9679_v43  ;;  %6953 = vmatpush3.bf16.msra.mxu1 %v7635_v58  ;;  %v6517_v51 = vadd.f32 %v9694_v40, %v9683_v30  ;;  %v3325_v35 = vshll.u32 %v9816_v55, 16 }
 0x1bb   : > { %v9853_v46 = vpop.f32.mrf.mxu1  ;;  %v9858_v31 = vadd.f32 %v6572_v2, %v2632_v48  ;;  %4297 = vmatprep.mubr.bf16.mxu1 %v9851_v26  ;;  %v9868_v39 = vcombine.low %v9816_v55, %v9826_v0  ;;  %v3427_v43 = vrot.slane %v3426_v47, 4  ;;  %6954 = vmatprep.subr.bf16.mxu1 %v7638_v1  ;;  %v7640_v48 = vld [vmem:[#allocation3 + $0x1c0] sm:$0xff]   ;;  %v3440_v58 = vor.u32 %v9833_v6, %v9820_v50  ;;  %v3189_v1 = vld [vmem:[#allocation2 + $0x68] sm:$0xf] }
 0x1bc   : > { %v6574_v7 = vpop.f32.mrf.mxu0  ;;  %4209 = vmatmul.mubr.bf16.gmra.mxu0 %v9851_v26  ;;  %v3334_v30 = vshll.u32 %v9826_v0, 16  ;;  %v3432_v40 = vrot.slane %v3431_v37, 4  ;;  %v3445_v2 = vor.u32 %v9848_v38, %v9846_v61  ;;  %v9878_v32 = vrot.slane %v3322_v62, 4  ;;  %v7641_v62 = vld [vmem:[#allocation3 + $0x180] sm:$0xff]  }
 0x1bd   : > { %11442 = vst [vmem:[#allocation20_spill] sm:$0xff] %v9858_v31  ;;  %v9863_v14 = vpop.f32.mrf.mxu1  ;;  %v6575_v45 = vadd.f32 %v6574_v7, %v6573_v15  ;;  %4216 = vmatprep.mubr.bf16.mxu0 %v9868_v39  ;;  %v3429_v47 = vsel %vm8146_vm5, %v3427_v43, %v9788_v59  ;;  %v3327_v6 = vor.u32 %v3325_v35, %v3324_v54  ;;  %v3329_v0 = vrot.slane %v3324_v54, 4 }
 0x1be   : > { %v6576_v50 = vpop.f32.mrf.mxu0  ;;  %v3437_v37 = vsel %vm8146_vm5, %v3432_v40, %v9546_v57  ;;  %v3336_v38 = vor.u32 %v3334_v30, %v3333_v44  ;;  %6955 = vmatpush3.bf16.msra.mxu1 %v7639_v10  ;;  %v9889_v7 = vrot.slane %v3325_v35, 5  ;;  %v3353_v10 = vshrl.u32 %v3189_v1, 16 }
 0x1bf   : > { %v6536_v55 = vpop.f32.mrf.mxu1  ;;  %v9884_v15 = vadd.f32 %v6575_v45, %v2635_v36  ;;  %v9891_v31 = vcombine.low %v3429_v47, %v3437_v37  ;;  %v3328_v59 = vsel %vm9419_vm8, %v9548_v41, %v3327_v6  ;;  %v3344_v36 = vshrl.u32 %v9874_v28, 16  ;;  %6956 = vmatprep.subr.bf16.mxu1 %v7640_v48 }
 0x1c0   : > { %v6577_v3 = vpop.f32.mrf.mxu0  ;;  %v3337_v57 = vsel %vm9419_vm8, %v3329_v0, %v3336_v38  ;;  %v9901_v35 = vrot.slane %v3334_v30, 5  ;;  %v9903_v45 = vrot.slane %v3331_v24, 4  ;;  %v2643_v48 = vadd.f32 %v9657_v34, %v6517_v51 }
 0x1c1   : > { %11443 = vst [vmem:[#allocation21_spill] sm:$0xff] %v9884_v15  ;;  %11444 = vst [vmem:[#allocation25_spill] sm:$0xff] %v9891_v31  ;;  %v6537_v43 = vpop.f32.mrf.mxu1  ;;  %v6578_v44 = vadd.f32 %v6577_v3, %v6576_v50  ;;  %4298 = vmatmul.mubr.bf16.gmra.mxu1 %v9891_v31  ;;  %v9906_v40 = vcombine.low %v3328_v59, %v3337_v57  ;;  %v3346_v6 = vrot.slane %v3344_v36, 7  ;;  %v11446_v3 = vshrl.u32 %v9561_v20, 16 }
 0x1c2   : > { %v9899_v54 = vadd.f32 %v6537_v43, %v6536_v55  ;;  %v6579_v47 = vpop.f32.mrf.mxu0  ;;  %v3355_v55 = vrot.slane %v3353_v10, 7  ;;  %6957 = vmatpush3.bf16.msra.mxu1 %v7641_v62  ;;  %v3347_v0 = vshll.u32 %v9874_v28, 16  ;;  %v3356_v38 = vshll.u32 %v3189_v1, 16 }
 0x1c3   : > { %v9908_v41 = vpop.f32.mrf.mxu1  ;;  %v9911_v37 = vadd.f32 %v6578_v44, %v2640_v56  ;;  %v9915_v50 = vrot.slane %v11446_v3, 11  ;;  %4305 = vmatprep.mubr.bf16.mxu1 %v9906_v40  ;;  %v9922_v59 = vcombine.low %v9874_v28, %v3189_v1  ;;  %v3441_v51 = vrot.slane %v3440_v58, 4  ;;  %v7734_v56 = vld [vmem:[#allocation3 + $0x78] sm:$0xff]   ;;  %v9929_v44 = vld [vmem:[#allocation2 + $0x74] sm:$0xf] }
 0x1c4   : > { %v6580_v30 = vpop.f32.mrf.mxu0  ;;  %7022 = vmatprep.subr.bf16.mxu1 %v7734_v56  ;;  %v2648_v20 = vadd.f32 %v9657_v34, %v9726_v29  ;;  %v6523_v62 = vadd.f32 %v9747_v52, %v9736_v9  ;;  %4217 = vmatmul.mubr.bf16.gmra.mxu0 %v9906_v40  ;;  %v3446_v57 = vrot.slane %v3445_v2, 4  ;;  %v3454_v3 = vor.u32 %v9889_v7, %v9878_v32  ;;  %v3193_v1 = vld [vmem:[#allocation2 + $0x78] sm:$0xf] }
 0x1c5   : > { %11445 = vst [vmem:[#allocation27_spill] sm:$0xff] %v9911_v37  ;;  %v9918_v24 = vpop.f32.mrf.mxu1  ;;  %v6581_v43 = vadd.f32 %v6580_v30, %v6579_v47  ;;  %v3459_v58 = vor.u32 %v9903_v45, %v9901_v35  ;;  %4224 = vmatprep.mubr.bf16.mxu0 %v9922_v59  ;;  %v3443_v29 = vsel %vm8146_vm5, %v3441_v51, %v9846_v61  ;;  %v3351_v7 = vrot.slane %v3346_v6, 4 }
 0x1c6   : > { %v6582_v28 = vpop.f32.mrf.mxu0  ;;  %v3349_v52 = vor.u32 %v3347_v0, %v3346_v6  ;;  %v3451_v32 = vsel %vm8146_vm5, %v3446_v57, %v9565_v60  ;;  %v3358_v47 = vor.u32 %v3356_v38, %v3355_v55  ;;  %v9946_v45 = vrot.slane %v3356_v38, 5 }
 0x1c7   : > { %v9939_v9 = vpop.f32.mrf.mxu1  ;;  %v9941_v2 = vadd.f32 %v6581_v43, %v2643_v48  ;;  %v3472_v30 = vrot.slane %v3353_v10, 4  ;;  %v9948_v56 = vcombine.low %v3443_v29, %v3451_v32  ;;  %v3366_v51 = vshrl.u32 %v9929_v44, 16 }
 0x1c8   : > { %v6583_v15 = vpop.f32.mrf.mxu0  ;;  %v3350_v48 = vsel %vm9419_vm8, %v9567_v27, %v3349_v52  ;;  %v3359_v43 = vsel %vm9419_vm8, %v3351_v7, %v3358_v47  ;;  %v3375_v6 = vshrl.u32 %v3193_v1, 16  ;;  %v3466_v55 = vrot.slane %v3344_v36, 4 }
 0x1c9   : > { %11447 = vst [vmem:[#allocation29_spill] sm:$0xff] %v9941_v2  ;;  %11448 = vst [vmem:[#allocation31_spill] sm:$0xff] %v9948_v56  ;;  %v9950_v61 = vpop.f32.mrf.mxu1  ;;  %v6584_v60 = vadd.f32 %v6583_v15, %v6582_v28  ;;  %v3467_v38 = vrot.slane %v3347_v0, 5  ;;  %4306 = vmatmul.mubr.bf16.gmra.mxu1 %v9948_v56  ;;  %v9959_v10 = vcombine.low %v3350_v48, %v3359_v43  ;;  %v3368_v32 = vrot.slane %v3366_v51, 7 }
 0x1ca   : > { %v6585_v57 = vpop.f32.mrf.mxu0  ;;  %v2651_v2 = vadd.f32 %v9657_v34, %v6523_v62  ;;  %v3377_v27 = vrot.slane %v3375_v6, 7  ;;  %v11450_v52 = vshll.u32 %v9569_v12, 16  ;;  %v3369_v0 = vshll.u32 %v9929_v44, 16 }
 0x1cb   : > { %v9961_v29 = vpop.f32.mrf.mxu1  ;;  %v9964_v37 = vadd.f32 %v6584_v60, %v2648_v20  ;;  %4313 = vmatprep.mubr.bf16.mxu1 %v9959_v10  ;;  %v3378_v28 = vshll.u32 %v3193_v1, 16  ;;  %v9975_v47 = vcombine.low %v9929_v44, %v3193_v1  ;;  %v3455_v48 = vrot.slane %v3454_v3, 4 }
 0x1cc   : > { %v9968_v7 = vrot.slane %v11450_v52, 5  ;;  %v6586_v15 = vpop.f32.mrf.mxu0  ;;  %v2656_v20 = vadd.f32 %v9657_v34, %v9785_v42  ;;  %v3473_v62 = vor.u32 %v3472_v30, %v9946_v45  ;;  %4225 = vmatmul.mubr.bf16.gmra.mxu0 %v9959_v10  ;;  %v3460_v43 = vrot.slane %v3459_v58, 4 }
 0x1cd   : > { %11449 = vst [vmem:[#allocation11_spill] sm:$0xff] %v9964_v37  ;;  %v9971_v36 = vpop.f32.mrf.mxu1  ;;  %11451 = vst [vmem:[#allocation22_spill] sm:$0xff] %v9975_v47  ;;  %v6587_v12 = vadd.f32 %v6586_v15, %v6585_v57  ;;  %v6529_v60 = vadd.f32 %v9805_v19, %v9795_v17  ;;  %v3468_v52 = vor.u32 %v3467_v38, %v3466_v55  ;;  %4232 = vmatprep.mubr.bf16.mxu0 %v9975_v47  ;;  %v9989_v37 = vld [vmem:[#allocation2 + $0x84] sm:$0xf]  ;;  %v3195_v55 = vld [vmem:[#allocation2 + $0x80] sm:$0xf] }
 0x1ce   : > { %v3457_v44 = vsel %vm8146_vm5, %v3455_v48, %v9901_v35  ;;  %v6588_v3 = vpop.f32.mrf.mxu0  ;;  %v3371_v42 = vor.u32 %v3369_v0, %v3368_v32  ;;  %v3465_v58 = vsel %vm8146_vm5, %v3460_v43, %v9577_v23  ;;  %v3373_v17 = vrot.slane %v3368_v32, 4  ;;  %v10007_v32 = vld [vmem:[#allocation2 + $0x88] sm:$0xf] }
 0x1cf   : > { %v9987_v1 = vpop.f32.mrf.mxu1  ;;  %v9991_v30 = vadd.f32 %v6587_v12, %v2651_v2  ;;  %v3380_v19 = vor.u32 %v3378_v28, %v3377_v27  ;;  %v9996_v38 = vrot.slane %v3378_v28, 5  ;;  %v3486_v57 = vrot.slane %v3375_v6, 4  ;;  %v3194_v28 = vld [vmem:[#allocation2 + $0x7c] sm:$0xf] }
 0x1d0   : > { %v9998_v15 = vcombine.low %v3457_v44, %v3465_v58  ;;  %v3372_v35 = vsel %vm9419_vm8, %v9915_v50, %v3371_v42  ;;  %v6589_v48 = vpop.f32.mrf.mxu0  ;;  %v3474_v23 = vrot.slane %v3473_v62, 4  ;;  %v11339_v27 = vshrl.u32 %v9989_v37, 16 }
 0x1d1   : > { %11452 = vst [vmem:[#allocation24_spill] sm:$0xff] %v9991_v30  ;;  %v10003_v47 = vpop.f32.mrf.mxu1  ;;  %v3381_v2 = vsel %vm9419_vm8, %v3373_v17, %v3380_v19  ;;  %v6590_v12 = vadd.f32 %v6589_v48, %v6588_v3  ;;  %v3480_v6 = vrot.slane %v3366_v51, 4  ;;  %v3495_v42 = vshrl.u32 %v3195_v55, 16 }
 0x1d2   : > { %11453 = vst [vmem:[#allocation33_spill] sm:$0xff] %v9998_v15  ;;  %4314 = vmatmul.mubr.bf16.gmra.mxu1 %v9998_v15  ;;  %v10011_v43 = vcombine.low %v3372_v35, %v3381_v2  ;;  %v6591_v44 = vpop.f32.mrf.mxu0  ;;  %v3481_v58 = vrot.slane %v3369_v0, 5  ;;  %v3469_v17 = vrot.slane %v3468_v52, 4  ;;  %v3502_v62 = vrot.slane %v11339_v27, 7 }
 0x1d3   : > { %v10013_v50 = vpop.f32.mrf.mxu1  ;;  %v10015_v30 = vadd.f32 %v6590_v12, %v2656_v20  ;;  %v11341_v51 = vshll.u32 %v9989_v37, 16  ;;  %v11342_v35 = vshrl.u32 %v10007_v32, 16  ;;  %v3490_v48 = vshll.u32 %v3194_v28, 16 }
 0x1d4   : > { %11454 = vst [vmem:[#allocation35_spill] sm:$0xff] %v10011_v43  ;;  %4321 = vmatprep.mubr.bf16.mxu1 %v10011_v43  ;;  %v6592_v3 = vpop.f32.mrf.mxu0  ;;  %v2659_v2 = vadd.f32 %v9657_v34, %v6529_v60  ;;  %v3487_v0 = vor.u32 %v3486_v57, %v9996_v38  ;;  %4233 = vmatmul.mubr.bf16.gmra.mxu0 %v10011_v43  ;;  %v6007_v27 = vrot.slane %v3495_v42, 11  ;;  %v11343_v57 = vshll.u32 %v10007_v32, 16 }
 0x1d5   : > { %11455 = vst [vmem:[#allocation12_spill] sm:$0xff] %v10015_v30  ;;  %v10020_v19 = vpop.f32.mrf.mxu1  ;;  %v6593_v20 = vadd.f32 %v6592_v3, %v6591_v44  ;;  %v3479_v52 = vsel %vm8146_vm5, %v3474_v23, %v9968_v7  ;;  %4370 = vmatprep.mubr.bf16.mxu0 %v9777_v63  ;;  %v3505_v28 = vor.u32 %v11341_v51, %v3502_v62  ;;  %v3511_v60 = vrot.slane %v11342_v35, 7 }
 0x1d6   : > { %v6594_v55 = vpop.f32.mrf.mxu0  ;;  %v3482_v44 = vor.u32 %v3481_v58, %v3480_v6  ;;  %v3471_v7 = vsel %vm8146_vm5, %v3469_v17, %v9946_v45  ;;  %v3507_v23 = vrot.slane %v3502_v62, 4  ;;  %v3492_v30 = vrot.slane %v3490_v48, 5 }
 0x1d7   : > { %v10031_v12 = vpop.f32.mrf.mxu1  ;;  %v10038_v3 = vadd.f32 %v6593_v20, %v2659_v2  ;;  %v10043_v63 = vcombine.low %v3471_v7, %v3479_v52  ;;  %v3514_v42 = vor.u32 %v11343_v57, %v3511_v60  ;;  %v2664_v35 = vadd.f32 %v9657_v34, %v9843_v18  ;;  %v7643_v60 = vld [vmem:[#allocation3 + $0x230] sm:$0xff]   ;;  %v7644_v7 = vld [vmem:[#allocation3 + $0x228] sm:$0xff]  }
 0x1d8   : > { %v6595_v43 = vpop.f32.mrf.mxu0  ;;  %v6535_v6 = vadd.f32 %v9863_v14, %v9853_v46  ;;  %v3488_v2 = vrot.slane %v3487_v0, 4  ;;  %v3506_v45 = vsel %vm9419_vm8, %v6007_v27, %v3505_v28  ;;  %v3483_v18 = vrot.slane %v3482_v44, 4  ;;  %v7735_v28 = vld [vmem:[#allocation3 + $0x238] sm:$0xff]  }
 0x1d9   : > { %11456 = vst [vmem:[#allocation26_spill] sm:$0xff] %v10038_v3  ;;  %11457 = vst [vmem:[#allocation28_spill] sm:$0xff] %v10043_v63  ;;  %v10047_v51 = vpop.f32.mrf.mxu1  ;;  %v6596_v58 = vadd.f32 %v6595_v43, %v6594_v55  ;;  %v3515_v17 = vsel %vm9419_vm8, %v3507_v23, %v3514_v42  ;;  %v11475_v3 = vshrl.u32 %v9989_v37, 16 }
 0x1da   : > { %4322 = vmatmul.mubr.bf16.gmra.mxu1 %v10043_v63  ;;  %v6597_v62 = vpop.f32.mrf.mxu0  ;;  %v10060_v48 = vcombine.low %v3506_v45, %v3515_v17  ;;  %v2667_v43 = vadd.f32 %v9657_v34, %v6535_v6  ;;  %v3493_v0 = vsel %vm8146_vm5, %v3488_v2, %v3492_v30  ;;  %v3485_v34 = vsel %vm8146_vm5, %v3483_v18, %v9996_v38 }
 0x1db   : > { %v10058_v20 = vpop.f32.mrf.mxu1  ;;  %v10062_v52 = vadd.f32 %v6596_v58, %v2664_v35  ;;  %v7645_v58 = vld [vmem:[#allocation3 + $0x220] sm:$0xff]  }
 0x1dc   : > { %11458 = vst [vmem:[#allocation13_spill] sm:$0xff] %v10060_v48  ;;  %v6598_v46 = vpop.f32.mrf.mxu0  ;;  %4329 = vmatprep.mubr.bf16.mxu1 %v10060_v48  ;;  %4371 = vmatmul.mubr.bf16.vlgmr.msra.gmra.mxu0 %v9671_v8  ;;  %v10081_v8 = vcombine.low %v3485_v34, %v3493_v0  ;;  %v7737_v34 = vld [vmem:[#allocation3 + $0x70] sm:$0xff]  }
 0x1dd   : > { %11459 = vst [vmem:[#allocation37_spill] sm:$0xff] %v10062_v52  ;;  %v10064_v14 = vpop.f32.mrf.mxu1  ;;  %v6599_v27 = vadd.f32 %v6598_v46, %v6597_v62  ;;  %4378 = vmatprep.mubr.bf16.mxu0 %v9835_v22  ;;  %7359 = vmatpush3.bf16.msra.mxu0 %v7735_v28  ;;  %v7741_v52 = vld [vmem:[#allocation3 + $0x60] sm:$0xff]   ;;  %v7745_v22 = vld [vmem:[#allocation3 + $0x50] sm:$0xff]  }
 0x1de   : > { %v10072_v55 = vpop.f32.mrf.mxu0  ;;  %7360 = vmatprep.subr.bf16.mxu0 %v7643_v60 }
 0x1df   : > { %11460 = vst [vmem:[#allocation39_spill] sm:$0xff] %v10072_v55  ;;  %v10074_v35 = vpop.f32.mrf.mxu1  ;;  %v10076_v44 = vadd.f32 %v6599_v27, %v2667_v43  ;;  %v7648_v27 = vld [vmem:[#allocation3 + $0x210] sm:$0xff]  }
 0x1e0   : > { %v10083_v23 = vpop.f32.mrf.mxu0 }
 0x1e1   : > { %11461 = vst [vmem:[#allocation30_spill] sm:$0xff] %v10076_v44  ;;  %11462 = vst [vmem:[#allocation32_spill] sm:$0xff] %v10083_v23  ;;  %v10085_v30 = vpop.f32.mrf.mxu1  ;;  %7361 = vmatpush3.bf16.msra.mxu0 %v7643_v60  ;;  %v7646_v60 = vld [vmem:[#allocation3 + $0x218] sm:$0xff]   ;;  %v3516_v23 = vrot.slane %v11475_v3, 4  ;;  %v6541_v3 = vadd.f32 %v9918_v24, %v9908_v41 }
 0x1e2   : > { %4330 = vmatmul.mubr.bf16.gmra.mxu1 %v10081_v8  ;;  %v10088_v42 = vpop.f32.mrf.mxu0  ;;  %7362 = vmatprep.subr.bf16.mxu0 %v7644_v7 }
 0x1e3   : > { %11463 = vst [vmem:[#allocation14_spill] sm:$0xff] %v10088_v42  ;;  %v10090_v6 = vpop.f32.mrf.mxu1  ;;  %4467 = vmatprep.mubr.bf16.mxu1 %v9711_v49  ;;  %v7743_v42 = vld [vmem:[#allocation3 + $0x58] sm:$0xff]  }
 0x1e4   : > { %v10093_v38 = vpop.f32.mrf.mxu0  ;;  %4379 = vmatmul.mubr.bf16.gmra.mxu0 %v9711_v49  ;;  %v7736_v49 = vld [vmem:[#allocation3 + $0x38] sm:$0xff]  }
 0x1e5   : > { %11464 = vst [vmem:[#allocation41_spill] sm:$0xff] %v10093_v38  ;;  %v10095_v2 = vpop.f32.mrf.mxu1  ;;  %4386 = vmatprep.mubr.bf16.mxu0 %v9891_v31  ;;  %7363 = vmatpush3.bf16.msra.mxu0 %v7644_v7 }
 0x1e6   : > { %v10101_v17 = vpop.f32.mrf.mxu0  ;;  %7364 = vmatprep.subr.bf16.mxu0 %v7645_v58 }
 0x1e7   : > { %v10099_v45 = vpop.f32.mrf.mxu1 }
 0x1e8   : > { %v10105_v18 = vpop.f32.mrf.mxu0 }
 0x1e9   : > { %v10103_v62 = vpop.f32.mrf.mxu1  ;;  %7365 = vmatpush3.bf16.msra.mxu0 %v7645_v58  ;;  %v7738_v58 = vld [vmem:[#allocation3 + $0x30] sm:$0xff]  }
 0x1ea   : > { %4468 = vmatmul.mubr.bf16.vlgmr.msra.gmra.mxu1 %v9734_v5  ;;  %v10110_v43 = vpop.f32.mrf.mxu0  ;;  %7366 = vmatprep.subr.bf16.mxu0 %v7646_v60 }
 0x1eb   : > { %v10108_v46 = vpop.f32.mrf.mxu1  ;;  %4475 = vmatprep.mubr.bf16.mxu1 %v9752_v25  ;;  %7023 = vmatpush3.bf16.msra.mxu1 %v7736_v49 }
 0x1ec   : > { %11465 = vst [vmem:[#allocation43_spill] sm:$0xff] %v10108_v46  ;;  %v10115_v28 = vpop.f32.mrf.mxu0  ;;  %7024 = vmatprep.subr.bf16.mxu1 %v7737_v34  ;;  %4387 = vmatmul.mubr.bf16.gmra.mxu0 %v9752_v25  ;;  %v7649_v34 = vld [vmem:[#allocation3 + $0x208] sm:$0xff]  }
 0x1ed   : > { %v10113_v0 = vpop.f32.mrf.mxu1  ;;  %4394 = vmatprep.mubr.bf16.mxu0 %v9948_v56  ;;  %7367 = vmatpush3.bf16.msra.mxu0 %v7646_v60  ;;  %v7740_v60 = vld [vmem:[#allocation3 + $0x28] sm:$0xff]  }
 0x1ee   : > { %11466 = vst [vmem:[#allocation34_spill] sm:$0xff] %v10113_v0  ;;  %v10121_v7 = vpop.f32.mrf.mxu0  ;;  %7368 = vmatprep.subr.bf16.mxu0 %v7648_v27  ;;  %v7748_v46 = vld [vmem:[#allocation3 + $0x48] sm:$0xff]  }
 0x1ef   : > { %v10119_v5 = vpop.f32.mrf.mxu1  ;;  %7025 = vmatpush3.bf16.msra.mxu1 %v7738_v58  ;;  %v7650_v58 = vld [vmem:[#allocation3 + $0x200] sm:$0xff]  }
 0x1f0   : > { %v10125_v57 = vpop.f32.mrf.mxu0  ;;  %7026 = vmatprep.subr.bf16.mxu1 %v7739_v21 }
 0x1f1   : > { %v10123_v49 = vpop.f32.mrf.mxu1  ;;  %7369 = vmatpush3.bf16.msra.mxu0 %v7648_v27  ;;  %v7742_v27 = vld [vmem:[#allocation3 + $0x20] sm:$0xff]  }
 0x1f2   : > { %4476 = vmatmul.mubr.bf16.gmra.mxu1 %v9793_v13  ;;  %v10130_v44 = vpop.f32.mrf.mxu0  ;;  %7370 = vmatprep.subr.bf16.mxu0 %v7649_v34 }
 0x1f3   : > { %v10128_v25 = vpop.f32.mrf.mxu1  ;;  %4483 = vmatprep.mubr.bf16.mxu1 %v9810_v16  ;;  %7027 = vmatpush3.bf16.msra.mxu1 %v7740_v60 }
 0x1f4   : > { %v10135_v31 = vpop.f32.mrf.mxu0  ;;  %7028 = vmatprep.subr.bf16.mxu1 %v7741_v52  ;;  %4395 = vmatmul.mubr.bf16.gmra.mxu0 %v9810_v16 }
 0x1f5   : > { %v10133_v56 = vpop.f32.mrf.mxu1  ;;  %4402 = vmatprep.mubr.bf16.mxu0 %v9998_v15  ;;  %7371 = vmatpush3.bf16.msra.mxu0 %v7649_v34  ;;  %v3198_v15 = vld [vmem:[#allocation2 + $0x8c] sm:$0xf]  ;;  %v7744_v34 = vld [vmem:[#allocation3 + $0x18] sm:$0xff]  }
 0x1f6   : > { %11467 = vst [vmem:[#allocation36_spill] sm:$0xff] %v10133_v56  ;;  %v10141_v13 = vpop.f32.mrf.mxu0  ;;  %7372 = vmatprep.subr.bf16.mxu0 %v7650_v58  ;;  %v3526_v0 = vshll.u32 %v3198_v15, 16  ;;  %v10178_v56 = vld [vmem:[#allocation2 + $0x8c] sm:$0xf]  ;;  %v6624_v15 = vadd.f32 %v9950_v61, %v9939_v9  ;;  %v6633_v9 = vadd.f32 %v10020_v19, %v10013_v50  ;;  %v6688_v61 = vadd.f32 %v10105_v18, %v10101_v17  ;;  %v7751_v17 = vld [vmem:[#allocation3 + $0x40] sm:$0xff]  }
 0x1f7   : > { %v10139_v21 = vpop.f32.mrf.mxu1  ;;  %7029 = vmatpush3.bf16.msra.mxu1 %v7742_v27  ;;  %v4646_v27 = vld [vmem:[#allocation2 + $0x80] sm:$0xf] }
 0x1f8   : > { %11468 = vst [vmem:[#allocation15_spill] sm:$0xff] %v10139_v21  ;;  %v10145_v38 = vpop.f32.mrf.mxu0  ;;  %7030 = vmatprep.subr.bf16.mxu1 %v7743_v42  ;;  %v11472_v21 = vshll.u32 %v10007_v32, 16 }
 0x1f9   : > { %v10143_v60 = vpop.f32.mrf.mxu1  ;;  %7373 = vmatpush3.bf16.msra.mxu0 %v7650_v58  ;;  %v7746_v58 = vld [vmem:[#allocation3 + $0xf8] sm:$0xff]  }
 0x1fa   : > { %11469 = vst [vmem:[#allocation38_spill] sm:$0xff] %v10143_v60  ;;  %4484 = vmatmul.mubr.bf16.gmra.mxu1 %v9851_v26  ;;  %v10150_v16 = vpop.f32.mrf.mxu0  ;;  %v10159_v42 = vrot.slane %v11472_v21, 5  ;;  %v11473_v26 = vshrl.u32 %v10007_v32, 16  ;;  %7086 = vmatprep.subr.bf16.mxu0 %v7746_v58  ;;  %v11476_v21 = vshll.u32 %v9989_v37, 16  ;;  %v7747_v58 = vld [vmem:[#allocation3 + $0x10] sm:$0xff]  }
 0x1fb   : > { %v10148_v52 = vpop.f32.mrf.mxu1  ;;  %4491 = vmatprep.mubr.bf16.mxu1 %v9868_v39  ;;  %7031 = vmatpush3.bf16.msra.mxu1 %v7744_v34 }
 0x1fc   : > { %11470 = vst [vmem:[#allocation40_spill] sm:$0xff] %v10148_v52  ;;  %v10155_v60 = vpop.f32.mrf.mxu0  ;;  %v3522_v52 = vrot.slane %v11473_v26, 4  ;;  %7032 = vmatprep.subr.bf16.mxu1 %v7745_v22  ;;  %4403 = vmatmul.mubr.bf16.gmra.mxu0 %v9868_v39  ;;  %v3517_v55 = vrot.slane %v11476_v21, 5  ;;  %v4687_v26 = vshrl.u32 %v4646_v27, 16  ;;  %v6630_v22 = vadd.f32 %v10003_v47, %v9987_v1  ;;  %v3199_v1 = vld [vmem:[#allocation2 + $0x90] sm:$0xf] }
 0x1fd   : > { %v10153_v48 = vpop.f32.mrf.mxu1  ;;  %4410 = vmatprep.mubr.bf16.mxu0 %v10043_v63  ;;  %v6694_v47 = vadd.f32 %v10125_v57, %v10121_v7  ;;  %v6627_v27 = vadd.f32 %v9971_v36, %v9961_v29  ;;  %v4872_v29 = vshll.u32 %v10178_v56, 16  ;;  %v7750_v36 = vld [vmem:[%s11325_s2] ss:$0 sm:$0xff]  ;;  %v6697_v7 = vadd.f32 %v10135_v31, %v10130_v44  ;;  %v11477_v31 = vld [vmem:[#allocation23_spill] sm:$0xff] }
 0x1fe   : > { %11471 = vst [vmem:[#allocation16_spill] sm:$0xff] %v10153_v48  ;;  %v10167_v48 = vpop.f32.mrf.mxu0  ;;  %v3518_v21 = vor.u32 %v3517_v55, %v3516_v23  ;;  %v10195_v41 = vrot.slane %v4687_v26, 11  ;;  %v2818_v24 = vadd.f32 %v6630_v22, %v9800_v4  ;;  %v10208_v57 = vadd.f32 %v7750_v36, %v9899_v54  ;;  %v10220_v26 = vld [vmem:[#allocation2 + $0x84] sm:$0xf] }
 0x1ff   : > { %v10165_v34 = vpop.f32.mrf.mxu1  ;;  %7033 = vmatpush3.bf16.msra.mxu1 %v7747_v58  ;;  %v10193_v58 = vrot.slane %v3526_v0, 5  ;;  %v6636_v4 = vadd.f32 %v10047_v51, %v10031_v12  ;;  %v3531_v23 = vshrl.u32 %v3199_v1, 16  ;;  %v10214_v18 = vadd.f32 %v7750_v36, %v6541_v3 }
 0x200   : > { %11474 = vst [vmem:[#allocation42_spill] sm:$0xff] %v10165_v34  ;;  %v6705_v63 = vpop.f32.mrf.mxu0  ;;  %v3523_v34 = vor.u32 %v3522_v52, %v10159_v42  ;;  %7034 = vmatprep.subr.bf16.mxu1 %v7748_v46  ;;  %v2810_v0 = vadd.f32 %v6624_v15, %v9742_v33  ;;  %v2915_v54 = vadd.f32 %v6694_v47, %v2818_v24  ;;  %v3519_v3 = vrot.slane %v3518_v21, 4  ;;  %v7753_v24 = vld [vmem:[#allocation3 + $0x178] sm:$0xff]  }
 0x201   : > { %v10175_v39 = vpop.f32.mrf.mxu1  ;;  %v2813_v51 = vadd.f32 %v6627_v27, %v9770_v11  ;;  %v6642_v12 = vadd.f32 %v10085_v30, %v10074_v35  ;;  %v2821_v44 = vadd.f32 %v6633_v9, %v11477_v31  ;;  %v10233_v47 = vcombine.low %v9989_v37, %v10007_v32  ;;  %v7752_v11 = vld [vmem:[#allocation3] sm:$0xff]   ;;  %v11478_v35 = vld [vmem:[#allocation20_spill] sm:$0xff] }
 0x202   : > { %4492 = vmatmul.mubr.bf16.gmra.mxu1 %v9906_v40  ;;  %v10191_v46 = vpop.f32.mrf.mxu0  ;;  %v7749_v40 = vld [vmem:[#allocation3 + $0x8] sm:$0xff]   ;;  %v3524_v55 = vrot.slane %v3523_v34, 4  ;;  %v6691_v34 = vadd.f32 %v10115_v28, %v10110_v43  ;;  %v2907_v15 = vadd.f32 %v6688_v61, %v2810_v0  ;;  %v2826_v30 = vadd.f32 %v6636_v4, %v11478_v35 }
 0x203   : > { %v10189_v52 = vpop.f32.mrf.mxu1  ;;  %4499 = vmatprep.mubr.bf16.mxu1 %v9922_v59  ;;  %7035 = vmatpush3.bf16.msra.mxu1 %v7749_v40  ;;  %v10241_v27 = vrot.slane %v3531_v23, 11  ;;  %v4692_v21 = vshrl.u32 %v10220_v26, 16  ;;  %v6706_v37 = vadd.f32 %v6705_v63, %v10167_v48  ;;  %v2918_v61 = vadd.f32 %v6697_v7, %v2821_v44  ;;  %v11479_v40 = vld [vmem:[#allocation27_spill] sm:$0xff]  ;;  %v11480_v0 = vld [vmem:[#allocation22_spill] sm:$0xff] }
 0x204   : > { %v6708_v19 = vpop.f32.mrf.mxu0  ;;  %7036 = vmatprep.subr.bf16.mxu1 %v7751_v17  ;;  %4411 = vmatmul.mubr.bf16.gmra.mxu0 %v9922_v59  ;;  %v3529_v28 = vsel %vm8146_vm5, %v3524_v55, %v10193_v58  ;;  %v2834_v36 = vadd.f32 %v6642_v12, %v11479_v40  ;;  %v6645_v4 = vadd.f32 %v10095_v2, %v10090_v6 }
 0x205   : > { %v10212_v50 = vpop.f32.mrf.mxu1  ;;  %4418 = vmatprep.mubr.bf16.mxu0 %v10081_v8  ;;  %v2910_v55 = vadd.f32 %v6691_v34, %v2813_v51  ;;  %v3521_v23 = vsel %vm8146_vm5, %v3519_v3, %v10159_v42  ;;  %v6700_v63 = vadd.f32 %v10145_v38, %v10141_v13  ;;  %v6639_v6 = vadd.f32 %v10064_v14, %v10058_v20  ;;  %v10267_v3 = vld [vmem:[#allocation2 + $0x88] sm:$0xf]  ;;  %v11481_v20 = vld [vmem:[#allocation29_spill] sm:$0xff] }
 0x206   : > { %v10228_v22 = vpop.f32.mrf.mxu0  ;;  %v10260_v51 = vcombine.low %v3521_v23, %v3529_v28  ;;  %v10264_v42 = vrot.slane %v4692_v21, 7  ;;  %v2837_v14 = vadd.f32 %v6645_v4, %v11481_v20  ;;  %v11482_v28 = vld [vmem:[#allocation21_spill] sm:$0xff] }
 0x207   : > { %v7344_v33 = vpop.f32.mrf.mxu1  ;;  %7037 = vmatpush3.bf16.msra.mxu1 %v7752_v11 }
 0x208   : > { %v3012_v59 = vadd.f32 %v7344_v33, %v2915_v54  ;;  %v10236_v1 = vpop.f32.mrf.mxu0  ;;  %7150 = vmatprep.subr.bf16.mxu1 %v7753_v24  ;;  %v2931_v33 = vadd.f32 %v6706_v37, %v2834_v36  ;;  %v2829_v24 = vadd.f32 %v6639_v6, %v11482_v28  ;;  %v6648_v37 = vadd.f32 %v10103_v62, %v10099_v45  ;;  %v11483_v36 = vld [vmem:[#allocation12_spill] sm:$0xff]  ;;  %v11486_v6 = vld [vmem:[#allocation11_spill] sm:$0xff] }
 0x209   : > { %v3003_v43 = vpop.f32.mrf.mxu1  ;;  %v4704_v62 = vshll.u32 %v10267_v3, 16 }
 0x20a   : > { %v3068_v32 = vmax.f32 %v3012_v59, 0.0  ;;  %v3004_v9 = vadd.f32 %v3003_v43, %v2907_v15  ;;  %4500 = vmatmul.mubr.bf16.gmra.mxu1 %v9959_v10  ;;  %v10249_v17 = vpop.f32.mrf.mxu0  ;;  %v6709_v10 = vadd.f32 %v6708_v19, %v10191_v46  ;;  %v6654_v46 = vadd.f32 %v10123_v49, %v10119_v5 }
 0x20b   : > { %v7345_v58 = vpop.f32.mrf.mxu1  ;;  %4507 = vmatprep.mubr.bf16.mxu1 %v11480_v0  ;;  %v6703_v19 = vadd.f32 %v10155_v60, %v10150_v16  ;;  %v4695_v59 = vshll.u32 %v10220_v26, 16  ;;  %v2923_v43 = vadd.f32 %v6700_v63, %v2826_v30  ;;  %v4701_v60 = vshrl.u32 %v10267_v3, 16 }
 0x20c   : > { %v6191_v48 = vpack.c.bf16 %v3068_v32, %v3068_v32  ;;  %v3066_v7 = vmax.f32 %v3004_v9, 0.0  ;;  %v3015_v54 = vadd.f32 %v7345_v58, %v2918_v61  ;;  %v6714_v2 = vpop.f32.mrf.mxu0  ;;  %4419 = vmatmul.mubr.bf16.gmra.mxu0 %v11480_v0  ;;  %v2934_v32 = vadd.f32 %v6709_v10, %v2837_v14  ;;  %v11484_v58 = vld [vmem:[#allocation36_spill] sm:$0xff] }
 0x20d   : > { %v3006_v12 = vpop.f32.mrf.mxu1  ;;  %4426 = vmatprep.mubr.bf16.mxu0 %v10260_v51  ;;  %v2850_v4 = vadd.f32 %v6654_v46, %v11483_v36  ;;  %v6657_v30 = vadd.f32 %v11484_v58, %v10128_v25  ;;  %v2926_v45 = vadd.f32 %v6703_v19, %v2829_v24  ;;  %v2842_v10 = vadd.f32 %v6648_v37, %v11486_v6  ;;  %v11488_v25 = vld [vmem:[#allocation34_spill] sm:$0xff]  ;;  %v11489_v19 = vld [vmem:[#allocation39_spill] sm:$0xff] }
 0x20e   : > { %3149 = vst [vmem:[#allocation2 + $0xa4] sm:$0xf] %v6191_v48  ;;  %v6189_v38 = vpack.c.bf16 %v3066_v7, %v3066_v7  ;;  %v3069_v13 = vmax.f32 %v3015_v54, 0.0  ;;  %v3007_v34 = vadd.f32 %v3006_v12, %v2910_v55  ;;  %v6716_v31 = vpop.f32.mrf.mxu0  ;;  %v11485_v55 = vld [vmem:[#allocation35_spill] sm:$0xff]  ;;  %v6712_v48 = vadd.f32 %v10236_v1, %v10228_v22 }
 0x20f   : > { %v7348_v44 = vpop.f32.mrf.mxu1  ;;  %v11487_v12 = vld [vmem:[#allocation43_spill] sm:$0xff]  ;;  %v4703_v20 = vrot.slane %v4701_v60, 7 }
 0x210   : > { %3147 = vst [vmem:[#allocation2 + $0x94] sm:$0xf] %v6189_v38  ;;  %v6192_v15 = vpack.c.bf16 %v3069_v13, %v3069_v13  ;;  %v3067_v11 = vmax.f32 %v3007_v34, 0.0  ;;  %v3028_v35 = vadd.f32 %v7348_v44, %v2931_v33  ;;  %v6717_v5 = vpop.f32.mrf.mxu0  ;;  %v6651_v38 = vadd.f32 %v11488_v25, %v11487_v12 }
 0x211   : > { %v3019_v49 = vpop.f32.mrf.mxu1  ;;  %v6718_v61 = vadd.f32 %v6717_v5, %v6716_v31  ;;  %v11490_v31 = vld [vmem:[#allocation32_spill] sm:$0xff]  ;;  %v10304_v5 = vor.u32 %v4695_v59, %v10264_v42 }
 0x212   : > { %3150 = vst [vmem:[#allocation2 + $0xa8] sm:$0xf] %v6192_v15  ;;  %v6190_v16 = vpack.c.bf16 %v3067_v11, %v3067_v11  ;;  %v3072_v9 = vmax.f32 %v3028_v35, 0.0  ;;  %v3020_v40 = vadd.f32 %v3019_v49, %v2923_v43  ;;  %4508 = vmatmul.mubr.bf16.gmra.mxu1 %v11485_v55  ;;  %v6719_v23 = vpop.f32.mrf.mxu0  ;;  %v6602_v44 = vadd.f32 %v11490_v31, %v11489_v19  ;;  %v11491_v15 = vld [vmem:[#allocation26_spill] sm:$0xff]  ;;  %v11501_v19 = vld [vmem:[#allocation16_spill] sm:$0xff] }
 0x213   : > { %v7349_v63 = vpop.f32.mrf.mxu1  ;;  %4515 = vmatprep.mubr.bf16.mxu1 %v10233_v47  ;;  %v2947_v33 = vadd.f32 %v6718_v61, %v2850_v4  ;;  %v2853_v11 = vadd.f32 %v6657_v30, %v11491_v15  ;;  %v6715_v35 = vadd.f32 %v6714_v2, %v10249_v17  ;;  %v11492_v43 = vld [vmem:[#allocation10_spill] sm:$0xff]  ;;  %v10312_v30 = vor.u32 %v4704_v62, %v4703_v20 }
 0x214   : > { %3148 = vst [vmem:[#allocation2 + $0x98] sm:$0xf] %v6190_v16  ;;  %v6195_v0 = vpack.c.bf16 %v3072_v9, %v3072_v9  ;;  %v3070_v7 = vmax.f32 %v3020_v40, 0.0  ;;  %v3031_v54 = vadd.f32 %v7349_v63, %v2934_v32  ;;  %v6720_v13 = vpop.f32.mrf.mxu0  ;;  %4427 = vmatmul.mubr.bf16.gmra.mxu0 %v10233_v47  ;;  %v2939_v16 = vadd.f32 %v6712_v48, %v2842_v10  ;;  %v11493_v9 = vld [vmem:[#allocation24_spill] sm:$0xff]  ;;  %v11494_v40 = vld [vmem:[#allocation15_spill] sm:$0xff]  ;;  %v11495_v17 = vld [vmem:[#allocation38_spill] sm:$0xff] }
 0x215   : > { %v3022_v34 = vpop.f32.mrf.mxu1  ;;  %v6721_v1 = vadd.f32 %v6720_v13, %v6719_v23  ;;  %7374 = vmatprep.mubr.bf16.mxu0 %v11492_v43  ;;  %v2845_v61 = vadd.f32 %v6651_v38, %v11493_v9  ;;  %v6660_v2 = vadd.f32 %v11495_v17, %v11494_v40  ;;  %v2769_v48 = vadd.f32 %v6602_v44, %v10208_v57  ;;  %v11497_v20 = vld [vmem:[#allocation14_spill] sm:$0xff]  ;;  %v11504_v40 = vld [vmem:[#allocation31_spill] sm:$0xff]  ;;  %v7754_v17 = vld [vmem:[#allocation3 + $0xb8] sm:$0xff]  }
 0x216   : > { %3153 = vst [vmem:[#allocation2 + $0xc4] sm:$0xf] %v6195_v0  ;;  %v6193_v14 = vpack.c.bf16 %v3070_v7, %v3070_v7  ;;  %v3073_v22 = vmax.f32 %v3031_v54, 0.0  ;;  %v3023_v46 = vadd.f32 %v3022_v34, %v2926_v45  ;;  %v6722_v28 = vpop.f32.mrf.mxu0  ;;  %v11496_v0 = vld [vmem:[#allocation13_spill] sm:$0xff] }
 0x217   : > { %v7352_v24 = vpop.f32.mrf.mxu1  ;;  %v10299_v37 = vld [vmem:[#allocation2 + $0x94] sm:$0xf]  ;;  %v2950_v45 = vadd.f32 %v6721_v1, %v2853_v11  ;;  %v2942_v10 = vadd.f32 %v6715_v35, %v2845_v61  ;;  %v11502_v35 = vld [vmem:[#allocation42_spill] sm:$0xff] }
 0x218   : > { %3151 = vst [vmem:[#allocation2 + $0xb4] sm:$0xf] %v6193_v14  ;;  %v6196_v47 = vpack.c.bf16 %v3073_v22, %v3073_v22  ;;  %v3071_v49 = vmax.f32 %v3023_v46, 0.0  ;;  %v3044_v32 = vadd.f32 %v7352_v24, %v2947_v33  ;;  %v6723_v36 = vpop.f32.mrf.mxu0  ;;  %v3536_v58 = vshrl.u32 %v10299_v37, 16  ;;  %v11498_v14 = vld [vmem:[#allocation41_spill] sm:$0xff]  ;;  %v11500_v46 = vld [vmem:[#allocation40_spill] sm:$0xff] }
 0x219   : > { %v3035_v4 = vpop.f32.mrf.mxu1  ;;  %v6724_v7 = vadd.f32 %v6723_v36, %v6722_v28  ;;  %v6605_v57 = vadd.f32 %v11498_v14, %v11497_v20  ;;  %v11499_v22 = vld [vmem:[#allocation37_spill] sm:$0xff]  ;;  %v6663_v31 = vadd.f32 %v11501_v19, %v11500_v46  ;;  %v3539_v11 = vshll.u32 %v10299_v37, 16 }
 0x21a   : > { %3154 = vst [vmem:[#allocation2 + $0xc8] sm:$0xf] %v6196_v47  ;;  %v6194_v55 = vpack.c.bf16 %v3071_v49, %v3071_v49  ;;  %v3076_v23 = vmax.f32 %v3044_v32, 0.0  ;;  %v3036_v63 = vadd.f32 %v3035_v4, %v2939_v16  ;;  %4516 = vmatmul.mubr.bf16.gmra.mxu1 %v11496_v0  ;;  %v6725_v54 = vpop.f32.mrf.mxu0  ;;  %v3538_v25 = vrot.slane %v3536_v58, 7  ;;  %v11503_v49 = vld [vmem:[#allocation25_spill] sm:$0xff] }
 0x21b   : > { %v7353_v6 = vpop.f32.mrf.mxu1  ;;  %v10316_v12 = vld [vmem:[#allocation2 + $0x98] sm:$0xf]  ;;  %v2858_v1 = vadd.f32 %v6660_v2, %v11499_v22  ;;  %v6666_v43 = vadd.f32 %v10175_v39, %v11502_v35 }
 0x21c   : > { %3152 = vst [vmem:[#allocation2 + $0xb8] sm:$0xf] %v6194_v55  ;;  %v6199_v38 = vpack.c.bf16 %v3076_v23, %v3076_v23  ;;  %v3074_v13 = vmax.f32 %v3036_v63, 0.0  ;;  %v3047_v34 = vadd.f32 %v7353_v6, %v2950_v45  ;;  %v3545_v33 = vshrl.u32 %v10316_v12, 16  ;;  %v6726_v44 = vpop.f32.mrf.mxu0  ;;  %7375 = vmatmul.mubr.bf16.vlgmr.msra.gmra.mxu0 %v11503_v49  ;;  %v7755_v63 = vld [vmem:[#allocation3 + $0xf0] sm:$0xff]   ;;  %v11505_v45 = vld [vmem:[#allocation30_spill] sm:$0xff] }
 0x21d   : > { %v3038_v15 = vpop.f32.mrf.mxu1  ;;  %v3541_v32 = vor.u32 %v3539_v11, %v3538_v25  ;;  %v3548_v9 = vshll.u32 %v10316_v12, 16  ;;  %v6037_v61 = vcombine.low %v10299_v37, %v10316_v12  ;;  %7378 = vmatprep.mubr.bf16.mxu0 %v11504_v40  ;;  %7087 = vmatpush3.bf16.msra.mxu0 %v7754_v17  ;;  %v6727_v4 = vadd.f32 %v6726_v44, %v6725_v54  ;;  %v10339_v54 = vld [vmem:[#allocation2 + $0x98] sm:$0xf]  ;;  %v3202_v17 = vld [vmem:[#allocation2 + $0x9c] sm:$0xf] }
 0x21e   : > { %3157 = vst [vmem:[#allocation2 + $0xe4] sm:$0xf] %v6199_v38  ;;  %v6197_v28 = vpack.c.bf16 %v3074_v13, %v3074_v13  ;;  %v3077_v24 = vmax.f32 %v3047_v34, 0.0  ;;  %v3039_v47 = vadd.f32 %v3038_v15, %v2942_v10  ;;  %v3547_v16 = vrot.slane %v3545_v33, 7  ;;  %v6728_v39 = vpop.f32.mrf.mxu0  ;;  %7088 = vmatprep.subr.bf16.mxu0 %v7755_v63 }
 0x21f   : > { %v7356_v2 = vpop.f32.mrf.mxu1  ;;  %v2955_v23 = vadd.f32 %v6724_v7, %v2858_v1  ;;  %v2861_v0 = vadd.f32 %v6663_v31, %v11505_v45  ;;  %v6669_v6 = vadd.f32 %v10212_v50, %v10189_v52  ;;  %v3543_v10 = vrot.slane %v3538_v25, 4  ;;  %4523 = vmatprep.mubr.bf16.mxu1 %v6037_v61  ;;  %v7756_v1 = vld [vmem:[#allocation3 + $0xb0] sm:$0xff]   ;;  %v7758_v45 = vld [vmem:[#allocation3 + $0xa8] sm:$0xff]  }
 0x220   : > { %3155 = vst [vmem:[#allocation2 + $0xd4] sm:$0xf] %v6197_v28  ;;  %v6200_v36 = vpack.c.bf16 %v3077_v24, %v3077_v24  ;;  %v3075_v55 = vmax.f32 %v3039_v47, 0.0  ;;  %v3550_v12 = vor.u32 %v3548_v9, %v3547_v16  ;;  %v6729_v38 = vpop.f32.mrf.mxu0  ;;  %v2866_v34 = vadd.f32 %v6666_v43, %v2769_v48  ;;  %v10426_v56 = vld [vmem:[#allocation2 + $0xb4] sm:$0xf] }
 0x221   : > { %v3051_v13 = vpop.f32.mrf.mxu1  ;;  %v6730_v14 = vadd.f32 %v6729_v38, %v6728_v39  ;;  %v2772_v7 = vadd.f32 %v6605_v57, %v10214_v18  ;;  %7089 = vmatpush3.bf16.msra.mxu0 %v7756_v1  ;;  %v3542_v50 = vsel %vm9419_vm8, %v10241_v27, %v3541_v32  ;;  %v6130_v48 = vcombine.low %v10220_v26, %v10267_v3  ;;  %v7757_v18 = vld [vmem:[#allocation3 + $0xe8] sm:$0xff]   ;;  %v10349_v57 = vld [vmem:[#allocation2 + $0x94] sm:$0xf]  ;;  %v7762_v26 = vld [vmem:[#allocation3 + $0x98] sm:$0xff]  }
 0x222   : > { %3158 = vst [vmem:[#allocation2 + $0xe8] sm:$0xf] %v6200_v36  ;;  %v6198_v20 = vpack.c.bf16 %v3075_v55, %v3075_v55  ;;  %v3052_v22 = vadd.f32 %v3051_v13, %v2955_v23  ;;  %v6731_v46 = vpop.f32.mrf.mxu0  ;;  %v3551_v25 = vsel %vm9419_vm8, %v3543_v10, %v3550_v12  ;;  %v2958_v15 = vadd.f32 %v6727_v4, %v2861_v0  ;;  %v11507_v36 = vld [vmem:[#allocation33_spill] sm:$0xff]  ;;  %v4650_v0 = vld [vmem:[#allocation2 + $0x90] sm:$0xf] }
 0x223   : > { %v7357_v19 = vpop.f32.mrf.mxu1  ;;  %v2963_v31 = vadd.f32 %v6730_v14, %v2866_v34  ;;  %v6036_v35 = vcombine.low %v3542_v50, %v3551_v25  ;;  %7090 = vmatprep.subr.bf16.mxu0 %v7757_v18  ;;  %v2869_v43 = vadd.f32 %v6669_v6, %v2772_v7  ;;  %v10351_v28 = vrot.slane %v3548_v9, 5  ;;  %v10376_v13 = vld [vmem:[#allocation2 + $0xa8] sm:$0xf] }
 0x224   : > { %3156 = vst [vmem:[#allocation2 + $0xd8] sm:$0xf] %v6198_v20  ;;  %v3078_v44 = vmax.f32 %v3052_v22, 0.0  ;;  %v3558_v24 = vrot.slane %v3545_v33, 4  ;;  %v6732_v27 = vpop.f32.mrf.mxu0  ;;  %v4723_v49 = vshrl.u32 %v10339_v54, 16  ;;  %v3552_v39 = vrot.slane %v3536_v58, 4  ;;  %7379 = vmatmul.mubr.bf16.gmra.mxu0 %v11507_v36 }
 0x225   : > { %v3054_v47 = vpop.f32.mrf.mxu1  ;;  %v3060_v32 = vadd.f32 %v7356_v2, %v2963_v31  ;;  %v6733_v61 = vadd.f32 %v6732_v27, %v6731_v46  ;;  %4524 = vmatmul.mubr.bf16.gmra.mxu1 %v6036_v35  ;;  %v4698_v33 = vsel %vm9419_vm8, %v10195_v41, %v10304_v5  ;;  %v4699_v9 = vrot.slane %v10264_v42, 4  ;;  %v11508_v58 = vld [vmem:[#allocation28_spill] sm:$0xff]  ;;  %7091 = vmatpush3.bf16.msra.mxu0 %v7758_v45  ;;  %v7759_v5 = vld [vmem:[#allocation3 + $0xe0] sm:$0xff]  }
 0x226   : > { %v6201_v16 = vpack.c.bf16 %v3078_v44, %v3078_v44  ;;  %v3055_v40 = vadd.f32 %v3054_v47, %v2958_v15  ;;  %5218 = vmatprep.mubr.bf16.mxu1 %v6130_v48  ;;  %v4714_v2 = vshrl.u32 %v10349_v57, 16  ;;  %v3553_v4 = vrot.slane %v3539_v11, 5  ;;  %7382 = vmatprep.mubr.bf16.mxu0 %v11508_v58  ;;  %v7760_v46 = vld [vmem:[#allocation3 + $0xa0] sm:$0xff]   ;;  %v10413_v36 = vld [vmem:[#allocation2 + $0xb8] sm:$0xf] }
 0x227   : > { %v3080_v55 = vmax.f32 %v3060_v32, 0.0  ;;  %v2966_v23 = vadd.f32 %v6733_v61, %v2869_v43  ;;  %v4707_v41 = vsel %vm9419_vm8, %v4699_v9, %v10312_v30  ;;  %v10371_v42 = vrot.slane %v4692_v21, 4  ;;  %7092 = vmatprep.subr.bf16.mxu0 %v7759_v5  ;;  %v4654_v27 = vld [vmem:[#allocation2 + $0xa0] sm:$0xf]  ;;  %v7763_v32 = vld [vmem:[#allocation3 + $0x138] sm:$0xff]  }
 0x228   : > { %3159 = vst [vmem:[#allocation2 + $0xf4] sm:$0xf] %v6201_v16  ;;  %v3079_v63 = vmax.f32 %v3055_v40, 0.0  ;;  %v4725_v37 = vrot.slane %v4723_v49, 7  ;;  %v3562_v11 = vshll.u32 %v3202_v17, 16  ;;  %v3559_v6 = vor.u32 %v3558_v24, %v10351_v28 }
 0x229   : > { %v6203_v10 = vpack.c.bf16 %v3080_v55, %v3080_v55  ;;  %v3063_v12 = vadd.f32 %v7357_v19, %v2966_v23  ;;  %v10380_v30 = vrot.slane %v4704_v62, 5  ;;  %v4716_v21 = vrot.slane %v4714_v2, 7  ;;  %7093 = vmatpush3.bf16.msra.mxu0 %v7760_v46  ;;  %v10387_v19 = vld [vmem:[#allocation2 + $0xa4] sm:$0xf]  ;;  %v7761_v62 = vld [vmem:[#allocation3 + $0xd8] sm:$0xff]  }
 0x22a   : > { %v6202_v38 = vpack.c.bf16 %v3079_v63, %v3079_v63  ;;  %v4726_v34 = vshll.u32 %v10339_v54, 16  ;;  %v4709_v20 = vshrl.u32 %v4650_v0, 16  ;;  %v3554_v14 = vor.u32 %v3553_v4, %v3552_v39  ;;  %7094 = vmatprep.subr.bf16.mxu0 %v7761_v62  ;;  %v7765_v39 = vld [vmem:[#allocation3 + $0x170] sm:$0xff]   ;;  %v10445_v46 = vld [vmem:[#allocation2 + $0xac] sm:$0xf] }
 0x22b   : > { %3161 = vst [vmem:[#allocation2 + $0x104] sm:$0xf] %v6203_v10  ;;  %v3081_v22 = vmax.f32 %v3063_v12, 0.0  ;;  %v4868_v7 = vrot.slane %v4701_v60, 4  ;;  %v6122_v1 = vcombine.low %v4698_v33, %v4707_v41  ;;  %v4717_v50 = vshll.u32 %v10349_v57, 16  ;;  %v7766_v63 = vld [vmem:[#allocation3 + $0x90] sm:$0xff]  }
 0x22c   : > { %3160 = vst [vmem:[#allocation2 + $0xf8] sm:$0xf] %v6202_v38  ;;  %v4728_v25 = vor.u32 %v4726_v34, %v4725_v37  ;;  %v10394_v48 = vcombine.low %v10349_v57, %v10339_v54  ;;  %v4745_v31 = vshrl.u32 %v10376_v13, 16  ;;  %v4863_v60 = vrot.slane %v4695_v59, 5  ;;  %7383 = vmatmul.mubr.bf16.gmra.mxu0 %v10081_v8  ;;  %v7764_v8 = vld [vmem:[#allocation3 + $0xd0] sm:$0xff]  }
 0x22d   : > { %v6204_v3 = vpack.c.bf16 %v3081_v22, %v3081_v22  ;;  %5219 = vmatmul.mubr.bf16.vlgmr.msra.gmra.mxu1 %v6122_v1  ;;  %v3560_v44 = vrot.slane %v3559_v6, 4  ;;  %v3564_v15 = vrot.slane %v3562_v11, 5  ;;  %v4719_v35 = vor.u32 %v4717_v50, %v4716_v21  ;;  %7386 = vmatprep.mubr.bf16.mxu0 %v10260_v51  ;;  %v7768_v11 = vld [vmem:[#allocation3 + $0x130] sm:$0xff]   ;;  %v4653_v6 = vld [vmem:[#allocation2 + $0x9c] sm:$0xf] }
 0x22e   : > { %v4721_v18 = vrot.slane %v4716_v21, 4  ;;  %5226 = vmatprep.mubr.bf16.mxu1 %v10394_v48  ;;  %v6113_v43 = vrot.slane %v4709_v20, 11  ;;  %v4736_v24 = vshrl.u32 %v10387_v19, 16  ;;  %v4869_v47 = vor.u32 %v4868_v7, %v10380_v30  ;;  %7095 = vmatpush3.bf16.msra.mxu0 %v7762_v26  ;;  %v7769_v20 = vld [vmem:[#allocation3 + $0x168] sm:$0xff]  }
 0x22f   : > { %3162 = vst [vmem:[#allocation2 + $0x108] sm:$0xf] %v6204_v3  ;;  %v3555_v59 = vrot.slane %v3554_v14, 4  ;;  %7151 = vmatpush3.bf16.msra.mxu1 %v7763_v32  ;;  %7096 = vmatprep.subr.bf16.mxu0 %v7764_v8  ;;  %v4747_v61 = vrot.slane %v4745_v31, 7  ;;  %v4864_v40 = vor.u32 %v4863_v60, %v10371_v42  ;;  %v3565_v17 = vsel %vm8146_vm5, %v3560_v44, %v3564_v15  ;;  %v7767_v42 = vld [vmem:[#allocation3 + $0xc8] sm:$0xff]   ;;  %v7771_v3 = vld [vmem:[#allocation3 + $0xc0] sm:$0xff]  }
 0x230   : > { %v4729_v16 = vsel %vm9419_vm8, %v4721_v18, %v4728_v25  ;;  %7152 = vmatprep.subr.bf16.mxu1 %v7765_v39  ;;  %v4731_v51 = vshrl.u32 %v4654_v27, 16  ;;  %v4874_v33 = vrot.slane %v4872_v29, 5  ;;  %v4720_v9 = vsel %vm9419_vm8, %v6113_v43, %v4719_v35  ;;  %v4658_v29 = vld [vmem:[#allocation2 + $0xb0] sm:$0xf]  ;;  %v7772_v15 = vld [vmem:[#allocation3 + $0x128] sm:$0xff]  }
 0x231   : > { %v4738_v4 = vrot.slane %v4736_v24, 7  ;;  %v4748_v55 = vshll.u32 %v10376_v13, 16  ;;  %v4870_v23 = vrot.slane %v4869_v47, 4  ;;  %v3557_v58 = vsel %vm8146_vm5, %v3555_v59, %v10351_v28  ;;  %v10461_v35 = vld [vmem:[#allocation2 + $0xc8] sm:$0xf] }
 0x232   : > { %7097 = vmatpush3.bf16.msra.mxu0 %v7766_v63  ;;  %v6123_v45 = vcombine.low %v4720_v9, %v4729_v16  ;;  %v4739_v0 = vshll.u32 %v10387_v19, 16  ;;  %v6038_v41 = vcombine.low %v3557_v58, %v3565_v17  ;;  %v10432_v37 = vcombine.low %v10387_v19, %v10376_v13  ;;  %v7776_v9 = vld [vmem:[#allocation3 + $0x1f8] sm:$0xff]  }
 0x233   : > { %7098 = vmatprep.subr.bf16.mxu0 %v7767_v42  ;;  %v4750_v5 = vor.u32 %v4748_v55, %v4747_v61  ;;  %7153 = vmatpush3.bf16.msra.mxu1 %v7768_v11  ;;  %v4767_v28 = vshrl.u32 %v10413_v36, 16  ;;  %v4865_v10 = vrot.slane %v4864_v40, 4  ;;  %v10437_v12 = vrot.slane %v4726_v34, 5  ;;  %v7770_v34 = vld [vmem:[#allocation3 + $0x88] sm:$0xff]   ;;  %v10471_v61 = vld [vmem:[#allocation2 + $0xc4] sm:$0xf] }
 0x234   : > { %v4882_v38 = vrot.slane %v4723_v49, 4  ;;  %v6114_v21 = vrot.slane %v4731_v51, 11  ;;  %7154 = vmatprep.subr.bf16.mxu1 %v7769_v20  ;;  %7387 = vmatmul.mubr.bf16.gmra.mxu0 %v6038_v41  ;;  %v4741_v14 = vor.u32 %v4739_v0, %v4738_v4  ;;  %v4743_v22 = vrot.slane %v4738_v4, 4 }
 0x235   : > { %5227 = vmatmul.mubr.bf16.gmra.mxu1 %v6123_v45  ;;  %v4758_v7 = vshrl.u32 %v10426_v56, 16  ;;  %v4753_v1 = vshrl.u32 %v4658_v29, 16  ;;  %v4876_v54 = vrot.slane %v4714_v2, 4  ;;  %v4877_v49 = vrot.slane %v4717_v50, 5  ;;  %5315 = vmatprep.mubr.bf16.mxu0 %v6123_v45  ;;  %v7773_v50 = vld [vmem:[#allocation3 + $0x160] sm:$0xff]   ;;  %v7777_v45 = vld [vmem:[#allocation3 + $0x158] sm:$0xff]  }
 0x236   : > { %5234 = vmatprep.mubr.bf16.mxu1 %v10432_v37  ;;  %7099 = vmatpush3.bf16.msra.mxu0 %v7770_v34  ;;  %v4886_v62 = vshll.u32 %v4653_v6, 16  ;;  %v4875_v25 = vsel %vm8146_vm5, %v4870_v23, %v4874_v33  ;;  %v4751_v60 = vsel %vm9419_vm8, %v4743_v22, %v4750_v5  ;;  %v4769_v44 = vrot.slane %v4767_v28, 7  ;;  %v7775_v33 = vld [vmem:[#allocation3 + $0x120] sm:$0xff]   ;;  %v10496_v5 = vpop.f32.mrf.mxu0  ;;  %v7780_v6 = vld [vmem:[#allocation3 + $0x1f0] sm:$0xff]  }
 0x237   : > { %7100 = vmatprep.subr.bf16.mxu0 %v7771_v3  ;;  %7155 = vmatpush3.bf16.msra.mxu1 %v7772_v15  ;;  %v4867_v57 = vsel %vm8146_vm5, %v4865_v10, %v10380_v30  ;;  %v4883_v2 = vor.u32 %v4882_v38, %v10437_v12  ;;  %v4900_v18 = vshll.u32 %v10445_v46, 16  ;;  %v4742_v43 = vsel %vm9419_vm8, %v6114_v21, %v4741_v14  ;;  %v7774_v30 = vld [vmem:[#allocation3 + $0x80] sm:$0xff]   ;;  %v10508_v14 = vld [vmem:[#allocation2 + $0xd8] sm:$0xf]  ;;  %v7781_v22 = vld [vmem:[#allocation3 + $0x150] sm:$0xff]  }
 0x238   : > { %7156 = vmatprep.subr.bf16.mxu1 %v7773_v50  ;;  %v4760_v27 = vrot.slane %v4758_v7, 7  ;;  %v4770_v47 = vshll.u32 %v10413_v36, 16  ;;  %v6115_v26 = vrot.slane %v4753_v1, 11  ;;  %v6138_v59 = vcombine.low %v4867_v57, %v4875_v25  ;;  %v6767_v34 = vpop.f32.mrf.mxu0  ;;  %v7782_v15 = vld [vmem:[#allocation3 + $0x1b0] sm:$0xff]  }
 0x239   : > { %v4878_v32 = vor.u32 %v4877_v49, %v4876_v54  ;;  %v10469_v8 = vcombine.low %v4742_v43, %v4751_v60  ;;  %v4888_v16 = vrot.slane %v4886_v62, 5  ;;  %v4761_v40 = vshll.u32 %v10426_v56, 16  ;;  %v7783_v50 = vld [vmem:[#allocation3 + $0x110] sm:$0xff]  }
 0x23a   : > { %7101 = vmatpush3.bf16.msra.mxu0 %v7774_v30  ;;  %v4772_v17 = vor.u32 %v4770_v47, %v4769_v44  ;;  %v10478_v39 = vcombine.low %v10426_v56, %v10413_v36  ;;  %v4789_v51 = vshrl.u32 %v10461_v35, 16  ;;  %v10483_v4 = vrot.slane %v4736_v24, 4  ;;  %v10526_v44 = vld [vmem:[#allocation2 + $0xd4] sm:$0xf]  ;;  %v6769_v36 = vpop.f32.mrf.mxu0 }
 0x23b   : > { %7157 = vmatpush3.bf16.msra.mxu1 %v7775_v33  ;;  %7214 = vmatprep.subr.bf16.mxu0 %v7776_v9  ;;  %v10487_v23 = vrot.slane %v4748_v55, 5  ;;  %v4896_v63 = vrot.slane %v4745_v31, 4  ;;  %v4884_v58 = vrot.slane %v4883_v2, 4  ;;  %v4891_v29 = vrot.slane %v4739_v0, 5  ;;  %v4662_v55 = vld [vmem:[#allocation2 + $0xc0] sm:$0xf] }
 0x23c   : > { %7158 = vmatprep.subr.bf16.mxu1 %v7777_v45  ;;  %v4763_v41 = vor.u32 %v4761_v40, %v4760_v27  ;;  %v4765_v42 = vrot.slane %v4760_v27, 4  ;;  %v4780_v24 = vshrl.u32 %v10471_v61, 16  ;;  %v4879_v13 = vrot.slane %v4878_v32, 4  ;;  %v7778_v31 = vld [vmem:[#allocation3 + $0x1b8] sm:$0xff]   ;;  %v7785_v32 = vld [vmem:[#allocation3 + $0x148] sm:$0xff]   ;;  %v7788_v45 = vld [vmem:[#allocation3 + $0x1e0] sm:$0xff]  }
 0x23d   : > { %5235 = vmatmul.mubr.bf16.gmra.mxu1 %v10469_v8  ;;  %5316 = vmatmul.mubr.bf16.vlgmr.msra.gmra.mxu0 %v6138_v59  ;;  %v4791_v19 = vrot.slane %v4789_v51, 7  ;;  %v7779_v0 = vld [vmem:[#allocation3 + $0x118] sm:$0xff]   ;;  %v4897_v10 = vor.u32 %v4896_v63, %v10487_v23  ;;  %v4889_v38 = vsel %vm8146_vm5, %v4884_v58, %v4888_v16  ;;  %v4775_v21 = vshrl.u32 %v4662_v55, 16  ;;  %v4666_v59 = vld [vmem:[#allocation2 + $0xd0] sm:$0xf]  ;;  %v7786_v33 = vld [vmem:[#allocation3 + $0x1a8] sm:$0xff]  }
 0x23e   : > { %5242 = vmatprep.mubr.bf16.mxu1 %v10478_v39  ;;  %5323 = vmatprep.mubr.bf16.mxu0 %v10469_v8  ;;  %v4773_v11 = vsel %vm9419_vm8, %v4765_v42, %v4772_v17  ;;  %v10506_v20 = vrot.slane %v4900_v18, 5  ;;  %v4892_v1 = vor.u32 %v4891_v29, %v10483_v4  ;;  %v4764_v46 = vsel %vm9419_vm8, %v6115_v26, %v4763_v41  ;;  %v4661_v17 = vld [vmem:[#allocation2 + $0xbc] sm:$0xf]  ;;  %v7787_v58 = vld [vmem:[#allocation3 + $0x108] sm:$0xff]  }
 0x23f   : > { %7215 = vmatpush3.bf16.msra.mxu0 %v7778_v31  ;;  %7159 = vmatpush3.bf16.msra.mxu1 %v7779_v0  ;;  %v4782_v54 = vrot.slane %v4780_v24, 7  ;;  %v4792_v49 = vshll.u32 %v10461_v35, 16  ;;  %v10518_v62 = vrot.slane %v4758_v7, 4  ;;  %v10520_v25 = vcombine.low %v4764_v46, %v4773_v11  ;;  %v7789_v31 = vld [vmem:[#allocation3 + $0x140] sm:$0xff]  }
 0x240   : > { %7216 = vmatprep.subr.bf16.mxu0 %v7780_v6  ;;  %7160 = vmatprep.subr.bf16.mxu1 %v7781_v22  ;;  %v4881_v3 = vsel %vm8146_vm5, %v4879_v13, %v10437_v12  ;;  %v4783_v60 = vshll.u32 %v10471_v61, 16  ;;  %v10534_v56 = vcombine.low %v10471_v61, %v10461_v35  ;;  %v4811_v7 = vshrl.u32 %v10508_v14, 16  ;;  %v7784_v12 = vld [vmem:[#allocation3 + $0x1e8] sm:$0xff]   ;;  %v10578_v22 = vld [vmem:[#allocation2 + $0xe4] sm:$0xf] }
 0x241   : > { %v10528_v57 = vcombine.low %v4881_v3, %v4889_v38  ;;  %v4794_v2 = vor.u32 %v4792_v49, %v4791_v19  ;;  %v10537_v18 = vrot.slane %v4761_v40, 5  ;;  %v10541_v43 = vrot.slane %v4770_v47, 5  ;;  %v10562_v13 = vld [vmem:[#allocation2 + $0xe8] sm:$0xf]  ;;  %v7792_v3 = vld [vmem:[#allocation3 + $0x1d8] sm:$0xff]  }
 0x242   : > { %v4910_v27 = vrot.slane %v4767_v28, 4  ;;  %v4898_v26 = vrot.slane %v4897_v10, 4  ;;  %v4785_v30 = vor.u32 %v4783_v60, %v4782_v54  ;;  %v4787_v16 = vrot.slane %v4782_v54, 4  ;;  %v6770_v10 = vpop.f32.mrf.mxu0 }
 0x243   : > { %7217 = vmatpush3.bf16.msra.mxu0 %v7782_v15  ;;  %7161 = vmatpush3.bf16.msra.mxu1 %v7783_v50  ;;  %v6116_v40 = vrot.slane %v4775_v21, 11  ;;  %v4802_v47 = vshrl.u32 %v10526_v44, 16  ;;  %v4893_v28 = vrot.slane %v4892_v1, 4  ;;  %v4813_v4 = vrot.slane %v4811_v7, 7  ;;  %v7790_v1 = vld [vmem:[#allocation3 + $0x1a0] sm:$0xff]  }
 0x244   : > { %7218 = vmatprep.subr.bf16.mxu0 %v7784_v12  ;;  %7162 = vmatprep.subr.bf16.mxu1 %v7785_v32  ;;  %v4795_v9 = vsel %vm9419_vm8, %v4787_v16, %v4794_v2  ;;  %v4797_v63 = vshrl.u32 %v4666_v59, 16  ;;  %v4906_v29 = vor.u32 %v10537_v18, %v10518_v62  ;;  %v4911_v41 = vor.u32 %v4910_v27, %v10541_v43  ;;  %v10598_v18 = vld [vmem:[#allocation3 + $0x238] sm:$0xff]   ;;  %v4670_v16 = vld [vmem:[#allocation2 + $0xe0] sm:$0xf] }
 0x245   : > { %5243 = vmatmul.mubr.bf16.gmra.mxu1 %v10520_v25  ;;  %5324 = vmatmul.mubr.bf16.gmra.mxu0 %v10528_v57  ;;  %v4903_v42 = vsel %vm8146_vm5, %v4898_v26, %v10506_v20  ;;  %v4914_v55 = vshll.u32 %v4661_v17, 16  ;;  %v4786_v11 = vsel %vm9419_vm8, %v6116_v40, %v4785_v30  ;;  %v4804_v19 = vrot.slane %v4802_v47, 7  ;;  %v7794_v40 = vld [vmem:[#allocation3 + $0x198] sm:$0xff]  }
 0x246   : > { %5250 = vmatprep.mubr.bf16.mxu1 %v10534_v56  ;;  %5331 = vmatprep.mubr.bf16.mxu0 %v10520_v25  ;;  %v4814_v0 = vshll.u32 %v10508_v14, 16  ;;  %v10570_v6 = vadd.f32 %v6767_v34, %v10496_v5  ;;  %v10572_v38 = vcombine.low %v4786_v11, %v4795_v9  ;;  %v4895_v21 = vsel %vm8146_vm5, %v4893_v28, %v10487_v23  ;;  %v7791_v23 = vld [vmem:[#allocation3 + $0x100] sm:$0xff]   ;;  %v7795_v28 = vld [vmem:[#allocation3 + $0x1d0] sm:$0xff]  }
 0x247   : > { %7219 = vmatpush3.bf16.msra.mxu0 %v7786_v33  ;;  %7163 = vmatpush3.bf16.msra.mxu1 %v7787_v58  ;;  %v4805_v20 = vshll.u32 %v10526_v44, 16  ;;  %v10580_v46 = vadd.f32 %v6770_v10, %v6769_v36  ;;  %v10582_v54 = vcombine.low %v4895_v21, %v4903_v42  ;;  %v10588_v34 = vcombine.low %v10526_v44, %v10508_v14 }
 0x248   : > { %7220 = vmatprep.subr.bf16.mxu0 %v7788_v45  ;;  %7164 = vmatprep.subr.bf16.mxu1 %v7789_v31  ;;  %v4816_v5 = vor.u32 %v4814_v0, %v4813_v4  ;;  %v4833_v62 = vshrl.u32 %v10562_v13, 16  ;;  %v10593_v15 = vrot.slane %v4792_v49, 5  ;;  %v4924_v2 = vrot.slane %v4789_v51, 4  ;;  %v4665_v51 = vld [vmem:[#allocation2 + $0xcc] sm:$0xf]  ;;  %v7796_v31 = vld [vmem:[#allocation3 + $0x190] sm:$0xff]  }
 0x249   : > { %v4912_v50 = vrot.slane %v4911_v41, 4  ;;  %v4916_v12 = vrot.slane %v4914_v55, 5  ;;  %v4807_v27 = vor.u32 %v4805_v20, %v4804_v19  ;;  %v4809_v26 = vrot.slane %v4804_v19, 4  ;;  %v10631_v55 = vld [vmem:[#allocation2 + $0xf4] sm:$0xf] }
 0x24a   : > { %v6117_v49 = vrot.slane %v4797_v63, 11  ;;  %v4824_v35 = vshrl.u32 %v10578_v22, 16  ;;  %v4918_v59 = vrot.slane %v4780_v24, 4  ;;  %v4919_v32 = vrot.slane %v4783_v60, 5  ;;  %v10618_v60 = vld [vmem:[#allocation2 + $0xf8] sm:$0xf] }
 0x24b   : > { %7221 = vmatpush3.bf16.msra.mxu0 %v7790_v1  ;;  %7165 = vmatpush3.bf16.msra.mxu1 %v7791_v23  ;;  %v4907_v30 = vrot.slane %v4906_v29, 4  ;;  %v4817_v17 = vsel %vm9419_vm8, %v4809_v26, %v4816_v5  ;;  %v4835_v36 = vrot.slane %v4833_v62, 7  ;;  %v4925_v33 = vor.u32 %v4924_v2, %v10593_v15  ;;  %v7797_v1 = vld [vmem:[#allocation3 + $0x1c8] sm:$0xff]  }
 0x24c   : > { %7222 = vmatprep.subr.bf16.mxu0 %v7792_v3  ;;  %7390 = vmatprep.subr.bf16.mxu1 %v10598_v18  ;;  %v4917_v61 = vsel %vm8146_vm5, %v4912_v50, %v4916_v12  ;;  %v4928_v24 = vshll.u32 %v4665_v51, 16  ;;  %v4808_v9 = vsel %vm9419_vm8, %v6117_v49, %v4807_v27  ;;  %v4826_v4 = vrot.slane %v4824_v35, 7  ;;  %v4674_v49 = vld [vmem:[#allocation2 + $0xf0] sm:$0xf]  ;;  %v7798_v51 = vld [vmem:[#allocation3 + $0x188] sm:$0xff]  }
 0x24d   : > { %5251 = vmatmul.mubr.bf16.gmra.mxu1 %v10572_v38  ;;  %5332 = vmatmul.mubr.bf16.gmra.mxu0 %v10582_v54  ;;  %v4836_v63 = vshll.u32 %v10562_v13, 16  ;;  %v4819_v58 = vshrl.u32 %v4670_v16, 16  ;;  %v4920_v45 = vor.u32 %v4919_v32, %v4918_v59  ;;  %v10625_v29 = vcombine.low %v4808_v9, %v4817_v17  ;;  %v7800_v9 = vld [vmem:[#allocation3 + $0x180] sm:$0xff]  }
 0x24e   : > { %5258 = vmatprep.mubr.bf16.mxu1 %v10588_v34  ;;  %5339 = vmatprep.mubr.bf16.mxu0 %v10572_v38  ;;  %v4909_v41 = vsel %vm8146_vm5, %v4907_v30, %v10541_v43  ;;  %v4827_v42 = vshll.u32 %v10578_v22, 16  ;;  %v10637_v10 = vcombine.low %v10578_v22, %v10562_v13  ;;  %v4855_v21 = vshrl.u32 %v10618_v60, 16  ;;  %v7799_v30 = vld [vmem:[#allocation3 + $0x1c0] sm:$0xff]  }
 0x24f   : > { %7223 = vmatpush3.bf16.msra.mxu0 %v7794_v40  ;;  %v10633_v11 = vcombine.low %v4909_v41, %v4917_v61  ;;  %v4838_v19 = vor.u32 %v4836_v63, %v4835_v36  ;;  %v10642_v43 = vrot.slane %v4814_v0, 5  ;;  %v4938_v5 = vrot.slane %v4811_v7, 4  ;;  %v4669_v0 = vld [vmem:[#allocation2 + $0xdc] sm:$0xf] }
 0x250   : > { %7224 = vmatprep.subr.bf16.mxu0 %v7795_v28  ;;  %v4926_v23 = vrot.slane %v4925_v33, 4  ;;  %v4930_v3 = vrot.slane %v4928_v24, 5  ;;  %v4829_v2 = vor.u32 %v4827_v42, %v4826_v4  ;;  %v4831_v50 = vrot.slane %v4826_v4, 4  ;;  %v10674_v24 = vld [vmem:[#allocation2 + $0x108] sm:$0xf] }
 0x251   : > { %v6118_v12 = vrot.slane %v4819_v58, 11  ;;  %v4846_v27 = vshrl.u32 %v10631_v55, 16  ;;  %v4932_v14 = vrot.slane %v4802_v47, 4  ;;  %v4933_v7 = vrot.slane %v4805_v20, 5 }
 0x252   : > { %v4921_v26 = vrot.slane %v4920_v45, 4  ;;  %v4839_v59 = vsel %vm9419_vm8, %v4831_v50, %v4838_v19  ;;  %v4857_v32 = vrot.slane %v4855_v21, 7  ;;  %v4939_v16 = vor.u32 %v4938_v5, %v10642_v43  ;;  %v10688_v5 = vld [vmem:[#allocation2 + $0x104] sm:$0xf]  ;;  %v4673_v50 = vld [vmem:[#allocation2 + $0xec] sm:$0xf] }
 0x253   : > { %7225 = vmatpush3.bf16.msra.mxu0 %v7796_v31  ;;  %v4931_v44 = vsel %vm8146_vm5, %v4926_v23, %v4930_v3  ;;  %v4942_v47 = vshll.u32 %v4669_v0, 16  ;;  %v4830_v20 = vsel %vm9419_vm8, %v6118_v12, %v4829_v2  ;;  %v4848_v40 = vrot.slane %v4846_v27, 7 }
 0x254   : > { %7226 = vmatprep.subr.bf16.mxu0 %v7797_v1  ;;  %v4858_v17 = vshll.u32 %v10618_v60, 16  ;;  %v4841_v36 = vshrl.u32 %v4674_v49, 16  ;;  %v4934_v28 = vor.u32 %v4933_v7, %v4932_v14  ;;  %v10669_v33 = vcombine.low %v4830_v20, %v4839_v59 }
 0x255   : > { %5259 = vmatmul.mubr.bf16.gmra.mxu1 %v10625_v29  ;;  %5340 = vmatmul.mubr.bf16.gmra.mxu0 %v10633_v11  ;;  %v4923_v61 = vsel %vm8146_vm5, %v4921_v26, %v10593_v15  ;;  %v4849_v58 = vshll.u32 %v10631_v55, 16  ;;  %v10681_v41 = vcombine.low %v10631_v55, %v10618_v60  ;;  %v10683_v31 = vrot.slane %v4836_v63, 5 }
 0x256   : > { %5266 = vmatprep.mubr.bf16.mxu1 %v10637_v10  ;;  %5347 = vmatprep.mubr.bf16.mxu0 %v10625_v29  ;;  %v10676_v4 = vcombine.low %v4923_v61, %v4931_v44  ;;  %v4860_v45 = vor.u32 %v4858_v17, %v4857_v32  ;;  %v4952_v19 = vrot.slane %v4833_v62, 4  ;;  %v4940_v15 = vrot.slane %v4939_v16, 4 }
 0x257   : > { %7227 = vmatpush3.bf16.msra.mxu0 %v7798_v51  ;;  %v4944_v1 = vrot.slane %v4942_v47, 5  ;;  %v4851_v23 = vor.u32 %v4849_v58, %v4848_v40  ;;  %v4853_v3 = vrot.slane %v4848_v40, 4  ;;  %v6119_v2 = vrot.slane %v4841_v36, 11  ;;  %v4678_v51 = vld [vmem:[#allocation2 + $0x100] sm:$0xf] }
 0x258   : > { %7228 = vmatprep.subr.bf16.mxu0 %v7799_v30  ;;  %v4989_v63 = vshrl.u32 %v10674_v24, 16  ;;  %v4946_v13 = vrot.slane %v4824_v35, 4  ;;  %v4947_v62 = vrot.slane %v4827_v42, 5  ;;  %v4935_v12 = vrot.slane %v4934_v28, 4 }
 0x259   : > { %v4861_v0 = vsel %vm9419_vm8, %v4853_v3, %v4860_v45  ;;  %v4980_v14 = vshrl.u32 %v10688_v5, 16  ;;  %v4953_v7 = vor.u32 %v4952_v19, %v10683_v31  ;;  %v4945_v26 = vsel %vm8146_vm5, %v4940_v15, %v4944_v1 }
 0x25a   : > { %v4956_v49 = vshll.u32 %v4673_v50, 16  ;;  %v4852_v35 = vsel %vm9419_vm8, %v6119_v2, %v4851_v23  ;;  %v4991_v22 = vrot.slane %v4989_v63, 7  ;;  %v4948_v42 = vor.u32 %v4947_v62, %v4946_v13 }
 0x25b   : > { %7229 = vmatpush3.bf16.msra.mxu0 %v7800_v9  ;;  %v10708_v59 = vcombine.low %v4852_v35, %v4861_v0  ;;  %v4937_v32 = vsel %vm8146_vm5, %v4935_v12, %v10642_v43  ;;  %v4975_v16 = vshrl.u32 %v4678_v51, 16  ;;  %v4982_v44 = vrot.slane %v4980_v14, 7  ;;  %v10726_v43 = vld [vmem:[%s11327_s4] ss:$0 sm:$0xff] }
 0x25c   : > { %v10713_v30 = vcombine.low %v4937_v32, %v4945_v26  ;;  %v4992_v47 = vshll.u32 %v10674_v24, 16  ;;  %v10718_v20 = vrot.slane %v4858_v17, 5  ;;  %v4966_v40 = vrot.slane %v4855_v21, 4  ;;  %11509 = vst [vmem:[#allocation44_spill] sm:$0xff] %v10726_v43  ;;  %v4677_v21 = vld [vmem:[#allocation2 + $0xfc] sm:$0xf] }
 0x25d   : > { %5267 = vmatmul.mubr.bf16.gmra.mxu1 %v10669_v33  ;;  %5348 = vmatmul.mubr.bf16.gmra.mxu0 %v10676_v4  ;;  %v4954_v28 = vrot.slane %v4953_v7, 4  ;;  %v4958_v61 = vrot.slane %v4956_v49, 5  ;;  %v4983_v17 = vshll.u32 %v10688_v5, 16  ;;  %v4960_v45 = vrot.slane %v4846_v27, 4 }
 0x25e   : > { %5274 = vmatprep.mubr.bf16.mxu1 %v10681_v41  ;;  %5355 = vmatprep.mubr.bf16.mxu0 %v10669_v33  ;;  %v4994_v60 = vor.u32 %v4992_v47, %v4991_v22  ;;  %v4961_v19 = vrot.slane %v4849_v58, 5  ;;  %v4179_v15 = vadd.f32 %v10570_v6, %v10726_v43  ;;  %v4949_v23 = vrot.slane %v4948_v42, 4 }
 0x25f   : > { %v4985_v50 = vor.u32 %v4983_v17, %v4982_v44  ;;  %v4987_v13 = vrot.slane %v4982_v44, 4  ;;  %v4967_v62 = vor.u32 %v4966_v40, %v10718_v20  ;;  %v4959_v27 = vsel %vm8146_vm5, %v4954_v28, %v4958_v61 }
 0x260   : > { %v4970_v58 = vshll.u32 %v4677_v21, 16  ;;  %v4962_v7 = vor.u32 %v4961_v19, %v4960_v45  ;;  %v4182_v26 = vadd.f32 %v10580_v46, %v10726_v43  ;;  %v4951_v35 = vsel %vm8146_vm5, %v4949_v23, %v10683_v31  ;;  %v7801_v21 = vld [vmem:[#allocation3 + $0x230] sm:$0xff]  }
 0x261   : > { %v4995_v0 = vsel %vm9419_vm8, %v4987_v13, %v4994_v60  ;;  %v10752_v32 = vcombine.low %v4951_v35, %v4959_v27  ;;  %v4968_v46 = vrot.slane %v4967_v62, 4 }
 0x262   : > { %v4972_v28 = vrot.slane %v4970_v58, 5 }
 0x264   : > { %v6772_v36 = vpop.f32.mrf.mxu0  ;;  %v4973_v45 = vsel %vm8146_vm5, %v4968_v46, %v4972_v28 }
 0x265   : > { %5275 = vmatmul.mubr.bf16.gmra.mxu1 %v10708_v59  ;;  %5356 = vmatmul.mubr.bf16.gmra.mxu0 %v10713_v30  ;;  %v6830_v9 = vpop.f32.mrf.mxu1 }
 0x266   : > { %5412 = vmatprep.mubr.bf16.mxu1 %v10528_v57  ;;  %5363 = vmatprep.mubr.bf16.mxu0 %v10708_v59  ;;  %v6773_v1 = vpop.f32.mrf.mxu0  ;;  %v6120_v57 = vrot.slane %v4975_v16, 11 }
 0x267   : > { %v6774_v3 = vadd.f32 %v6773_v1, %v6772_v36  ;;  %v6831_v2 = vpop.f32.mrf.mxu1 }
 0x268   : > { %v6832_v12 = vadd.f32 %v6831_v2, %v6830_v9  ;;  %v6775_v55 = vpop.f32.mrf.mxu0  ;;  %v4986_v16 = vsel %vm9419_vm8, %v6120_v57, %v4985_v50  ;;  %v4963_v9 = vrot.slane %v4962_v7, 4 }
 0x269   : > { %v6833_v6 = vpop.f32.mrf.mxu1  ;;  %v10757_v36 = vcombine.low %v4986_v16, %v4995_v0  ;;  %v4187_v50 = vadd.f32 %v6774_v3, %v10726_v43 }
 0x26a   : > { %v10747_v49 = vadd.f32 %v6832_v12, %v4179_v15  ;;  %v6776_v51 = vpop.f32.mrf.mxu0  ;;  %v4965_v1 = vsel %vm8146_vm5, %v4963_v9, %v10718_v20 }
 0x26b   : > { %v6777_v22 = vadd.f32 %v6776_v51, %v6775_v55  ;;  %v6834_v42 = vpop.f32.mrf.mxu1  ;;  %v10770_v57 = vcombine.low %v4965_v1, %v4973_v45 }
 0x26c   : > { %v6835_v44 = vadd.f32 %v6834_v42, %v6833_v6  ;;  %v6778_v40 = vpop.f32.mrf.mxu0  ;;  %v7803_v6 = vld [vmem:[#allocation3 + $0x220] sm:$0xff]  }
 0x26d   : > { %5413 = vmatmul.mubr.bf16.vlgmr.msra.gmra.mxu1 %v10394_v48  ;;  %5364 = vmatmul.mubr.bf16.gmra.mxu0 %v10752_v32  ;;  %v4190_v3 = vadd.f32 %v6777_v22, %v10726_v43 }
 0x26e   : > { %5420 = vmatprep.mubr.bf16.mxu1 %v10582_v54  ;;  %v10761_v31 = vadd.f32 %v6835_v44, %v4182_v26  ;;  %5371 = vmatprep.mubr.bf16.mxu0 %v10757_v36  ;;  %v6779_v61 = vpop.f32.mrf.mxu0  ;;  %v7804_v44 = vld [vmem:[#allocation3 + $0x218] sm:$0xff]  }
 0x26f   : > { %7391 = vmatpush3.bf16.msra.mxu1 %v10598_v18  ;;  %v6780_v60 = vadd.f32 %v6779_v61, %v6778_v40  ;;  %v7802_v18 = vld [vmem:[#allocation3 + $0x228] sm:$0xff]  }
 0x270   : > { %7392 = vmatprep.subr.bf16.mxu1 %v7801_v21  ;;  %v6781_v48 = vpop.f32.mrf.mxu0 }
 0x271   : > { %v6836_v19 = vpop.f32.mrf.mxu1 }
 0x272   : > { %v6782_v15 = vpop.f32.mrf.mxu0 }
 0x273   : > { %7393 = vmatpush3.bf16.msra.mxu1 %v7801_v21  ;;  %v6837_v23 = vpop.f32.mrf.mxu1  ;;  %v6783_v2 = vadd.f32 %v6782_v15, %v6781_v48  ;;  %v7805_v48 = vld [vmem:[#allocation3 + $0x210] sm:$0xff]  }
 0x274   : > { %7394 = vmatprep.subr.bf16.mxu1 %v7802_v18  ;;  %v6838_v13 = vadd.f32 %v6837_v23, %v6836_v19  ;;  %v6784_v62 = vpop.f32.mrf.mxu0 }
 0x275   : > { %5421 = vmatmul.mubr.bf16.gmra.mxu1 %v10432_v37  ;;  %v6839_v12 = vpop.f32.mrf.mxu1  ;;  %5372 = vmatmul.mubr.bf16.gmra.mxu0 %v10770_v57 }
 0x276   : > { %5428 = vmatprep.mubr.bf16.mxu1 %v10633_v11  ;;  %v10776_v55 = vadd.f32 %v6838_v13, %v4187_v50  ;;  %5509 = vmatprep.mubr.bf16.mxu0 %v10432_v37  ;;  %v6785_v20 = vpop.f32.mrf.mxu0  ;;  %v4195_v37 = vadd.f32 %v6780_v60, %v10726_v43  ;;  %v4198_v60 = vadd.f32 %v6783_v2, %v10726_v43  ;;  %v7806_v50 = vld [vmem:[#allocation3 + $0x208] sm:$0xff]  }
 0x277   : > { %7395 = vmatpush3.bf16.msra.mxu1 %v7802_v18  ;;  %v6840_v27 = vpop.f32.mrf.mxu1  ;;  %v6786_v58 = vadd.f32 %v6785_v20, %v6784_v62 }
 0x278   : > { %7396 = vmatprep.subr.bf16.mxu1 %v7803_v6  ;;  %v6841_v0 = vadd.f32 %v6840_v27, %v6839_v12  ;;  %v6787_v7 = vpop.f32.mrf.mxu0 }
 0x279   : > { %v6842_v26 = vpop.f32.mrf.mxu1 }
 0x27a   : > { %v10780_v51 = vadd.f32 %v6841_v0, %v4190_v3  ;;  %v6788_v35 = vpop.f32.mrf.mxu0  ;;  %v7807_v3 = vld [vmem:[#allocation3 + $0x200] sm:$0xff]  }
 0x27b   : > { %7397 = vmatpush3.bf16.msra.mxu1 %v7803_v6  ;;  %v6843_v42 = vpop.f32.mrf.mxu1  ;;  %v6789_v16 = vadd.f32 %v6788_v35, %v6787_v7 }
 0x27c   : > { %7398 = vmatprep.subr.bf16.mxu1 %v7804_v44  ;;  %v6844_v40 = vadd.f32 %v6843_v42, %v6842_v26  ;;  %v6790_v46 = vpop.f32.mrf.mxu0 }
 0x27d   : > { %5429 = vmatmul.mubr.bf16.gmra.mxu1 %v10478_v39  ;;  %v6845_v28 = vpop.f32.mrf.mxu1  ;;  %5510 = vmatmul.mubr.bf16.vlgmr.msra.gmra.mxu0 %v10469_v8 }
 0x27e   : > { %5436 = vmatprep.mubr.bf16.mxu1 %v10676_v4  ;;  %v10786_v22 = vadd.f32 %v6844_v40, %v4195_v37  ;;  %5517 = vmatprep.mubr.bf16.mxu0 %v10478_v39  ;;  %v6791_v61 = vpop.f32.mrf.mxu0  ;;  %v4203_v39 = vadd.f32 %v6786_v58, %v10726_v43  ;;  %v4206_v58 = vadd.f32 %v6789_v16, %v10726_v43  ;;  %v5002_v16 = vrot.slane %v4989_v63, 4 }
 0x27f   : > { %7399 = vmatpush3.bf16.msra.mxu1 %v7804_v44  ;;  %v6846_v9 = vpop.f32.mrf.mxu1  ;;  %v6792_v21 = vadd.f32 %v6791_v61, %v6790_v46  ;;  %v5000_v46 = vrot.slane %v4992_v47, 5  ;;  %v4681_v61 = vld [vmem:[#allocation2 + $0x10c] sm:$0xf]  ;;  %v4997_v47 = vrot.slane %v4983_v17, 5 }
 0x280   : > { %7400 = vmatprep.subr.bf16.mxu1 %v7805_v48  ;;  %v6847_v45 = vadd.f32 %v6846_v9, %v6845_v28  ;;  %v6793_v19 = vpop.f32.mrf.mxu0 }
 0x281   : > { %v6848_v15 = vpop.f32.mrf.mxu1  ;;  %v4211_v37 = vadd.f32 %v6792_v21, %v10726_v43 }
 0x282   : > { %v10790_v1 = vadd.f32 %v6847_v45, %v4198_v60  ;;  %v6794_v8 = vpop.f32.mrf.mxu0 }
 0x283   : > { %7401 = vmatpush3.bf16.msra.mxu1 %v7805_v48  ;;  %v6849_v23 = vpop.f32.mrf.mxu1  ;;  %v6795_v18 = vadd.f32 %v6794_v8, %v6793_v19  ;;  %v4996_v48 = vrot.slane %v4980_v14, 4  ;;  %v5006_v8 = vshll.u32 %v4681_v61, 16 }
 0x284   : > { %7402 = vmatprep.subr.bf16.mxu1 %v7806_v50  ;;  %v6850_v13 = vadd.f32 %v6849_v23, %v6848_v15  ;;  %v6796_v62 = vpop.f32.mrf.mxu0  ;;  %v5003_v15 = vor.u32 %v5002_v16, %v5000_v46 }
 0x285   : > { %5437 = vmatmul.mubr.bf16.gmra.mxu1 %v10534_v56  ;;  %v6851_v12 = vpop.f32.mrf.mxu1  ;;  %5518 = vmatmul.mubr.bf16.gmra.mxu0 %v10520_v25  ;;  %v4214_v63 = vadd.f32 %v6795_v18, %v10726_v43 }
 0x286   : > { %5444 = vmatprep.mubr.bf16.mxu1 %v10713_v30  ;;  %v10796_v2 = vadd.f32 %v6850_v13, %v4203_v39  ;;  %5525 = vmatprep.mubr.bf16.mxu0 %v10534_v56  ;;  %v6797_v20 = vpop.f32.mrf.mxu0  ;;  %v5004_v17 = vrot.slane %v5003_v15, 4 }
 0x287   : > { %7403 = vmatpush3.bf16.msra.mxu1 %v7806_v50  ;;  %v6852_v27 = vpop.f32.mrf.mxu1  ;;  %v6798_v6 = vadd.f32 %v6797_v20, %v6796_v62 }
 0x288   : > { %7404 = vmatprep.subr.bf16.mxu1 %v7807_v3  ;;  %v6853_v0 = vadd.f32 %v6852_v27, %v6851_v12  ;;  %v6799_v7 = vpop.f32.mrf.mxu0  ;;  %v5008_v27 = vrot.slane %v5006_v8, 5 }
 0x289   : > { %v6854_v26 = vpop.f32.mrf.mxu1  ;;  %v4219_v14 = vadd.f32 %v6798_v6, %v10726_v43 }
 0x28a   : > { %v10800_v35 = vadd.f32 %v6853_v0, %v4206_v58  ;;  %v6800_v25 = vpop.f32.mrf.mxu0 }
 0x28b   : > { %7405 = vmatpush3.bf16.msra.mxu1 %v7807_v3  ;;  %v6855_v42 = vpop.f32.mrf.mxu1  ;;  %v6801_v44 = vadd.f32 %v6800_v25, %v6799_v7 }
 0x28c   : > { %v6856_v56 = vadd.f32 %v6855_v42, %v6854_v26  ;;  %v6802_v40 = vpop.f32.mrf.mxu0 }
 0x28d   : > { %5445 = vmatmul.mubr.bf16.gmra.mxu1 %v10588_v34  ;;  %v6857_v28 = vpop.f32.mrf.mxu1  ;;  %5526 = vmatmul.mubr.bf16.gmra.mxu0 %v10572_v38  ;;  %v4222_v6 = vadd.f32 %v6801_v44, %v10726_v43 }
 0x28e   : > { %5452 = vmatprep.mubr.bf16.mxu1 %v10752_v32  ;;  %v10810_v9 = vadd.f32 %v6856_v56, %v4211_v37  ;;  %5533 = vmatprep.mubr.bf16.mxu0 %v10588_v34  ;;  %v6803_v21 = vpop.f32.mrf.mxu0  ;;  %v4998_v34 = vor.u32 %v4997_v47, %v4996_v48  ;;  %v5009_v37 = vsel %vm8146_vm5, %v5004_v17, %v5008_v27 }
 0x28f   : > { %v6858_v60 = vpop.f32.mrf.mxu1  ;;  %v6804_v45 = vadd.f32 %v6803_v21, %v6802_v40 }
 0x290   : > { %v6859_v19 = vadd.f32 %v6858_v60, %v6857_v28  ;;  %v6805_v38 = vpop.f32.mrf.mxu0  ;;  %v4999_v0 = vrot.slane %v4998_v34, 4 }
 0x291   : > { %v4227_v21 = vadd.f32 %v6804_v45, %v10726_v43 }
 0x292   : > { %v6860_v23 = vpop.f32.mrf.mxu1  ;;  %v10818_v50 = vadd.f32 %v6859_v19, %v4214_v63  ;;  %v6806_v39 = vpop.f32.mrf.mxu0  ;;  %v5001_v16 = vsel %vm8146_vm5, %v4999_v0, %v5000_v46  ;;  %v4683_v63 = vld [vmem:[#allocation2 + $0x114] sm:$0xf] }
 0x293   : > { %v6807_v62 = vadd.f32 %v6806_v39, %v6805_v38  ;;  %v10834_v61 = vcombine.low %v5001_v16, %v5009_v37  ;;  %v4684_v38 = vld [vmem:[#allocation2 + $0x118] sm:$0xf]  ;;  %v5016_v39 = vshrl.u32 %v4683_v63, 16 }
 0x294   : > { %11510 = vst [vmem:[#allocation17_spill] sm:$0xff] %v10818_v50  ;;  %v6861_v13 = vpop.f32.mrf.mxu1  ;;  %v6808_v20 = vpop.f32.mrf.mxu0 }
 0x295   : > { %v6862_v12 = vadd.f32 %v6861_v13, %v6860_v23  ;;  %5453 = vmatmul.mubr.bf16.gmra.mxu1 %v10637_v10  ;;  %5534 = vmatmul.mubr.bf16.gmra.mxu0 %v10625_v29  ;;  %v4230_v45 = vadd.f32 %v6807_v62, %v10726_v43  ;;  %v6147_v13 = vcombine.low %v10688_v5, %v10674_v24 }
 0x296   : > { %v6863_v18 = vpop.f32.mrf.mxu1  ;;  %5460 = vmatprep.mubr.bf16.mxu1 %v10770_v57  ;;  %5541 = vmatprep.mubr.bf16.mxu0 %v10637_v10  ;;  %v6809_v58 = vpop.f32.mrf.mxu0 }
 0x297   : > { %v10824_v3 = vadd.f32 %v6862_v12, %v4219_v14  ;;  %v6810_v26 = vadd.f32 %v6809_v58, %v6808_v20  ;;  %v4682_v12 = vld [vmem:[#allocation2 + $0x110] sm:$0xf]  ;;  %v5019_v58 = vshll.u32 %v4683_v63, 16 }
 0x298   : > { %v6864_v7 = vpop.f32.mrf.mxu1  ;;  %v6811_v42 = vpop.f32.mrf.mxu0 }
 0x299   : > { %v6865_v25 = vadd.f32 %v6864_v7, %v6863_v18  ;;  %v4235_v20 = vadd.f32 %v6810_v26, %v10726_v43  ;;  %v5018_v18 = vrot.slane %v5016_v39, 7  ;;  %v5028_v7 = vshll.u32 %v4684_v38, 16 }
 0x29a   : > { %v6866_v56 = vpop.f32.mrf.mxu1  ;;  %v6812_v29 = vpop.f32.mrf.mxu0 }
 0x29b   : > { %v10830_v40 = vadd.f32 %v6865_v25, %v4222_v6  ;;  %v6813_v10 = vadd.f32 %v6812_v29, %v6811_v42  ;;  %v5011_v6 = vshrl.u32 %v4682_v12, 16  ;;  %v5036_v12 = vrot.slane %v5028_v7, 5 }
 0x29c   : > { %v6867_v28 = vpop.f32.mrf.mxu1  ;;  %v10837_v44 = vpop.f32.mrf.mxu0 }
 0x29d   : > { %11511 = vst [vmem:[#allocation18_spill] sm:$0xff] %v10830_v40  ;;  %v6868_v48 = vadd.f32 %v6867_v28, %v6866_v56  ;;  %5461 = vmatmul.mubr.bf16.gmra.mxu1 %v10681_v41  ;;  %5542 = vmatmul.mubr.bf16.gmra.mxu0 %v10669_v33  ;;  %v4238_v25 = vadd.f32 %v6813_v10, %v10726_v43 }
 0x29e   : > { %v6869_v47 = vpop.f32.mrf.mxu1  ;;  %5468 = vmatprep.mubr.bf16.mxu1 %v10834_v61  ;;  %5549 = vmatprep.mubr.bf16.mxu0 %v10681_v41  ;;  %v10845_v46 = vpop.f32.mrf.mxu0  ;;  %v5025_v41 = vshrl.u32 %v4684_v38, 16 }
 0x29f   : > { %v10842_v60 = vadd.f32 %v6868_v48, %v4227_v21  ;;  %v6150_v21 = vcombine.low %v4683_v63, %v4684_v38  ;;  %v6121_v48 = vrot.slane %v5011_v6, 11 }
 0x2a0   : > { %v6870_v19 = vpop.f32.mrf.mxu1  ;;  %v10848_v8 = vpop.f32.mrf.mxu0  ;;  %v5027_v5 = vrot.slane %v5025_v41, 7 }
 0x2a1   : > { %11512 = vst [vmem:[#allocation9_spill] sm:$0xff] %v10842_v60  ;;  %v6871_v15 = vadd.f32 %v6870_v19, %v6869_v47 }
 0x2a2   : > { %v6872_v23 = vpop.f32.mrf.mxu1  ;;  %v10852_v33 = vpop.f32.mrf.mxu0  ;;  %v5030_v28 = vor.u32 %v5028_v7, %v5027_v5 }
 0x2a3   : > { %v10850_v34 = vadd.f32 %v6871_v15, %v4230_v45 }
 0x2a4   : > { %v6873_v14 = vpop.f32.mrf.mxu1  ;;  %v10857_v27 = vpop.f32.mrf.mxu0 }
 0x2a5   : > { %11513 = vst [vmem:[#allocation23_spill] sm:$0xff] %v10850_v34  ;;  %v6874_v17 = vadd.f32 %v6873_v14, %v6872_v23  ;;  %5469 = vmatmul.mubr.bf16.gmra.mxu1 %v6147_v13  ;;  %5550 = vmatmul.mubr.bf16.gmra.mxu0 %v10708_v59  ;;  %v5021_v59 = vor.u32 %v5019_v58, %v5018_v18  ;;  %v5033_v14 = vrot.slane %v5019_v58, 5 }
 0x2a6   : > { %v6875_v62 = vpop.f32.mrf.mxu1  ;;  %7406 = vmatprep.mubr.bf16.mxu1 %v10582_v54  ;;  %5557 = vmatprep.mubr.bf16.mxu0 %v6147_v13  ;;  %v10863_v24 = vpop.f32.mrf.mxu0  ;;  %v5023_v54 = vrot.slane %v5018_v18, 4 }
 0x2a7   : > { %v10861_v0 = vadd.f32 %v6874_v17, %v4235_v20  ;;  %v5022_v15 = vsel %vm9419_vm8, %v6121_v48, %v5021_v59  ;;  %v4685_v17 = vld [vmem:[#allocation2 + $0x11c] sm:$0xf] }
 0x2a8   : > { %v6876_v26 = vpop.f32.mrf.mxu1  ;;  %v10866_v37 = vpop.f32.mrf.mxu0  ;;  %v5031_v63 = vsel %vm9419_vm8, %v5023_v54, %v5030_v28 }
 0x2a9   : > { %11514 = vst [vmem:[#allocation20_spill] sm:$0xff] %v10861_v0  ;;  %v6877_v42 = vadd.f32 %v6876_v26, %v6875_v62  ;;  %v6149_v20 = vcombine.low %v5022_v15, %v5031_v63  ;;  %v6902_v0 = vadd.f32 %v10863_v24, %v10857_v27 }
 0x2aa   : > { %v10868_v56 = vpop.f32.mrf.mxu1  ;;  %v10872_v16 = vpop.f32.mrf.mxu0 }
 0x2ab   : > { %v10870_v29 = vadd.f32 %v6877_v42, %v4238_v25  ;;  %v6905_v27 = vadd.f32 %v10872_v16, %v10866_v37 }
 0x2ac   : > { %v10874_v47 = vpop.f32.mrf.mxu1  ;;  %v10876_v19 = vpop.f32.mrf.mxu0 }
 0x2ad   : > { %11515 = vst [vmem:[#allocation27_spill] sm:$0xff] %v10870_v29  ;;  %7407 = vmatmul.mubr.bf16.vlgmr.msra.gmra.mxu1 %v10633_v11  ;;  %5558 = vmatmul.mubr.bf16.gmra.mxu0 %v10757_v36  ;;  %v5032_v11 = vrot.slane %v5016_v39, 4  ;;  %v5038_v36 = vrot.slane %v5025_v41, 4  ;;  %v5042_v39 = vshll.u32 %v4685_v17, 16 }
 0x2ae   : > { %v10879_v10 = vpop.f32.mrf.mxu1  ;;  %7410 = vmatprep.mubr.bf16.mxu1 %v10676_v4  ;;  %v10883_v45 = vpop.f32.mrf.mxu0  ;;  %5565 = vmatprep.mubr.bf16.mxu0 %v6150_v21 }
 0x2af   : > { %v5034_v5 = vor.u32 %v5033_v14, %v5032_v11  ;;  %v5039_v6 = vor.u32 %v5038_v36, %v5036_v12  ;;  %v5044_v59 = vrot.slane %v5042_v39, 5 }
 0x2b0   : > { %v10889_v38 = vpop.f32.mrf.mxu1  ;;  %v10891_v23 = vpop.f32.mrf.mxu0 }
 0x2b1   : > { %v5035_v25 = vrot.slane %v5034_v5, 4  ;;  %v5040_v42 = vrot.slane %v5039_v6, 4  ;;  %v6963_v37 = vadd.f32 %v10889_v38, %v10879_v10 }
 0x2b2   : > { %v6964_v13 = vpop.f32.mrf.mxu1  ;;  %v10893_v4 = vpop.f32.mrf.mxu0 }
 0x2b3   : > { %v5037_v21 = vsel %vm8146_vm5, %v5035_v25, %v5036_v12  ;;  %v5045_v48 = vsel %vm8146_vm5, %v5040_v42, %v5044_v59 }
 0x2b4   : > { %v6965_v62 = vpop.f32.mrf.mxu1  ;;  %v10895_v18 = vpop.f32.mrf.mxu0  ;;  %v6151_v14 = vcombine.low %v5037_v21, %v5045_v48 }
 0x2b5   : > { %7411 = vmatmul.mubr.bf16.gmra.mxu1 %v10713_v30  ;;  %5566 = vmatmul.mubr.bf16.gmra.mxu0 %v6149_v20 }
 0x2b6   : > { %v6967_v52 = vpop.f32.mrf.mxu1  ;;  %7414 = vmatprep.mubr.bf16.mxu1 %v10752_v32  ;;  %v10899_v26 = vpop.f32.mrf.mxu0 }
 0x2b8   : > { %v6968_v58 = vpop.f32.mrf.mxu1  ;;  %v10901_v41 = vpop.f32.mrf.mxu0 }
 0x2ba   : > { %v10903_v7 = vpop.f32.mrf.mxu1  ;;  %v10905_v54 = vpop.f32.mrf.mxu0 }
 0x2bc   : > { %v10907_v30 = vpop.f32.mrf.mxu1  ;;  %v10909_v28 = vpop.f32.mrf.mxu0 }
 0x2bd   : > { %7415 = vmatmul.mubr.bf16.gmra.mxu1 %v10770_v57 }
 0x2be   : > { %v10912_v32 = vpop.f32.mrf.mxu1  ;;  %7418 = vmatprep.mubr.bf16.mxu1 %v10834_v61  ;;  %v10919_v15 = vpop.f32.mrf.mxu0 }
 0x2c0   : > { %v10921_v63 = vpop.f32.mrf.mxu1  ;;  %v10923_v11 = vpop.f32.mrf.mxu0 }
 0x2c2   : > { %v6976_v36 = vpop.f32.mrf.mxu1  ;;  %v10925_v20 = vpop.f32.mrf.mxu0 }
 0x2c4   : > { %v6977_v57 = vpop.f32.mrf.mxu1  ;;  %v10927_v17 = vpop.f32.mrf.mxu0 }
 0x2c5   : > { %7419 = vmatmul.mubr.bf16.gmra.mxu1 %v6151_v14 }
 0x2c6   : > { %v10929_v61 = vpop.f32.mrf.mxu1  ;;  %v10931_v12 = vpop.f32.mrf.mxu0 }
 0x2c8   : > { %v6980_v53 = vpop.f32.mrf.mxu1  ;;  %v10933_v5 = vpop.f32.mrf.mxu0 }
 0x2ca   : > { %v10935_v6 = vpop.f32.mrf.mxu1  ;;  %v10937_v39 = vpop.f32.mrf.mxu0 }
 0x2cc   : > { %v10939_v25 = vpop.f32.mrf.mxu1  ;;  %v10941_v42 = vpop.f32.mrf.mxu0 }
 0x2cd   : > { %11516 = vst [vmem:[#allocation22_spill] sm:$0xff] %v10941_v42 }
 0x2ce   : > { %v10943_v59 = vpop.f32.mrf.mxu1  ;;  %v10945_v21 = vpop.f32.mrf.mxu0 }
 0x2cf   : > { %11517 = vst [vmem:[#allocation29_spill] sm:$0xff] %v10945_v21  ;;  %v6966_v21 = vadd.f32 %v6965_v62, %v6964_v13  ;;  %v6969_v13 = vadd.f32 %v6968_v58, %v6967_v52 }
 0x2d0   : > { %v10947_v48 = vpop.f32.mrf.mxu1  ;;  %v10949_v14 = vpop.f32.mrf.mxu0 }
 0x2d1   : > { %11518 = vst [vmem:[#allocation21_spill] sm:$0xff] %v10947_v48  ;;  %11519 = vst [vmem:[#allocation12_spill] sm:$0xff] %v10949_v14  ;;  %v6896_v14 = vadd.f32 %v10845_v46, %v10837_v44  ;;  %v6899_v46 = vadd.f32 %v10852_v33, %v10848_v8  ;;  %v6908_v33 = vadd.f32 %v10883_v45, %v10876_v19 }
 0x2d2   : > { %v10951_v43 = vpop.f32.mrf.mxu1  ;;  %v10953_v34 = vpop.f32.mrf.mxu0  ;;  %v6911_v19 = vadd.f32 %v10893_v4, %v10891_v23 }
 0x2d3   : > { %11520 = vst [vmem:[#allocation36_spill] sm:$0xff] %v10953_v34  ;;  %v4381_v34 = vadd.f32 %v6902_v0, %v10776_v55  ;;  %v4373_v44 = vadd.f32 %v6896_v14, %v10747_v49  ;;  %v4376_v8 = vadd.f32 %v6899_v46, %v10761_v31  ;;  %v6972_v31 = vadd.f32 %v10907_v30, %v10903_v7 }
 0x2d4   : > { %v10955_v29 = vpop.f32.mrf.mxu1  ;;  %v10957_v60 = vpop.f32.mrf.mxu0  ;;  %v6975_v7 = vadd.f32 %v10921_v63, %v10912_v32  ;;  %v6926_v30 = vadd.f32 %v10931_v12, %v10927_v17  ;;  %v6984_v46 = vadd.f32 %v10939_v25, %v10935_v6 }
 0x2d5   : > { %11521 = vst [vmem:[#allocation35_spill] sm:$0xff] %v10957_v60  ;;  %v6960_v60 = vadd.f32 %v10874_v47, %v10868_v56  ;;  %v4478_v55 = vadd.f32 %v6966_v21, %v4381_v34  ;;  %v4384_v56 = vadd.f32 %v6905_v27, %v10780_v51  ;;  %v6990_v32 = vadd.f32 %v10955_v29, %v10951_v43 }
 0x2d6   : > { %v10961_v42 = vpop.f32.mrf.mxu1  ;;  %v10963_v50 = vpop.f32.mrf.mxu0  ;;  %v4413_v12 = vadd.f32 %v6926_v30, %v10824_v3  ;;  %v6923_v43 = vadd.f32 %v10925_v20, %v10923_v11 }
 0x2d7   : > { %11522 = vst [vmem:[#allocation11_spill] sm:$0xff] %v10963_v50  ;;  %v4470_v47 = vadd.f32 %v6960_v60, %v4373_v44  ;;  %v4481_v34 = vadd.f32 %v6969_v13, %v4384_v56  ;;  %v6978_v60 = vadd.f32 %v6977_v57, %v6976_v36  ;;  %v4389_v36 = vadd.f32 %v6908_v33, %v10786_v22  ;;  %v11526_v56 = vld [vmem:[#allocation18_spill] sm:$0xff] }
 0x2d8   : > { %v10968_v40 = vpop.f32.mrf.mxu1  ;;  %v10970_v48 = vpop.f32.mrf.mxu0  ;;  %v6981_v57 = vadd.f32 %v6980_v53, %v10929_v61  ;;  %v4392_v22 = vadd.f32 %v6911_v19, %v10790_v1  ;;  %v6920_v61 = vadd.f32 %v10919_v15, %v10909_v28  ;;  %v6929_v1 = vadd.f32 %v10937_v39, %v10933_v5  ;;  %v11525_v5 = vld [vmem:[#allocation21_spill] sm:$0xff] }
 0x2d9   : > { %11523 = vst [vmem:[#allocation43_spill] sm:$0xff] %v10970_v48  ;;  %v4486_v14 = vadd.f32 %v6972_v31, %v4389_v36  ;;  %v4510_v6 = vadd.f32 %v6990_v32, %v4413_v12  ;;  %v6987_v39 = vadd.f32 %v11525_v5, %v10943_v59  ;;  %v11538_v32 = vld [vmem:[#allocation27_spill] sm:$0xff] }
 0x2da   : > { %v10977_v24 = vpop.f32.mrf.mxu1  ;;  %v10981_v50 = vpop.f32.mrf.mxu0  ;;  %v4489_v17 = vadd.f32 %v6975_v7, %v4392_v22  ;;  %v4405_v13 = vadd.f32 %v6920_v61, %v10810_v9 }
 0x2db   : > { %11524 = vst [vmem:[#allocation34_spill] sm:$0xff] %v10981_v50  ;;  %v6914_v50 = vadd.f32 %v10899_v26, %v10895_v18  ;;  %v4473_v18 = vadd.f32 %v6963_v37, %v4376_v8  ;;  %v6917_v26 = vadd.f32 %v10905_v54, %v10901_v41  ;;  %v4416_v37 = vadd.f32 %v6929_v1, %v11526_v56  ;;  %v11530_v8 = vld [vmem:[#allocation22_spill] sm:$0xff] }
 0x2dc   : > { %v10986_v62 = vpop.f32.mrf.mxu1  ;;  %v7376_v0 = vpop.f32.mrf.mxu0  ;;  %v4502_v9 = vadd.f32 %v6984_v46, %v4405_v13 }
 0x2dd   : > { %v4575_v16 = vadd.f32 %v7376_v0, %v4478_v55  ;;  %v4397_v52 = vadd.f32 %v6914_v50, %v10796_v2  ;;  %v4400_v54 = vadd.f32 %v6917_v26, %v10800_v35  ;;  %v6993_v55 = vadd.f32 %v10968_v40, %v10961_v42  ;;  %v11529_v40 = vld [vmem:[#allocation17_spill] sm:$0xff]  ;;  %v11532_v26 = vld [vmem:[#allocation20_spill] sm:$0xff] }
 0x2de   : > { %v10993_v48 = vpop.f32.mrf.mxu1  ;;  %v4566_v49 = vpop.f32.mrf.mxu0  ;;  %v4408_v42 = vadd.f32 %v6923_v43, %v11529_v40  ;;  %v6996_v19 = vadd.f32 %v10986_v62, %v10977_v24 }
 0x2df   : > { %4631 = vst [vmem:[%s10996_s8 + $0x10] sm:$0xff] %v4575_v16  ;;  %v4567_v51 = vadd.f32 %v4566_v49, %v4470_v47  ;;  %v4494_v50 = vadd.f32 %v6978_v60, %v4397_v52  ;;  %v4497_v53 = vadd.f32 %v6981_v57, %v4400_v54  ;;  %v11527_v16 = vld [vmem:[#allocation35_spill] sm:$0xff] }
 0x2e0   : > { %v7377_v10 = vpop.f32.mrf.mxu0  ;;  %v11007_v58 = vpop.f32.mrf.mxu1  ;;  %v11528_v47 = vld [vmem:[#allocation11_spill] sm:$0xff]  ;;  %v4505_v31 = vadd.f32 %v6987_v39, %v4408_v42 }
 0x2e1   : > { %4629 = vst [vmem:[%s10996_s8] sm:$0xff] %v4567_v51  ;;  %v4578_v38 = vadd.f32 %v7377_v10, %v4481_v34  ;;  %v6938_v11 = vadd.f32 %v11528_v47, %v11527_v16  ;;  %v11531_v51 = vld [vmem:[#allocation29_spill] sm:$0xff]  ;;  %v11540_v16 = vld [vmem:[#allocation44_spill] sm:$0xff] }
 0x2e2   : > { %v4569_v21 = vpop.f32.mrf.mxu0  ;;  %v6932_v34 = vadd.f32 %v11531_v51, %v11530_v8  ;;  %v11534_v36 = vld [vmem:[#allocation34_spill] sm:$0xff] }
 0x2e3   : > { %4632 = vst [vmem:[%s10996_s8 + $0x18] sm:$0xff] %v4578_v38  ;;  %v4570_v45 = vadd.f32 %v4569_v21, %v4473_v18  ;;  %v4513_v38 = vadd.f32 %v6993_v55, %v4416_v37  ;;  %v4429_v21 = vadd.f32 %v6938_v11, %v11532_v26 }
 0x2e4   : > { %v7380_v41 = vpop.f32.mrf.mxu0 }
 0x2e5   : > { %v7000_v2 = vpop.f32.mrf.mxu1  ;;  %4630 = vst [vmem:[%s10996_s8 + $0x8] sm:$0xff] %v4570_v45  ;;  %v4591_v23 = vadd.f32 %v7380_v41, %v4494_v50  ;;  %v11533_v45 = vld [vmem:[#allocation43_spill] sm:$0xff] }
 0x2e6   : > { %v4582_v27 = vpop.f32.mrf.mxu0  ;;  %v6941_v57 = vadd.f32 %v11534_v36, %v11533_v45 }
 0x2e7   : > { %v7001_v4 = vpop.f32.mrf.mxu1  ;;  %4635 = vst [vmem:[%s10996_s8 + $0x30] sm:$0xff] %v4591_v23  ;;  %v4583_v63 = vadd.f32 %v4582_v27, %v4486_v14  ;;  %v11536_v23 = vld [vmem:[#allocation12_spill] sm:$0xff] }
 0x2e8   : > { %v7381_v44 = vpop.f32.mrf.mxu0  ;;  %v7002_v10 = vadd.f32 %v7001_v4, %v7000_v2  ;;  %v11535_v2 = vld [vmem:[#allocation9_spill] sm:$0xff]  ;;  %v11537_v4 = vld [vmem:[#allocation36_spill] sm:$0xff] }
 0x2e9   : > { %v7003_v35 = vpop.f32.mrf.mxu1  ;;  %4633 = vst [vmem:[%s10996_s8 + $0x20] sm:$0xff] %v4583_v63  ;;  %v4594_v28 = vadd.f32 %v7381_v44, %v4497_v53  ;;  %v4421_v41 = vadd.f32 %v6932_v34, %v11535_v2  ;;  %v6935_v14 = vadd.f32 %v11537_v4, %v11536_v23  ;;  %v4432_v63 = vadd.f32 %v6941_v57, %v11538_v32 }
 0x2ea   : > { %v4585_v29 = vpop.f32.mrf.mxu0  ;;  %v4526_v61 = vadd.f32 %v7002_v10, %v4429_v21  ;;  %v6999_v53 = vadd.f32 %v11007_v58, %v10993_v48 }
 0x2eb   : > { %v7004_v15 = vpop.f32.mrf.mxu1  ;;  %4636 = vst [vmem:[%s10996_s8 + $0x38] sm:$0xff] %v4594_v28  ;;  %v4586_v3 = vadd.f32 %v4585_v29, %v4489_v17  ;;  %v4518_v17 = vadd.f32 %v6996_v19, %v4421_v41  ;;  %v11539_v28 = vld [vmem:[#allocation23_spill] sm:$0xff] }
 0x2ec   : > { %v7384_v0 = vpop.f32.mrf.mxu0  ;;  %v7005_v22 = vadd.f32 %v7004_v15, %v7003_v35  ;;  %v4424_v35 = vadd.f32 %v6935_v14, %v11539_v28 }
 0x2ed   : > { %v7038_v25 = vpop.f32.mrf.mxu1  ;;  %4634 = vst [vmem:[%s10996_s8 + $0x28] sm:$0xff] %v4586_v3  ;;  %v4607_v20 = vadd.f32 %v7384_v0, %v4510_v6 }
 0x2ee   : > { %v4598_v33 = vpop.f32.mrf.mxu0  ;;  %v4529_v43 = vadd.f32 %v7005_v22, %v4432_v63  ;;  %v4521_v3 = vadd.f32 %v6999_v53, %v4424_v35 }
 0x2ef   : > { %v7039_v49 = vpop.f32.mrf.mxu1  ;;  %4639 = vst [vmem:[%s10996_s8 + $0x50] sm:$0xff] %v4607_v20  ;;  %v4599_v59 = vadd.f32 %v4598_v33, %v4502_v9 }
 0x2f0   : > { %v7040_v60 = vadd.f32 %v7039_v49, %v7038_v25  ;;  %v7385_v52 = vpop.f32.mrf.mxu0 }
 0x2f1   : > { %v7041_v18 = vpop.f32.mrf.mxu1  ;;  %4637 = vst [vmem:[%s10996_s8 + $0x40] sm:$0xff] %v4599_v59  ;;  %v4610_v50 = vadd.f32 %v7385_v52, %v4513_v38 }
 0x2f2   : > { %v4601_v54 = vpop.f32.mrf.mxu0  ;;  %v5221_v47 = vadd.f32 %v7040_v60, %v11540_v16 }
 0x2f3   : > { %v7042_v7 = vpop.f32.mrf.mxu1  ;;  %4640 = vst [vmem:[%s10996_s8 + $0x58] sm:$0xff] %v4610_v50  ;;  %v4602_v27 = vadd.f32 %v4601_v54, %v4505_v31 }
 0x2f4   : > { %v7043_v30 = vadd.f32 %v7042_v7, %v7041_v18  ;;  %v7388_v62 = vpop.f32.mrf.mxu0 }
 0x2f5   : > { %v7044_v24 = vpop.f32.mrf.mxu1  ;;  %4638 = vst [vmem:[%s10996_s8 + $0x48] sm:$0xff] %v4602_v27  ;;  %v4623_v44 = vadd.f32 %v7388_v62, %v4526_v61 }
 0x2f6   : > { %v4614_v46 = vpop.f32.mrf.mxu0  ;;  %v5224_v51 = vadd.f32 %v7043_v30, %v11540_v16 }
 0x2f7   : > { %v7045_v12 = vpop.f32.mrf.mxu1  ;;  %4643 = vst [vmem:[%s10996_s8 + $0x70] sm:$0xff] %v4623_v44  ;;  %v4615_v15 = vadd.f32 %v4614_v46, %v4518_v17 }
 0x2f8   : > { %v7046_v1 = vadd.f32 %v7045_v12, %v7044_v24  ;;  %v7389_v13 = vpop.f32.mrf.mxu0 }
 0x2f9   : > { %v7047_v29 = vpop.f32.mrf.mxu1  ;;  %4641 = vst [vmem:[%s10996_s8 + $0x60] sm:$0xff] %v4615_v15  ;;  %v4626_v55 = vadd.f32 %v7389_v13, %v4529_v43 }
 0x2fa   : > { %v4617_v48 = vpop.f32.mrf.mxu0  ;;  %v5229_v60 = vadd.f32 %v7046_v1, %v11540_v16 }
 0x2fb   : > { %v7048_v6 = vpop.f32.mrf.mxu1  ;;  %4644 = vst [vmem:[%s10996_s8 + $0x78] sm:$0xff] %v4626_v55  ;;  %v4618_v25 = vadd.f32 %v4617_v48, %v4521_v3 }
 0x2fc   : > { %v7049_v58 = vadd.f32 %v7048_v6, %v7047_v29 }
 0x2fd   : > { %v7050_v5 = vpop.f32.mrf.mxu1  ;;  %v7102_v39 = vpop.f32.mrf.mxu0  ;;  %4642 = vst [vmem:[%s10996_s8 + $0x68] sm:$0xff] %v4618_v25 }
 0x2fe   : > { %v5232_v50 = vadd.f32 %v7049_v58, %v11540_v16 }
 0x2ff   : > { %v7051_v0 = vpop.f32.mrf.mxu1  ;;  %v7103_v37 = vpop.f32.mrf.mxu0 }
 0x300   : > { %v7052_v56 = vadd.f32 %v7051_v0, %v7050_v5  ;;  %v7104_v11 = vadd.f32 %v7103_v37, %v7102_v39 }
 0x301   : > { %v7053_v20 = vpop.f32.mrf.mxu1  ;;  %v7105_v9 = vpop.f32.mrf.mxu0 }
 0x302   : > { %v11068_v49 = vadd.f32 %v7104_v11, %v5221_v47  ;;  %v5237_v14 = vadd.f32 %v7052_v56, %v11540_v16  ;;  %v11094_v11 = vld [vmem:[%s11327_s4] ss:$0 sm:$0xff] }
 0x303   : > { %v7054_v40 = vpop.f32.mrf.mxu1  ;;  %v7106_v8 = vpop.f32.mrf.mxu0  ;;  %11541 = vst [vmem:[#allocation39_spill] sm:$0xff] %v11094_v11 }
 0x304   : > { %v7055_v42 = vadd.f32 %v7054_v40, %v7053_v20  ;;  %v7107_v34 = vadd.f32 %v7106_v8, %v7105_v9 }
 0x305   : > { %v7056_v33 = vpop.f32.mrf.mxu1  ;;  %v7108_v10 = vpop.f32.mrf.mxu0 }
 0x306   : > { %v11071_v59 = vadd.f32 %v7107_v34, %v5224_v51  ;;  %v5240_v53 = vadd.f32 %v7055_v42, %v11540_v16 }
 0x307   : > { %v7057_v38 = vpop.f32.mrf.mxu1  ;;  %v7109_v52 = vpop.f32.mrf.mxu0 }
 0x308   : > { %v7058_v18 = vadd.f32 %v7057_v38, %v7056_v33  ;;  %v7110_v31 = vadd.f32 %v7109_v52, %v7108_v10 }
 0x309   : > { %v7059_v26 = vpop.f32.mrf.mxu1  ;;  %v7111_v21 = vpop.f32.mrf.mxu0 }
 0x30a   : > { %v11074_v19 = vadd.f32 %v7110_v31, %v5229_v60  ;;  %v5245_v15 = vadd.f32 %v7058_v18, %v11540_v16 }
 0x30b   : > { %v7060_v45 = vpop.f32.mrf.mxu1  ;;  %v7112_v57 = vpop.f32.mrf.mxu0 }
 0x30c   : > { %v7061_v36 = vadd.f32 %v7060_v45, %v7059_v26  ;;  %v7113_v7 = vadd.f32 %v7112_v57, %v7111_v21 }
 0x30d   : > { %v7062_v2 = vpop.f32.mrf.mxu1  ;;  %v7114_v41 = vpop.f32.mrf.mxu0 }
 0x30e   : > { %v11077_v54 = vadd.f32 %v7113_v7, %v5232_v50  ;;  %v5248_v58 = vadd.f32 %v7061_v36, %v11540_v16 }
 0x30f   : > { %v7063_v30 = vpop.f32.mrf.mxu1  ;;  %v7115_v4 = vpop.f32.mrf.mxu0 }
 0x310   : > { %v7064_v23 = vadd.f32 %v7063_v30, %v7062_v2  ;;  %v7116_v22 = vadd.f32 %v7115_v4, %v7114_v41 }
 0x311   : > { %v7065_v27 = vpop.f32.mrf.mxu1  ;;  %v7117_v61 = vpop.f32.mrf.mxu0 }
 0x312   : > { %v11080_v24 = vadd.f32 %v7116_v22, %v5237_v14  ;;  %v5253_v20 = vadd.f32 %v11094_v11, %v7064_v23 }
 0x313   : > { %v7066_v62 = vpop.f32.mrf.mxu1  ;;  %v7118_v63 = vpop.f32.mrf.mxu0 }
 0x314   : > { %v7067_v32 = vadd.f32 %v7066_v62, %v7065_v27  ;;  %v7119_v44 = vadd.f32 %v7118_v63, %v7117_v61 }
 0x315   : > { %v7068_v17 = vpop.f32.mrf.mxu1  ;;  %v7120_v12 = vpop.f32.mrf.mxu0 }
 0x316   : > { %v11083_v46 = vadd.f32 %v7119_v44, %v5240_v53  ;;  %v5256_v33 = vadd.f32 %v11094_v11, %v7067_v32 }
 0x317   : > { %v7069_v1 = vpop.f32.mrf.mxu1  ;;  %v7121_v35 = vpop.f32.mrf.mxu0 }
 0x318   : > { %v7070_v28 = vadd.f32 %v7069_v1, %v7068_v17  ;;  %v7122_v43 = vadd.f32 %v7121_v35, %v7120_v12 }
 0x319   : > { %v7071_v29 = vpop.f32.mrf.mxu1  ;;  %v7123_v13 = vpop.f32.mrf.mxu0 }
 0x31a   : > { %v11086_v55 = vadd.f32 %v7122_v43, %v5245_v15  ;;  %v5261_v21 = vadd.f32 %v11094_v11, %v7070_v28 }
 0x31b   : > { %v7072_v3 = vpop.f32.mrf.mxu1  ;;  %v7124_v48 = vpop.f32.mrf.mxu0 }
 0x31c   : > { %v7073_v6 = vadd.f32 %v7072_v3, %v7071_v29  ;;  %v7125_v25 = vadd.f32 %v7124_v48, %v7123_v13 }
 0x31d   : > { %v7074_v5 = vpop.f32.mrf.mxu1  ;;  %v7126_v39 = vpop.f32.mrf.mxu0 }
 0x31e   : > { %v11089_v0 = vadd.f32 %v7125_v25, %v5248_v58  ;;  %v5264_v30 = vadd.f32 %v11094_v11, %v7073_v6 }
 0x31f   : > { %v7075_v56 = vpop.f32.mrf.mxu1  ;;  %v7127_v47 = vpop.f32.mrf.mxu0 }
 0x320   : > { %v7076_v37 = vadd.f32 %v7075_v56, %v7074_v5  ;;  %v7128_v9 = vadd.f32 %v7127_v47, %v7126_v39 }
 0x321   : > { %v7077_v40 = vpop.f32.mrf.mxu1  ;;  %v7129_v42 = vpop.f32.mrf.mxu0 }
 0x322   : > { %v11097_v8 = vadd.f32 %v7128_v9, %v5253_v20  ;;  %v5269_v62 = vadd.f32 %v11094_v11, %v7076_v37 }
 0x323   : > { %v7078_v16 = vpop.f32.mrf.mxu1  ;;  %v7130_v34 = vpop.f32.mrf.mxu0 }
 0x324   : > { %11542 = vst [vmem:[#allocation32_spill] sm:$0xff] %v11097_v8  ;;  %v7079_v51 = vadd.f32 %v7078_v16, %v7077_v40  ;;  %v7131_v10 = vadd.f32 %v7130_v34, %v7129_v42 }
 0x325   : > { %v7080_v38 = vpop.f32.mrf.mxu1  ;;  %v7132_v18 = vpop.f32.mrf.mxu0 }
 0x326   : > { %v11100_v52 = vadd.f32 %v7131_v10, %v5256_v33  ;;  %v5272_v1 = vadd.f32 %v11094_v11, %v7079_v51 }
 0x327   : > { %v7081_v60 = vpop.f32.mrf.mxu1  ;;  %v7133_v26 = vpop.f32.mrf.mxu0 }
 0x328   : > { %11543 = vst [vmem:[#allocation26_spill] sm:$0xff] %v11100_v52  ;;  %v11102_v31 = vadd.f32 %v7081_v60, %v7080_v38  ;;  %v7134_v45 = vadd.f32 %v7133_v26, %v7132_v18 }
 0x329   : > { %v7083_v36 = vpop.f32.mrf.mxu1  ;;  %v7135_v57 = vpop.f32.mrf.mxu0 }
 0x32a   : > { %11544 = vst [vmem:[#allocation10_spill] sm:$0xff] %v11102_v31  ;;  %v11105_v50 = vadd.f32 %v7134_v45, %v5261_v21 }
 0x32b   : > { %v7084_v7 = vpop.f32.mrf.mxu1  ;;  %v7136_v41 = vpop.f32.mrf.mxu0 }
 0x32c   : > { %v11107_v2 = vadd.f32 %v7084_v7, %v7083_v36  ;;  %v7137_v23 = vadd.f32 %v7136_v41, %v7135_v57 }
 0x32d   : > { %v11110_v4 = vpop.f32.mrf.mxu1  ;;  %v7138_v14 = vpop.f32.mrf.mxu0 }
 0x32e   : > { %11545 = vst [vmem:[#allocation24_spill] sm:$0xff] %v11107_v2  ;;  %v11112_v22 = vadd.f32 %v7137_v23, %v5264_v30 }
 0x32f   : > { %v11114_v27 = vpop.f32.mrf.mxu1  ;;  %v7139_v61 = vpop.f32.mrf.mxu0 }
 0x330   : > { %11546 = vst [vmem:[#allocation15_spill] sm:$0xff] %v11112_v22  ;;  %v7140_v32 = vadd.f32 %v7139_v61, %v7138_v14 }
 0x331   : > { %v11117_v63 = vpop.f32.mrf.mxu1  ;;  %v7141_v53 = vpop.f32.mrf.mxu0 }
 0x332   : > { %v11119_v44 = vadd.f32 %v7140_v32, %v5269_v62 }
 0x333   : > { %v11121_v17 = vpop.f32.mrf.mxu1  ;;  %v7142_v12 = vpop.f32.mrf.mxu0 }
 0x334   : > { %11547 = vst [vmem:[#allocation38_spill] sm:$0xff] %v11119_v44  ;;  %v7143_v28 = vadd.f32 %v7142_v12, %v7141_v53 }
 0x335   : > { %v7172_v35 = vpop.f32.mrf.mxu1  ;;  %v11124_v15 = vpop.f32.mrf.mxu0 }
 0x336   : > { %v11126_v43 = vadd.f32 %v7143_v28, %v5272_v1 }
 0x337   : > { %v7173_v29 = vpop.f32.mrf.mxu1  ;;  %v11128_v13 = vpop.f32.mrf.mxu0 }
 0x338   : > { %11548 = vst [vmem:[#allocation13_spill] sm:$0xff] %v11126_v43  ;;  %v7174_v22 = vadd.f32 %v7173_v29, %v7172_v35 }
 0x339   : > { %v7175_v3 = vpop.f32.mrf.mxu1  ;;  %v11130_v6 = vpop.f32.mrf.mxu0 }
 0x33a   : > { %11549 = vst [vmem:[#allocation14_spill] sm:$0xff] %v11130_v6 }
 0x33b   : > { %v7176_v48 = vpop.f32.mrf.mxu1  ;;  %v11132_v58 = vpop.f32.mrf.mxu0 }
 0x33c   : > { %11550 = vst [vmem:[#allocation41_spill] sm:$0xff] %v11132_v58 }
 0x33d   : > { %v11134_v25 = vpop.f32.mrf.mxu1  ;;  %v7230_v5 = vpop.f32.mrf.mxu0 }
 0x33f   : > { %v11136_v39 = vpop.f32.mrf.mxu1  ;;  %v7231_v56 = vpop.f32.mrf.mxu0 }
 0x341   : > { %v11138_v37 = vpop.f32.mrf.mxu1  ;;  %v7233_v47 = vpop.f32.mrf.mxu0 }
 0x343   : > { %v11140_v20 = vpop.f32.mrf.mxu1  ;;  %v7234_v9 = vpop.f32.mrf.mxu0 }
 0x345   : > { %v7184_v40 = vpop.f32.mrf.mxu1  ;;  %v7236_v42 = vpop.f32.mrf.mxu0 }
 0x347   : > { %v7185_v16 = vpop.f32.mrf.mxu1  ;;  %v7237_v51 = vpop.f32.mrf.mxu0 }
 0x349   : > { %v11142_v34 = vpop.f32.mrf.mxu1  ;;  %v7239_v33 = vpop.f32.mrf.mxu0 }
 0x34b   : > { %v7188_v10 = vpop.f32.mrf.mxu1  ;;  %v7240_v38 = vpop.f32.mrf.mxu0 }
 0x34d   : > { %v11144_v18 = vpop.f32.mrf.mxu1  ;;  %v7242_v60 = vpop.f32.mrf.mxu0 }
 0x34f   : > { %v11146_v26 = vpop.f32.mrf.mxu1  ;;  %v7243_v21 = vpop.f32.mrf.mxu0 }
 0x351   : > { %v11148_v45 = vpop.f32.mrf.mxu1  ;;  %v11150_v36 = vpop.f32.mrf.mxu0 }
 0x352   : > { %11551 = vst [vmem:[#allocation37_spill] sm:$0xff] %v11148_v45  ;;  %v7232_v45 = vadd.f32 %v7231_v56, %v7230_v5  ;;  %v7180_v5 = vadd.f32 %v11136_v39, %v11134_v25  ;;  %v7183_v25 = vadd.f32 %v11140_v20, %v11138_v37 }
 0x353   : > { %v11152_v57 = vpop.f32.mrf.mxu1  ;;  %v11154_v7 = vpop.f32.mrf.mxu0 }
 0x354   : > { %11552 = vst [vmem:[#allocation40_spill] sm:$0xff] %v11152_v57 }
 0x355   : > { %v11156_v41 = vpop.f32.mrf.mxu1  ;;  %v7248_v30 = vpop.f32.mrf.mxu0 }
 0x357   : > { %v11158_v23 = vpop.f32.mrf.mxu1  ;;  %v7249_v14 = vpop.f32.mrf.mxu0 }
 0x359   : > { %v11160_v61 = vpop.f32.mrf.mxu1  ;;  %v7251_v62 = vpop.f32.mrf.mxu0 }
 0x35b   : > { %v11162_v32 = vpop.f32.mrf.mxu1  ;;  %v7252_v53 = vpop.f32.mrf.mxu0 }
 0x35d   : > { %v11164_v12 = vpop.f32.mrf.mxu1  ;;  %v11166_v1 = vpop.f32.mrf.mxu0 }
 0x35e   : > { %11553 = vst [vmem:[#allocation16_spill] sm:$0xff] %v11164_v12  ;;  %v7168_v12 = vadd.f32 %v11114_v27, %v11110_v4 }
 0x35f   : > { %v11168_v28 = vpop.f32.mrf.mxu1  ;;  %v11170_v43 = vpop.f32.mrf.mxu0 }
 0x360   : > { %11554 = vst [vmem:[#allocation42_spill] sm:$0xff] %v11168_v28  ;;  %v7238_v28 = vadd.f32 %v7237_v51, %v7236_v42  ;;  %v5415_v29 = vadd.f32 %v7168_v12, %v11068_v49  ;;  %v7235_v42 = vadd.f32 %v7234_v9, %v7233_v47  ;;  %v7250_v49 = vadd.f32 %v7249_v14, %v7248_v30 }
 0x361   : > { %v11172_v44 = vpop.f32.mrf.mxu1  ;;  %v11174_v2 = vpop.f32.mrf.mxu0  ;;  %v7192_v14 = vadd.f32 %v11146_v26, %v11144_v18  ;;  %v11562_v18 = vld [vmem:[#allocation40_spill] sm:$0xff] }
 0x362   : > { %11555 = vst [vmem:[#allocation25_spill] sm:$0xff] %v11172_v44  ;;  %11556 = vst [vmem:[#allocation31_spill] sm:$0xff] %v11174_v2  ;;  %v5423_v44 = vadd.f32 %v7174_v22, %v11074_v19  ;;  %v7177_v2 = vadd.f32 %v7176_v48, %v7175_v3  ;;  %v7186_v19 = vadd.f32 %v7185_v16, %v7184_v40 }
 0x363   : > { %v11176_v52 = vpop.f32.mrf.mxu1  ;;  %v11178_v58 = vpop.f32.mrf.mxu0  ;;  %v5512_v48 = vadd.f32 %v7232_v45, %v5415_v29  ;;  %v7189_v40 = vadd.f32 %v7188_v10, %v11142_v34  ;;  %v7244_v16 = vadd.f32 %v7243_v21, %v7242_v60  ;;  %v7247_v34 = vadd.f32 %v11154_v7, %v11150_v36 }
 0x364   : > { %11557 = vst [vmem:[#allocation30_spill] sm:$0xff] %v11176_v52  ;;  %v5520_v27 = vadd.f32 %v7238_v28, %v5423_v44  ;;  %v5439_v9 = vadd.f32 %v7186_v19, %v11086_v55  ;;  %v7198_v21 = vadd.f32 %v11158_v23, %v11156_v41  ;;  %v7201_v23 = vadd.f32 %v11162_v32, %v11160_v61  ;;  %v11564_v32 = vld [vmem:[#allocation10_spill] sm:$0xff]  ;;  %v11565_v19 = vld [vmem:[#allocation39_spill] sm:$0xff] }
 0x365   : > { %v11180_v6 = vpop.f32.mrf.mxu1  ;;  %v7260_v11 = vpop.f32.mrf.mxu0  ;;  %v5442_v60 = vadd.f32 %v7189_v40, %v11089_v0  ;;  %v11573_v40 = vld [vmem:[#allocation16_spill] sm:$0xff] }
 0x366   : > { %11558 = vst [vmem:[#allocation19_spill] sm:$0xff] %v11180_v6  ;;  %v7171_v6 = vadd.f32 %v11121_v17, %v11117_v63  ;;  %v5536_v45 = vadd.f32 %v7250_v49, %v5439_v9  ;;  %v5455_v41 = vadd.f32 %v7198_v21, %v11105_v50 }
 0x367   : > { %v11182_v31 = vpop.f32.mrf.mxu1  ;;  %v7261_v8 = vpop.f32.mrf.mxu0 }
 0x368   : > { %11559 = vst [vmem:[#allocation33_spill] sm:$0xff] %v11182_v31  ;;  %v7241_v31 = vadd.f32 %v7240_v38, %v7239_v33  ;;  %v5418_v63 = vadd.f32 %v7171_v6, %v11071_v59  ;;  %v5431_v33 = vadd.f32 %v7180_v5, %v11080_v24  ;;  %v7253_v38 = vadd.f32 %v7252_v53, %v7251_v62 }
 0x369   : > { %v11186_v57 = vpop.f32.mrf.mxu1  ;;  %v11189_v52 = vpop.f32.mrf.mxu0  ;;  %v7262_v62 = vadd.f32 %v7261_v8, %v7260_v11  ;;  %v7146_v11 = vadd.f32 %v11128_v13, %v11124_v15  ;;  %v11561_v8 = vld [vmem:[#allocation37_spill] sm:$0xff]  ;;  %v11567_v13 = vld [vmem:[#allocation15_spill] sm:$0xff] }
 0x36a   : > { %11560 = vst [vmem:[#allocation28_spill] sm:$0xff] %v11186_v57  ;;  %v5426_v57 = vadd.f32 %v7177_v2, %v11077_v54  ;;  %v5515_v2 = vadd.f32 %v7235_v42, %v5418_v63  ;;  %v5528_v20 = vadd.f32 %v7244_v16, %v5431_v33  ;;  %v5539_v7 = vadd.f32 %v7253_v38, %v5442_v60  ;;  %v11574_v16 = vld [vmem:[#allocation42_spill] sm:$0xff] }
 0x36b   : > { %v11193_v35 = vpop.f32.mrf.mxu1  ;;  %v7264_v4 = vpop.f32.mrf.mxu0  ;;  %v7195_v26 = vadd.f32 %v11562_v18, %v11561_v8  ;;  %v5552_v61 = vadd.f32 %v7262_v62, %v5455_v41  ;;  %v5458_v63 = vadd.f32 %v7201_v23, %v11567_v13  ;;  %v11580_v8 = vld [vmem:[#allocation13_spill] sm:$0xff] }
 0x36c   : > { %v5523_v47 = vadd.f32 %v7241_v31, %v5426_v57  ;;  %v5434_v57 = vadd.f32 %v7183_v25, %v11083_v46  ;;  %v7256_v46 = vadd.f32 %v11170_v43, %v11166_v1  ;;  %v7265_v50 = vadd.f32 %v7264_v4, %v11189_v52  ;;  %v11566_v1 = vld [vmem:[#allocation31_spill] sm:$0xff]  ;;  %v11570_v4 = vld [vmem:[#allocation14_spill] sm:$0xff] }
 0x36d   : > { %v7408_v51 = vpop.f32.mrf.mxu1  ;;  %v11197_v22 = vpop.f32.mrf.mxu0  ;;  %v5277_v43 = vadd.f32 %v11565_v19, %v11564_v32 }
 0x36e   : > { %v5617_v3 = vadd.f32 %v7408_v51, %v5520_v27  ;;  %v5531_v12 = vadd.f32 %v7247_v34, %v5434_v57  ;;  %v11563_v27 = vld [vmem:[#allocation32_spill] sm:$0xff]  ;;  %v5555_v38 = vadd.f32 %v7265_v50, %v5458_v63 }
 0x36f   : > { %v5608_v17 = vpop.f32.mrf.mxu1  ;;  %v11203_v44 = vpop.f32.mrf.mxu0  ;;  %v5447_v42 = vadd.f32 %v7192_v14, %v11563_v27  ;;  %v11569_v5 = vld [vmem:[#allocation33_spill] sm:$0xff]  ;;  %v5374_v25 = vadd.f32 %v7146_v11, %v5277_v43  ;;  %v11577_v14 = vld [vmem:[#allocation38_spill] sm:$0xff] }
 0x370   : > { %6154 = vst [vmem:[%s10996_s8 + $0x90] sm:$0xff] %v5617_v3  ;;  %v5609_v56 = vadd.f32 %v5608_v17, %v5512_v48  ;;  %v7259_v3 = vadd.f32 %v11178_v58, %v11566_v1  ;;  %v11568_v17 = vld [vmem:[#allocation19_spill] sm:$0xff]  ;;  %v7268_v57 = vadd.f32 %v11203_v44, %v11197_v22 }
 0x371   : > { %v7409_v54 = vpop.f32.mrf.mxu1  ;;  %v11208_v59 = vpop.f32.mrf.mxu0  ;;  %v7210_v49 = vadd.f32 %v11569_v5, %v11568_v17  ;;  %v5544_v52 = vadd.f32 %v7256_v46, %v5447_v42 }
 0x372   : > { %6152 = vst [vmem:[%s10996_s8 + $0x80] sm:$0xff] %v5609_v56  ;;  %v5620_v6 = vadd.f32 %v7409_v54, %v5523_v47  ;;  %v11571_v47 = vld [vmem:[#allocation41_spill] sm:$0xff] }
 0x373   : > { %v5611_v39 = vpop.f32.mrf.mxu1  ;;  %v11214_v31 = vpop.f32.mrf.mxu0  ;;  %v7149_v54 = vadd.f32 %v11571_v47, %v11570_v4  ;;  %v5471_v21 = vadd.f32 %v7210_v49, %v5374_v25 }
 0x374   : > { %6155 = vst [vmem:[%s10996_s8 + $0x98] sm:$0xff] %v5620_v6  ;;  %v5612_v55 = vadd.f32 %v5611_v39, %v5515_v2  ;;  %v11572_v2 = vld [vmem:[#allocation26_spill] sm:$0xff]  ;;  %v7204_v6 = vadd.f32 %v11574_v16, %v11573_v40  ;;  %v7271_v22 = vadd.f32 %v11214_v31, %v11208_v59 }
 0x375   : > { %v7412_v10 = vpop.f32.mrf.mxu1  ;;  %v7272_v37 = vpop.f32.mrf.mxu0  ;;  %v5450_v9 = vadd.f32 %v7195_v26, %v11572_v2 }
 0x376   : > { %6153 = vst [vmem:[%s10996_s8 + $0x88] sm:$0xff] %v5612_v55  ;;  %v5633_v24 = vadd.f32 %v7412_v10, %v5536_v45  ;;  %v11575_v55 = vld [vmem:[#allocation24_spill] sm:$0xff]  ;;  %v5463_v62 = vadd.f32 %v7204_v6, %v11577_v14 }
 0x377   : > { %v5624_v30 = vpop.f32.mrf.mxu1  ;;  %v7273_v0 = vpop.f32.mrf.mxu0  ;;  %v5280_v45 = vadd.f32 %v11565_v19, %v11575_v55  ;;  %v5547_v60 = vadd.f32 %v7259_v3, %v5450_v9 }
 0x378   : > { %6158 = vst [vmem:[%s10996_s8 + $0xb0] sm:$0xff] %v5633_v24  ;;  %v5625_v36 = vadd.f32 %v5624_v30, %v5528_v20  ;;  %v7274_v39 = vadd.f32 %v7273_v0, %v7272_v37  ;;  %v11576_v24 = vld [vmem:[#allocation28_spill] sm:$0xff]  ;;  %v11579_v0 = vld [vmem:[#allocation30_spill] sm:$0xff] }
 0x379   : > { %v7413_v53 = vpop.f32.mrf.mxu1  ;;  %v7275_v48 = vpop.f32.mrf.mxu0  ;;  %v7213_v20 = vadd.f32 %v11193_v35, %v11576_v24  ;;  %v5377_v30 = vadd.f32 %v7149_v54, %v5280_v45 }
 0x37a   : > { %6156 = vst [vmem:[%s10996_s8 + $0xa0] sm:$0xff] %v5625_v36  ;;  %v5636_v28 = vadd.f32 %v7413_v53, %v5539_v7  ;;  %v11578_v7 = vld [vmem:[#allocation25_spill] sm:$0xff]  ;;  %v5568_v35 = vadd.f32 %v7274_v39, %v5471_v21 }
 0x37b   : > { %v5627_v29 = vpop.f32.mrf.mxu1  ;;  %v7276_v34 = vpop.f32.mrf.mxu0  ;;  %v7207_v53 = vadd.f32 %v11579_v0, %v11578_v7  ;;  %v5474_v46 = vadd.f32 %v7213_v20, %v5377_v30 }
 0x37c   : > { %6159 = vst [vmem:[%s10996_s8 + $0xb8] sm:$0xff] %v5636_v28  ;;  %v5628_v51 = vadd.f32 %v5627_v29, %v5531_v12  ;;  %v7277_v12 = vadd.f32 %v7276_v34, %v7275_v48  ;;  %v5560_v28 = vadd.f32 %v7268_v57, %v5463_v62 }
 0x37d   : > { %v7416_v15 = vpop.f32.mrf.mxu1  ;;  %v5466_v18 = vadd.f32 %v7207_v53, %v11580_v8 }
 0x37e   : > { %6157 = vst [vmem:[%s10996_s8 + $0xa8] sm:$0xff] %v5628_v51  ;;  %v5649_v56 = vadd.f32 %v7416_v15, %v5552_v61  ;;  %v5571_v29 = vadd.f32 %v7277_v12, %v5474_v46 }
 0x37f   : > { %v5640_v58 = vpop.f32.mrf.mxu1  ;;  %v5563_v50 = vadd.f32 %v7271_v22, %v5466_v18 }
 0x380   : > { %6162 = vst [vmem:[%s10996_s8 + $0xd0] sm:$0xff] %v5649_v56  ;;  %v5641_v33 = vadd.f32 %v5640_v58, %v5544_v52 }
 0x381   : > { %v7417_v10 = vpop.f32.mrf.mxu1 }
 0x382   : > { %6160 = vst [vmem:[%s10996_s8 + $0xc0] sm:$0xff] %v5641_v33  ;;  %v5652_v37 = vadd.f32 %v7417_v10, %v5555_v38 }
 0x383   : > { %v5643_v36 = vpop.f32.mrf.mxu1 }
 0x384   : > { %6163 = vst [vmem:[%s10996_s8 + $0xd8] sm:$0xff] %v5652_v37  ;;  %v5644_v41 = vadd.f32 %v5643_v36, %v5547_v60 }
 0x385   : > { %v7420_v23 = vpop.f32.mrf.mxu1 }
 0x386   : > { %6161 = vst [vmem:[%s10996_s8 + $0xc8] sm:$0xff] %v5644_v41  ;;  %v5665_v44 = vadd.f32 %v7420_v23, %v5568_v35 }
 0x387   : > { %v5656_v11 = vpop.f32.mrf.mxu1 }
 0x388   : > { %6166 = vst [vmem:[%s10996_s8 + $0xf0] sm:$0xff] %v5665_v44  ;;  %v5657_v26 = vadd.f32 %v5656_v11, %v5560_v28 }
 0x389   : > { %v7421_v27 = vpop.f32.mrf.mxu1 }
 0x38a   : > { %6164 = vst [vmem:[%s10996_s8 + $0xe0] sm:$0xff] %v5657_v26  ;;  %v5668_v42 = vadd.f32 %v7421_v27, %v5571_v29 }
 0x38b   : > { %v5659_v59 = vpop.f32.mrf.mxu1 }
 0x38c   : > { %6167 = vst [vmem:[%s10996_s8 + $0xf8] sm:$0xff] %v5668_v42  ;;  %v5660_v31 = vadd.f32 %v5659_v59, %v5563_v50 }
 0x38e   : > { %6165 = vst [vmem:[%s10996_s8 + $0xe8] sm:$0xff] %v5660_v31 }
 0x38f   : > { %7848 = shalt.err (!%p7845_p0)
}
 0x390   : > { %s7849_s26 = scalar_lea.hbm %s11275_s16, 4096  ;;  %s7853_s7 = scalar_lea.hbm %s11328_s5, 8192 }
 0x391   : > { %p7850_p1 = scmp.ne.s32.totalorder %s11275_s16, %s7849_s26  ;;  %p7854_p4 = scmp.lt.s32.totalorder %s11275_s16, %s11328_s5 }
 0x392   : > { %p7855_p7 = scmp.lt.s32.totalorder %s7853_s7, %s7849_s26 }
 0x393   : > { %p7851_p2 = pnand %p7850_p1, %p7976_p5 }
 0x394   : > { %p7856_p6 = por %p7855_p7, %p7854_p4 }
 0x395   : > { %p7852_p3 = pneg %p7851_p2 }
 0x397   : > { %p7857_p8 = pnand %p7856_p6, %p7852_p3 }
 0x399   : > { %7860 = shalt.err (!%p7857_p8)
}
 0x39a   : > { %s7906_s9 = smov 128   ;;  %s7907_s11 = smov 8  }
 0x39b   : > { %7427 = dma.vmem_to_hbm [thread:$0]  (%p7976_p5), %s11277_s12, 4096, %s11275_s16, %s11283_s22, %s7906_s9, %s7906_s9, %s7907_s11  }
 0x39c PF: > { %p7439_p9 = scmp.ge.s32.totalorder %s7899_s21, 2  ;;  %s5717_s14 = sand.u32 1, %s7887_s18  }
 0x39d   : > { %p11581_p10 = scmp.ne.s32.totalorder %s11356_s29, 0  ;;  %s5718_s15 = scalar_lea.sflag [#allocation5], %s5717_s14 }
 0x39f   : > { %p7434_p11 = pnand %p7439_p9, %p11581_p10 }
 0x3a1   : > { %p7435_p12 = pneg %p7434_p11 }
 0x3a3   : > { %7882 = dma.done.wait (%p7435_p12), %s5718_s15, 4096  }
 0x3a4   : > { %7884 = vsyncadd (%p7435_p12), %s5718_s15, 4294963200  ;;  %p16_p13 = scmp.ge.s32.totalorder %s7963_s24, 4   ;;  %s11582_s18 = smov %s7891_s19 }
 0x3a5   : > { %s11583_s19 = smov %s7895_s20  ;;  %s11584_s20 = smov %s7974_s27 }
 0x3a6   : > { %s11585_s21 = smov %s7963_s24  ;;  %18 = sbr.rel (!%p16_p13) target bundleno = 4 (0x4), region = 86 }
 0x3ab   :  { %5723 = vsyncpa [#allocation4], 1 }
 0x3ac   :  { %5725 = vsyncpa [#allocation4 + $0x1], 1 }
 0x3ad   :  { %5726 = vsyncpa [#allocation5], 1 }
 0x3ae   :  { %5728 = vsyncpa [#allocation5 + $0x1], 1 }

</bundles_post_ra>
